<compile_context>
chip_gen: v6e
topology: v6e:2x2x1
jax: 0.10.0
libtpu: 0.0.40
codegen_flags: <defaults>
</compile_context>

<pallas_src>
import functools
import math

import jax
import jax.numpy as jnp
from jax.experimental import pallas as pl
from jax.experimental.pallas import tpu as pltpu


_UNROLL_LIMIT = 8  # fully unroll the refinement loop up to this many iterations


# ----------------------------------------------------------------------------
# small math helpers usable both inside the kernel and in the JAX reference
# ----------------------------------------------------------------------------
def _rmsnorm(x, w, eps=1e-6):
    rms = jax.lax.rsqrt(jnp.mean(x * x, axis=-1, keepdims=True) + eps)
    return x * rms * w


def _gelu_tanh(x):
    # tanh-approximate GELU: routes the transcendental through the EUP slot.
    c = math.sqrt(2.0 / math.pi)
    return 0.5 * x * (1.0 + jnp.tanh(c * (x + 0.044715 * x * x * x)))


# ----------------------------------------------------------------------------
# Pallas kernel: one grid step == Lb layers' PrefixGenerator forward
# ----------------------------------------------------------------------------
def prefix_gen_kernel(ctx_ref, s0_ref,
                      n1_ref, n2_ref, n3_ref, non_ref,
                      wq_ref, bq_ref, wkv_ref, bkv_ref,
                      w1_ref, b1_ref, w2_ref, b2_ref, wp_ref, bp_ref,
                      states_ref, prefix_ref,
                      *, num_iterations, unroll_limit):
    Lb, S, H = ctx_ref.shape
    H4 = w1_ref.shape[1]
    H2 = wkv_ref.shape[1]
    Hm = wp_ref.shape[1]
    bf16 = jnp.bfloat16
    f32 = jnp.float32

    s = s0_ref[:, 0, :]                                   # [Lb, H] f32

    # Pre-broadcast tiny per-row params ONCE (used every iteration).
    n1b = jnp.broadcast_to(n1_ref[...], (Lb, H))
    n2b = jnp.broadcast_to(n2_ref[...], (Lb, H))
    bqb = jnp.broadcast_to(bq_ref[...], (Lb, H))           # already /sqrt(H)
    b1b = jnp.broadcast_to(b1_ref[...], (Lb, H4))
    b2b = jnp.broadcast_to(b2_ref[...], (Lb, H))

    # ---- key/value for all Lb contexts: a single [Lb*S, H] @ [H, 2H] bf16
    # matmul (wk/wv fused in the wrapper).  S % 8 == 0 keeps the reshape a
    # pure view for f32.
    ctx2d = ctx_ref[...].reshape(Lb * S, H)
    kv = (jnp.dot(ctx2d.astype(bf16), wkv_ref[...],
                  preferred_element_type=f32)
          + jnp.broadcast_to(bkv_ref[...], (Lb * S, H2)))
    k = kv[:, :H].reshape(Lb, S, H)                        # score scale folded into wq
    v = kv[:, H:].reshape(Lb, S, H)

    def one_iteration(s):
        # --- cross-attention of the [Lb, H] state block against the context
        s_norm = _rmsnorm(s, n1b)
        q = (jnp.dot(s_norm.astype(bf16), wq_ref[...],
                     preferred_element_type=f32) + bqb)     # [Lb, H], pre-scaled
        scores = jnp.einsum('lqh,lkh->lqk', q[:, None, :], k,
                            preferred_element_type=f32)     # [Lb, 1, S]
        scores = scores - jnp.max(scores, axis=-1, keepdims=True)
        e = jnp.exp(scores)
        attn = e * pl.reciprocal(jnp.sum(e, axis=-1, keepdims=True),
                                 approx=True)
        ctx_att = jnp.einsum('lqk,lkh->lqh', attn, v,
                             preferred_element_type=f32)    # [Lb, 1, H]
        s = s + ctx_att[:, 0, :]

        # --- MLP block (weights read at point of use, bf16 into the MXU)
        s_norm2 = _rmsnorm(s, n2b)
        h = (jnp.dot(s_norm2.astype(bf16), w1_ref[...],
                     preferred_element_type=f32) + b1b)     # [Lb, 4H]
        h = _gelu_tanh(h)
        s = s + (jnp.dot(h.astype(bf16), w2_ref[...],
                         preferred_element_type=f32) + b2b)
        return s

    if num_iterations <= unroll_limit:
        # Small static trip count: fully unroll, batch the states writeback
        # into one full-tile lane-dense store.
        states = []
        for _ in range(num_iterations):
            s = one_iteration(s)
            states.append(s)
        states_ref[...] = jnp.stack(states, axis=1)         # [Lb, T, H]
    else:
        # Production-sized T: bound instruction stream / vreg live ranges.
        def body(i, s):
            s = one_iteration(s)
            states_ref[:, pl.ds(i, 1), :] = s[:, None, :]
            return s
        s = jax.lax.fori_loop(0, num_iterations, body, s)

    # state_to_prefix_projection: output_norm(state_projection(norm3(s)))
    s3 = _rmsnorm(s, jnp.broadcast_to(n3_ref[...], (Lb, H)))
    proj = (jnp.dot(s3.astype(bf16), wp_ref[...],
                    preferred_element_type=f32)
            + jnp.broadcast_to(bp_ref[...], (Lb, Hm)))
    prefix_ref[:, 0, :] = _rmsnorm(proj, jnp.broadcast_to(non_ref[...], (Lb, Hm)))


# ----------------------------------------------------------------------------
# wrapper
# ----------------------------------------------------------------------------
def _pick_vmem_limit(bytes_needed):
    cap = None
    try:
        cap = getattr(pltpu.get_tpu_info(), "vmem_capacity_bytes", None)
    except Exception:
        cap = None
    if not cap:
        cap = 64 * 1024 * 1024          # conservative default (v7x per-TC VMEM)
    # leave ~12% headroom for compiler-internal scratch
    return int(max(32 * 1024 * 1024, min(0.88 * cap, bytes_needed)))


def update_prefixes(contexts, init_states, params, num_iterations,
                    layers_per_block=None, vmem_limit_bytes=None):
    """Pallas equivalent of TestTimePrefixModel.update_prefix_given_hidden_states
    (shared generator, explicit initial states, batch_size == 1)."""
    L, S, H = contexts.shape
    Hm = params["wp"].shape[1]
    T = int(num_iterations)

    assert H % 128 == 0 and Hm % 128 == 0, "hidden sizes must be lane-dense"
    assert S % 8 == 0, "seq len must be a multiple of 8 (f32 sublane)"

    if layers_per_block is None:
        if L <= 16:
            layers_per_block = L        # tiny L: one block, no grid-step overhead
        else:
            # largest divisor of L that fills (<=) the 256-wide MXU M dimension
            layers_per_block = max(d for d in range(1, min(L, 256) + 1)
                                   if L % d == 0)
    Lb = layers_per_block
    assert L % Lb == 0, "layer count must be divisible by layers_per_block"
    n_blocks = L // Lb

    # --- parameter preprocessing: fuse wk/wv, fold 1/sqrt(H) into wq/bq,
    #     cast the big matrices to bf16 (MXU inputs).
    inv = 1.0 / math.sqrt(H)
    bf16 = jnp.bfloat16
    weights = [
        params["n1"], params["n2"], params["n3"], params["non"],
        (params["wq"] * inv).astype(bf16), params["bq"] * inv,
        jnp.concatenate([params["wk"], params["wv"]], axis=1).astype(bf16),
        jnp.concatenate([params["bk"], params["bv"]], axis=1),
        params["w1"].astype(bf16), params["b1"],
        params["w2"].astype(bf16), params["b2"],
        params["wp"].astype(bf16), params["bp"],
    ]

    def full_spec(arr):
        nd = arr.ndim
        return pl.BlockSpec(arr.shape, lambda b, nd=nd: (0,) * nd)

    in_specs = ([pl.BlockSpec((Lb, S, H), lambda b: (b, 0, 0)),    # contexts
                 pl.BlockSpec((Lb, 1, H), lambda b: (b, 0, 0))]    # initial states
                + [full_spec(w) for w in weights])

    out_specs = [pl.BlockSpec((Lb, T, H), lambda b: (b, 0, 0)),    # states_iters
                 pl.BlockSpec((Lb, 1, Hm), lambda b: (b, 0, 0))]   # prefix
    out_shape = [jax.ShapeDtypeStruct((L, T, H), jnp.float32),
                 jax.ShapeDtypeStruct((L, 1, Hm), jnp.float32)]

    # --- VMEM budget: double-buffered blocked I/O + resident weights +
    #     live intermediates, with headroom; clamped per device generation.
    if vmem_limit_bytes is None:
        block_io = 4 * (Lb * S * H + Lb * H + Lb * T * H + Lb * Hm)
        weight_bytes = sum(int(w.size) * w.dtype.itemsize for w in weights)
        live = 4 * (Lb * S * 2 * H + 2 * Lb * S * H + Lb * 4 * H)
        needed = int(1.25 * (2 * (block_io + weight_bytes) + live)) + (4 << 20)
        vmem_limit_bytes = _pick_vmem_limit(needed)

    kernel = functools.partial(prefix_gen_kernel,
                               num_iterations=T, unroll_limit=_UNROLL_LIMIT)

    states_all, prefix_all = pl.pallas_call(
        kernel,
        grid=(n_blocks,),
        in_specs=in_specs,
        out_specs=out_specs,
        out_shape=out_shape,
        compiler_params=pltpu.CompilerParams(
            dimension_semantics=("parallel",),
            vmem_limit_bytes=vmem_limit_bytes),
    )(contexts, init_states, *weights)

    # Mirror the stacking done in update_prefix_given_hidden_states:
    #   current_prefixes = stack(prefix.unsqueeze(1))  -> [L, 1, 1, Hm]
    #   current_states   = stack(states_iters[:, -1])  -> [L, 1, H]
    current_prefixes = prefix_all[:, None, :, :]
    current_states = states_all[:, -1][:, None, :]
    return states_all, current_prefixes, current_states


# ----------------------------------------------------------------------------
# pure-JAX reference (module semantics: f32, exact GELU, exact softmax)
# ----------------------------------------------------------------------------
def reference(contexts, init_states, params, num_iterations):
    L, S, H = contexts.shape
    all_states, all_prefixes = [], []
    for l in range(L):
        ctx = contexts[l]
        s = init_states[l]
        k = ctx @ params["wk"] + params["bk"]
        v = ctx @ params["wv"] + params["bv"]
        states = []
        for _ in range(num_iterations):
            sn = _rmsnorm(s, params["n1"])
            q = sn @ params["wq"] + params["bq"]
            scores = (q @ k.T) / math.sqrt(H)
            attn = jax.nn.softmax(scores, axis=-1)
            s = s + attn @ v
            sn2 = _rmsnorm(s, params["n2"])
            h = sn2 @ params["w1"] + params["b1"]
            h = 0.5 * h * (1.0 + jax.scipy.special.erf(h / math.sqrt(2.0)))
            s = s + h @ params["w2"] + params["b2"]
            states.append(s)
        states = jnp.concatenate(states, axis=0)          # [T, H]
        s3 = _rmsnorm(s, params["n3"])
        proj = s3 @ params["wp"] + params["bp"]
        prefix = _rmsnorm(proj, params["non"])            # [1, Hm]
        all_states.append(states)
        all_prefixes.append(prefix)
    states_all = jnp.stack(all_states, axis=0)            # [L, T, H]
    prefix_all = jnp.stack(all_prefixes, axis=0)          # [L, 1, Hm]
    return states_all, prefix_all[:, None, :, :], states_all[:, -1][:, None, :]


# ----------------------------------------------------------------------------
if __name__ == "__main__":
    # Small synthetic config: 4 target layers ("all" mode), seq=8,
    # generator hidden == model hidden == 128 (lane-dense), 6 refinement
    # iterations.  With L=4 the Lb heuristic picks a single grid step (Lb=L).
    L, S, H, Hm, T = 4, 8, 128, 128, 6

    key = jax.random.PRNGKey(0)
    ks = jax.random.split(key, 16)

    def lin(kk, fan_in, shape):
        bound = 1.0 / math.sqrt(fan_in)
        return jax.random.uniform(kk, shape, jnp.float32, -bound, bound)

    # Deterministic parameters (shapes follow PrefixGenerator.__init__;
    # weights stored as [in, out], norm weights initialised to ones).
    params = {
        "wq": lin(ks[0], H, (H, H)),         "bq": lin(ks[1], H, (1, H)),
        "wk": lin(ks[2], H, (H, H)),         "bk": lin(ks[3], H, (1, H)),
        "wv": lin(ks[4], H, (H, H)),         "bv": lin(ks[5], H, (1, H)),
        "w1": lin(ks[6], H, (H, 4 * H)),     "b1": lin(ks[7], H, (1, 4 * H)),
        "w2": lin(ks[8], 4 * H, (4 * H, H)), "b2": lin(ks[9], 4 * H, (1, H)),
        "wp": lin(ks[10], H, (H, Hm)),       "bp": lin(ks[11], H, (1, Hm)),
        "n1": jnp.ones((1, H), jnp.float32),
        "n2": jnp.ones((1, H), jnp.float32),
        "n3": jnp.ones((1, H), jnp.float32),
        "non": jnp.ones((1, Hm), jnp.float32),
    }

    # Per-layer "hidden states" used as context and explicit initial states
    # (PrefixGenerator's initial_state branch, init_std = 1/sqrt(H)).
    contexts = jax.random.normal(ks[12], (L, S, H), jnp.float32)
    init_states = jax.random.normal(ks[13], (L, 1, H), jnp.float32) / math.sqrt(H)

    states_all, current_prefixes, current_states = update_prefixes(
        contexts, init_states, params, T)
    jax.block_until_ready((states_all, current_prefixes, current_states))

    ref_states, ref_prefixes, ref_final = reference(
        contexts, init_states, params, T)

    assert states_all.shape == (L, T, H)
    assert current_prefixes.shape == (L, 1, 1, Hm)
    assert current_states.shape == (L, 1, H)

    ok = (bool(jnp.allclose(states_all, ref_states, atol=5e-2, rtol=5e-2)) and
          bool(jnp.allclose(current_prefixes, ref_prefixes, atol=5e-2, rtol=5e-2)) and
          bool(jnp.allclose(current_states, ref_final, atol=5e-2, rtol=5e-2)))

    if ok:
        print("KERNEL_OK")
    else:
        print("MISMATCH",
              float(jnp.max(jnp.abs(states_all - ref_states))),
              float(jnp.max(jnp.abs(current_prefixes - ref_prefixes))))
</pallas_src>

<mosaic_0001>
module attributes {stable_mosaic.version = 11 : i64} {
  func.func @prefix_gen_kernel(%arg0: i32, %arg1: memref<4x8x128xf32, #tpu.memory_space<vmem>>, %arg2: memref<4x1x128xf32, #tpu.memory_space<vmem>>, %arg3: memref<1x128xf32, #tpu.memory_space<vmem>>, %arg4: memref<1x128xf32, #tpu.memory_space<vmem>>, %arg5: memref<1x128xf32, #tpu.memory_space<vmem>>, %arg6: memref<1x128xf32, #tpu.memory_space<vmem>>, %arg7: memref<128x128xbf16, #tpu.memory_space<vmem>>, %arg8: memref<1x128xf32, #tpu.memory_space<vmem>>, %arg9: memref<128x256xbf16, #tpu.memory_space<vmem>>, %arg10: memref<1x256xf32, #tpu.memory_space<vmem>>, %arg11: memref<128x512xbf16, #tpu.memory_space<vmem>>, %arg12: memref<1x512xf32, #tpu.memory_space<vmem>>, %arg13: memref<512x128xbf16, #tpu.memory_space<vmem>>, %arg14: memref<1x128xf32, #tpu.memory_space<vmem>>, %arg15: memref<128x128xbf16, #tpu.memory_space<vmem>>, %arg16: memref<1x128xf32, #tpu.memory_space<vmem>>, %arg17: memref<4x6x128xf32, #tpu.memory_space<vmem>>, %arg18: memref<4x1x128xf32, #tpu.memory_space<vmem>>) attributes {dimension_semantics = [#tpu.dimension_semantics<parallel>], iteration_bounds = array<i64: 1>, scalar_prefetch = 0 : i64, scratch_operands = 0 : i64, tpu.core_type = #tpu.core_type<tc>, window_params = [{transform_indices = @transform_0, window_bounds = array<i64: 4, 8, 128>}, {transform_indices = @transform_1, window_bounds = array<i64: 4, 1, 128>}, {pipeline_mode = #tpu.pipeline_mode<synchronous>, transform_indices = @transform_2, window_bounds = array<i64: 1, 128>}, {pipeline_mode = #tpu.pipeline_mode<synchronous>, transform_indices = @transform_3, window_bounds = array<i64: 1, 128>}, {pipeline_mode = #tpu.pipeline_mode<synchronous>, transform_indices = @transform_4, window_bounds = array<i64: 1, 128>}, {pipeline_mode = #tpu.pipeline_mode<synchronous>, transform_indices = @transform_5, window_bounds = array<i64: 1, 128>}, {pipeline_mode = #tpu.pipeline_mode<synchronous>, transform_indices = @transform_6, window_bounds = array<i64: 128, 128>}, {pipeline_mode = #tpu.pipeline_mode<synchronous>, transform_indices = @transform_7, window_bounds = array<i64: 1, 128>}, {pipeline_mode = #tpu.pipeline_mode<synchronous>, transform_indices = @transform_8, window_bounds = array<i64: 128, 256>}, {pipeline_mode = #tpu.pipeline_mode<synchronous>, transform_indices = @transform_9, window_bounds = array<i64: 1, 256>}, {pipeline_mode = #tpu.pipeline_mode<synchronous>, transform_indices = @transform_10, window_bounds = array<i64: 128, 512>}, {pipeline_mode = #tpu.pipeline_mode<synchronous>, transform_indices = @transform_11, window_bounds = array<i64: 1, 512>}, {pipeline_mode = #tpu.pipeline_mode<synchronous>, transform_indices = @transform_12, window_bounds = array<i64: 512, 128>}, {pipeline_mode = #tpu.pipeline_mode<synchronous>, transform_indices = @transform_13, window_bounds = array<i64: 1, 128>}, {pipeline_mode = #tpu.pipeline_mode<synchronous>, transform_indices = @transform_14, window_bounds = array<i64: 128, 128>}, {pipeline_mode = #tpu.pipeline_mode<synchronous>, transform_indices = @transform_15, window_bounds = array<i64: 1, 128>}, {transform_indices = @transform_16, window_bounds = array<i64: 4, 6, 128>}, {transform_indices = @transform_17, window_bounds = array<i64: 4, 1, 128>}]} {
    %c0 = arith.constant 0 : index
    %c0_0 = arith.constant 0 : index
    %c0_1 = arith.constant 0 : index
    %0 = vector.load %arg2[%c0, %c0_0, %c0_1] : memref<4x1x128xf32, #tpu.memory_space<vmem>>, vector<4x1x128xf32>
    %1 = vector.shape_cast %0 : vector<4x1x128xf32> to vector<4x128xf32>
    %c0_2 = arith.constant 0 : index
    %c0_3 = arith.constant 0 : index
    %2 = vector.load %arg3[%c0_2, %c0_3] : memref<1x128xf32, #tpu.memory_space<vmem>>, vector<1x128xf32>
    %3 = vector.shape_cast %2 : vector<1x128xf32> to vector<1x128xf32>
    %4 = vector.broadcast %3 : vector<1x128xf32> to vector<4x128xf32>
    %c0_4 = arith.constant 0 : index
    %c0_5 = arith.constant 0 : index
    %5 = vector.load %arg4[%c0_4, %c0_5] : memref<1x128xf32, #tpu.memory_space<vmem>>, vector<1x128xf32>
    %6 = vector.shape_cast %5 : vector<1x128xf32> to vector<1x128xf32>
    %7 = vector.broadcast %6 : vector<1x128xf32> to vector<4x128xf32>
    %c0_6 = arith.constant 0 : index
    %c0_7 = arith.constant 0 : index
    %8 = vector.load %arg8[%c0_6, %c0_7] : memref<1x128xf32, #tpu.memory_space<vmem>>, vector<1x128xf32>
    %9 = vector.shape_cast %8 : vector<1x128xf32> to vector<1x128xf32>
    %10 = vector.broadcast %9 : vector<1x128xf32> to vector<4x128xf32>
    %c0_8 = arith.constant 0 : index
    %c0_9 = arith.constant 0 : index
    %11 = vector.load %arg12[%c0_8, %c0_9] : memref<1x512xf32, #tpu.memory_space<vmem>>, vector<1x512xf32>
    %12 = vector.shape_cast %11 : vector<1x512xf32> to vector<1x512xf32>
    %13 = vector.broadcast %12 : vector<1x512xf32> to vector<4x512xf32>
    %c0_10 = arith.constant 0 : index
    %c0_11 = arith.constant 0 : index
    %14 = vector.load %arg14[%c0_10, %c0_11] : memref<1x128xf32, #tpu.memory_space<vmem>>, vector<1x128xf32>
    %15 = vector.shape_cast %14 : vector<1x128xf32> to vector<1x128xf32>
    %16 = vector.broadcast %15 : vector<1x128xf32> to vector<4x128xf32>
    %c0_12 = arith.constant 0 : index
    %c0_13 = arith.constant 0 : index
    %c0_14 = arith.constant 0 : index
    %17 = vector.load %arg1[%c0_12, %c0_13, %c0_14] : memref<4x8x128xf32, #tpu.memory_space<vmem>>, vector<4x8x128xf32>
    %18 = vector.shape_cast %17 : vector<4x8x128xf32> to vector<32x128xf32>
    %19 = arith.truncf %18 : vector<32x128xf32> to vector<32x128xbf16>
    %c0_15 = arith.constant 0 : index
    %c0_16 = arith.constant 0 : index
    %20 = vector.load %arg9[%c0_15, %c0_16] : memref<128x256xbf16, #tpu.memory_space<vmem>>, vector<128x256xbf16>
    %cst = arith.constant dense<0.000000e+00> : vector<32x256xf32>
    %21 = tpu.matmul %19, %20, %cst {dimension_numbers = #tpu.dot_dimension_numbers<[1], [0], [0], [1], [0, 0, 1, 1], [], []>} : vector<32x128xbf16>, vector<128x256xbf16>, vector<32x256xf32> -> vector<32x256xf32>
    %c0_17 = arith.constant 0 : index
    %c0_18 = arith.constant 0 : index
    %22 = vector.load %arg10[%c0_17, %c0_18] : memref<1x256xf32, #tpu.memory_space<vmem>>, vector<1x256xf32>
    %23 = vector.shape_cast %22 : vector<1x256xf32> to vector<1x256xf32>
    %24 = vector.broadcast %23 : vector<1x256xf32> to vector<32x256xf32>
    %25 = arith.addf %21, %24 : vector<32x256xf32>
    %26 = vector.extract_strided_slice %25 {offsets = [0, 0], sizes = [32, 128], strides = [1, 1]} : vector<32x256xf32> to vector<32x128xf32>
    %27 = vector.shape_cast %26 : vector<32x128xf32> to vector<4x8x128xf32>
    %28 = vector.extract_strided_slice %25 {offsets = [0, 128], sizes = [32, 128], strides = [1, 1]} : vector<32x256xf32> to vector<32x128xf32>
    %29 = vector.shape_cast %28 : vector<32x128xf32> to vector<4x8x128xf32>
    %30 = arith.mulf %1, %1 : vector<4x128xf32>
    %cst_19 = arith.constant dense<0.000000e+00> : vector<4xf32>
    %31 = vector.multi_reduction <add>, %30, %cst_19 [1] : vector<4x128xf32> to vector<4xf32>
    %32 = vector.shape_cast %31 : vector<4xf32> to vector<4x1xf32>
    %cst_20 = arith.constant 1.280000e+02 : f32
    %33 = vector.broadcast %cst_20 : f32 to vector<4x1xf32>
    %34 = arith.divf %32, %33 : vector<4x1xf32>
    %cst_21 = arith.constant 9.99999997E-7 : f32
    %35 = vector.broadcast %cst_21 : f32 to vector<4x1xf32>
    %36 = arith.addf %34, %35 : vector<4x1xf32>
    %37 = math.rsqrt %36 : vector<4x1xf32>
    %38 = vector.broadcast %37 : vector<4x1xf32> to vector<4x128xf32>
    %39 = arith.mulf %1, %38 : vector<4x128xf32>
    %40 = arith.mulf %39, %4 : vector<4x128xf32>
    %41 = arith.truncf %40 : vector<4x128xf32> to vector<4x128xbf16>
    %c0_22 = arith.constant 0 : index
    %c0_23 = arith.constant 0 : index
    %42 = vector.load %arg7[%c0_22, %c0_23] : memref<128x128xbf16, #tpu.memory_space<vmem>>, vector<128x128xbf16>
    %cst_24 = arith.constant dense<0.000000e+00> : vector<4x128xf32>
    %43 = tpu.matmul %41, %42, %cst_24 {dimension_numbers = #tpu.dot_dimension_numbers<[1], [0], [0], [1], [0, 0, 1, 1], [], []>} : vector<4x128xbf16>, vector<128x128xbf16>, vector<4x128xf32> -> vector<4x128xf32>
    %44 = arith.addf %43, %10 : vector<4x128xf32>
    %45 = vector.shape_cast %44 : vector<4x128xf32> to vector<4x1x128xf32>
    "tpu.trace_start"() <{level = 10 : i32, message = "lqh,lkh->lqk"}> : () -> ()
    %cst_25 = arith.constant dense<0.000000e+00> : vector<4x1x8xf32>
    %46 = tpu.matmul %45, %27, %cst_25 {dimension_numbers = #tpu.dot_dimension_numbers<[2], [2], [1], [1], [0, 0, 0, 1, 1, 1], [0], [0]>} : vector<4x1x128xf32>, vector<4x8x128xf32>, vector<4x1x8xf32> -> vector<4x1x8xf32>
    "tpu.trace_stop"() : () -> ()
    %cst_26 = arith.constant dense<0xFF800000> : vector<4x1xf32>
    %47 = vector.multi_reduction <maximumf>, %46, %cst_26 [2] : vector<4x1x8xf32> to vector<4x1xf32>
    %48 = vector.shape_cast %47 : vector<4x1xf32> to vector<4x1x1xf32>
    %49 = vector.broadcast %48 : vector<4x1x1xf32> to vector<4x1x8xf32>
    %50 = arith.subf %46, %49 : vector<4x1x8xf32>
    %51 = math.exp %50 : vector<4x1x8xf32>
    %cst_27 = arith.constant dense<0.000000e+00> : vector<4x1xf32>
    %52 = vector.multi_reduction <add>, %51, %cst_27 [2] : vector<4x1x8xf32> to vector<4x1xf32>
    %53 = vector.shape_cast %52 : vector<4x1xf32> to vector<4x1x1xf32>
    %54 = tpu.reciprocal %53 {approx = true} : vector<4x1x1xf32> -> vector<4x1x1xf32>
    %55 = vector.broadcast %54 : vector<4x1x1xf32> to vector<4x1x8xf32>
    %56 = arith.mulf %51, %55 : vector<4x1x8xf32>
    "tpu.trace_start"() <{level = 10 : i32, message = "lqk,lkh->lqh"}> : () -> ()
    %cst_28 = arith.constant dense<0.000000e+00> : vector<4x1x128xf32>
    %57 = tpu.matmul %56, %29, %cst_28 {dimension_numbers = #tpu.dot_dimension_numbers<[2], [1], [1], [2], [0, 0, 0, 1, 1, 2], [0], [0]>} : vector<4x1x8xf32>, vector<4x8x128xf32>, vector<4x1x128xf32> -> vector<4x1x128xf32>
    "tpu.trace_stop"() : () -> ()
    %58 = vector.shape_cast %57 : vector<4x1x128xf32> to vector<4x128xf32>
    %59 = arith.addf %1, %58 : vector<4x128xf32>
    %60 = arith.mulf %59, %59 : vector<4x128xf32>
    %cst_29 = arith.constant dense<0.000000e+00> : vector<4xf32>
    %61 = vector.multi_reduction <add>, %60, %cst_29 [1] : vector<4x128xf32> to vector<4xf32>
    %62 = vector.shape_cast %61 : vector<4xf32> to vector<4x1xf32>
    %cst_30 = arith.constant 1.280000e+02 : f32
    %63 = vector.broadcast %cst_30 : f32 to vector<4x1xf32>
    %64 = arith.divf %62, %63 : vector<4x1xf32>
    %cst_31 = arith.constant 9.99999997E-7 : f32
    %65 = vector.broadcast %cst_31 : f32 to vector<4x1xf32>
    %66 = arith.addf %64, %65 : vector<4x1xf32>
    %67 = math.rsqrt %66 : vector<4x1xf32>
    %68 = vector.broadcast %67 : vector<4x1xf32> to vector<4x128xf32>
    %69 = arith.mulf %59, %68 : vector<4x128xf32>
    %70 = arith.mulf %69, %7 : vector<4x128xf32>
    %71 = arith.truncf %70 : vector<4x128xf32> to vector<4x128xbf16>
    %c0_32 = arith.constant 0 : index
    %c0_33 = arith.constant 0 : index
    %72 = vector.load %arg11[%c0_32, %c0_33] : memref<128x512xbf16, #tpu.memory_space<vmem>>, vector<128x512xbf16>
    %cst_34 = arith.constant dense<0.000000e+00> : vector<4x512xf32>
    %73 = tpu.matmul %71, %72, %cst_34 {dimension_numbers = #tpu.dot_dimension_numbers<[1], [0], [0], [1], [0, 0, 1, 1], [], []>} : vector<4x128xbf16>, vector<128x512xbf16>, vector<4x512xf32> -> vector<4x512xf32>
    %74 = arith.addf %73, %13 : vector<4x512xf32>
    %cst_35 = arith.constant 5.000000e-01 : f32
    %75 = vector.broadcast %cst_35 : f32 to vector<4x512xf32>
    %76 = arith.mulf %75, %74 : vector<4x512xf32>
    %cst_36 = arith.constant 4.471500e-02 : f32
    %77 = vector.broadcast %cst_36 : f32 to vector<4x512xf32>
    %78 = arith.mulf %77, %74 : vector<4x512xf32>
    %79 = arith.mulf %78, %74 : vector<4x512xf32>
    %80 = arith.mulf %79, %74 : vector<4x512xf32>
    %81 = arith.addf %74, %80 : vector<4x512xf32>
    %cst_37 = arith.constant 0.797884583 : f32
    %82 = vector.broadcast %cst_37 : f32 to vector<4x512xf32>
    %83 = arith.mulf %82, %81 : vector<4x512xf32>
    %84 = math.tanh %83 : vector<4x512xf32>
    %cst_38 = arith.constant 1.000000e+00 : f32
    %85 = vector.broadcast %cst_38 : f32 to vector<4x512xf32>
    %86 = arith.addf %85, %84 : vector<4x512xf32>
    %87 = arith.mulf %76, %86 : vector<4x512xf32>
    %88 = arith.truncf %87 : vector<4x512xf32> to vector<4x512xbf16>
    %c0_39 = arith.constant 0 : index
    %c0_40 = arith.constant 0 : index
    %89 = vector.load %arg13[%c0_39, %c0_40] : memref<512x128xbf16, #tpu.memory_space<vmem>>, vector<512x128xbf16>
    %cst_41 = arith.constant dense<0.000000e+00> : vector<4x128xf32>
    %90 = tpu.matmul %88, %89, %cst_41 {dimension_numbers = #tpu.dot_dimension_numbers<[1], [0], [0], [1], [0, 0, 1, 1], [], []>} : vector<4x512xbf16>, vector<512x128xbf16>, vector<4x128xf32> -> vector<4x128xf32>
    %91 = arith.addf %90, %16 : vector<4x128xf32>
    %92 = arith.addf %59, %91 : vector<4x128xf32>
    %93 = arith.mulf %92, %92 : vector<4x128xf32>
    %cst_42 = arith.constant dense<0.000000e+00> : vector<4xf32>
    %94 = vector.multi_reduction <add>, %93, %cst_42 [1] : vector<4x128xf32> to vector<4xf32>
    %95 = vector.shape_cast %94 : vector<4xf32> to vector<4x1xf32>
    %cst_43 = arith.constant 1.280000e+02 : f32
    %96 = vector.broadcast %cst_43 : f32 to vector<4x1xf32>
    %97 = arith.divf %95, %96 : vector<4x1xf32>
    %cst_44 = arith.constant 9.99999997E-7 : f32
    %98 = vector.broadcast %cst_44 : f32 to vector<4x1xf32>
    %99 = arith.addf %97, %98 : vector<4x1xf32>
    %100 = math.rsqrt %99 : vector<4x1xf32>
    %101 = vector.broadcast %100 : vector<4x1xf32> to vector<4x128xf32>
    %102 = arith.mulf %92, %101 : vector<4x128xf32>
    %103 = arith.mulf %102, %4 : vector<4x128xf32>
    %104 = arith.truncf %103 : vector<4x128xf32> to vector<4x128xbf16>
    %c0_45 = arith.constant 0 : index
    %c0_46 = arith.constant 0 : index
    %105 = vector.load %arg7[%c0_45, %c0_46] : memref<128x128xbf16, #tpu.memory_space<vmem>>, vector<128x128xbf16>
    %cst_47 = arith.constant dense<0.000000e+00> : vector<4x128xf32>
    %106 = tpu.matmul %104, %105, %cst_47 {dimension_numbers = #tpu.dot_dimension_numbers<[1], [0], [0], [1], [0, 0, 1, 1], [], []>} : vector<4x128xbf16>, vector<128x128xbf16>, vector<4x128xf32> -> vector<4x128xf32>
    %107 = arith.addf %106, %10 : vector<4x128xf32>
    %108 = vector.shape_cast %107 : vector<4x128xf32> to vector<4x1x128xf32>
    "tpu.trace_start"() <{level = 10 : i32, message = "lqh,lkh->lqk"}> : () -> ()
    %cst_48 = arith.constant dense<0.000000e+00> : vector<4x1x8xf32>
    %109 = tpu.matmul %108, %27, %cst_48 {dimension_numbers = #tpu.dot_dimension_numbers<[2], [2], [1], [1], [0, 0, 0, 1, 1, 1], [0], [0]>} : vector<4x1x128xf32>, vector<4x8x128xf32>, vector<4x1x8xf32> -> vector<4x1x8xf32>
    "tpu.trace_stop"() : () -> ()
    %cst_49 = arith.constant dense<0xFF800000> : vector<4x1xf32>
    %110 = vector.multi_reduction <maximumf>, %109, %cst_49 [2] : vector<4x1x8xf32> to vector<4x1xf32>
    %111 = vector.shape_cast %110 : vector<4x1xf32> to vector<4x1x1xf32>
    %112 = vector.broadcast %111 : vector<4x1x1xf32> to vector<4x1x8xf32>
    %113 = arith.subf %109, %112 : vector<4x1x8xf32>
    %114 = math.exp %113 : vector<4x1x8xf32>
    %cst_50 = arith.constant dense<0.000000e+00> : vector<4x1xf32>
    %115 = vector.multi_reduction <add>, %114, %cst_50 [2] : vector<4x1x8xf32> to vector<4x1xf32>
    %116 = vector.shape_cast %115 : vector<4x1xf32> to vector<4x1x1xf32>
    %117 = tpu.reciprocal %116 {approx = true} : vector<4x1x1xf32> -> vector<4x1x1xf32>
    %118 = vector.broadcast %117 : vector<4x1x1xf32> to vector<4x1x8xf32>
    %119 = arith.mulf %114, %118 : vector<4x1x8xf32>
    "tpu.trace_start"() <{level = 10 : i32, message = "lqk,lkh->lqh"}> : () -> ()
    %cst_51 = arith.constant dense<0.000000e+00> : vector<4x1x128xf32>
    %120 = tpu.matmul %119, %29, %cst_51 {dimension_numbers = #tpu.dot_dimension_numbers<[2], [1], [1], [2], [0, 0, 0, 1, 1, 2], [0], [0]>} : vector<4x1x8xf32>, vector<4x8x128xf32>, vector<4x1x128xf32> -> vector<4x1x128xf32>
    "tpu.trace_stop"() : () -> ()
    %121 = vector.shape_cast %120 : vector<4x1x128xf32> to vector<4x128xf32>
    %122 = arith.addf %92, %121 : vector<4x128xf32>
    %123 = arith.mulf %122, %122 : vector<4x128xf32>
    %cst_52 = arith.constant dense<0.000000e+00> : vector<4xf32>
    %124 = vector.multi_reduction <add>, %123, %cst_52 [1] : vector<4x128xf32> to vector<4xf32>
    %125 = vector.shape_cast %124 : vector<4xf32> to vector<4x1xf32>
    %cst_53 = arith.constant 1.280000e+02 : f32
    %126 = vector.broadcast %cst_53 : f32 to vector<4x1xf32>
    %127 = arith.divf %125, %126 : vector<4x1xf32>
    %cst_54 = arith.constant 9.99999997E-7 : f32
    %128 = vector.broadcast %cst_54 : f32 to vector<4x1xf32>
    %129 = arith.addf %127, %128 : vector<4x1xf32>
    %130 = math.rsqrt %129 : vector<4x1xf32>
    %131 = vector.broadcast %130 : vector<4x1xf32> to vector<4x128xf32>
    %132 = arith.mulf %122, %131 : vector<4x128xf32>
    %133 = arith.mulf %132, %7 : vector<4x128xf32>
    %134 = arith.truncf %133 : vector<4x128xf32> to vector<4x128xbf16>
    %c0_55 = arith.constant 0 : index
    %c0_56 = arith.constant 0 : index
    %135 = vector.load %arg11[%c0_55, %c0_56] : memref<128x512xbf16, #tpu.memory_space<vmem>>, vector<128x512xbf16>
    %cst_57 = arith.constant dense<0.000000e+00> : vector<4x512xf32>
    %136 = tpu.matmul %134, %135, %cst_57 {dimension_numbers = #tpu.dot_dimension_numbers<[1], [0], [0], [1], [0, 0, 1, 1], [], []>} : vector<4x128xbf16>, vector<128x512xbf16>, vector<4x512xf32> -> vector<4x512xf32>
    %137 = arith.addf %136, %13 : vector<4x512xf32>
    %cst_58 = arith.constant 5.000000e-01 : f32
    %138 = vector.broadcast %cst_58 : f32 to vector<4x512xf32>
    %139 = arith.mulf %138, %137 : vector<4x512xf32>
    %cst_59 = arith.constant 4.471500e-02 : f32
    %140 = vector.broadcast %cst_59 : f32 to vector<4x512xf32>
    %141 = arith.mulf %140, %137 : vector<4x512xf32>
    %142 = arith.mulf %141, %137 : vector<4x512xf32>
    %143 = arith.mulf %142, %137 : vector<4x512xf32>
    %144 = arith.addf %137, %143 : vector<4x512xf32>
    %cst_60 = arith.constant 0.797884583 : f32
    %145 = vector.broadcast %cst_60 : f32 to vector<4x512xf32>
    %146 = arith.mulf %145, %144 : vector<4x512xf32>
    %147 = math.tanh %146 : vector<4x512xf32>
    %cst_61 = arith.constant 1.000000e+00 : f32
    %148 = vector.broadcast %cst_61 : f32 to vector<4x512xf32>
    %149 = arith.addf %148, %147 : vector<4x512xf32>
    %150 = arith.mulf %139, %149 : vector<4x512xf32>
    %151 = arith.truncf %150 : vector<4x512xf32> to vector<4x512xbf16>
    %c0_62 = arith.constant 0 : index
    %c0_63 = arith.constant 0 : index
    %152 = vector.load %arg13[%c0_62, %c0_63] : memref<512x128xbf16, #tpu.memory_space<vmem>>, vector<512x128xbf16>
    %cst_64 = arith.constant dense<0.000000e+00> : vector<4x128xf32>
    %153 = tpu.matmul %151, %152, %cst_64 {dimension_numbers = #tpu.dot_dimension_numbers<[1], [0], [0], [1], [0, 0, 1, 1], [], []>} : vector<4x512xbf16>, vector<512x128xbf16>, vector<4x128xf32> -> vector<4x128xf32>
    %154 = arith.addf %153, %16 : vector<4x128xf32>
    %155 = arith.addf %122, %154 : vector<4x128xf32>
    %156 = arith.mulf %155, %155 : vector<4x128xf32>
    %cst_65 = arith.constant dense<0.000000e+00> : vector<4xf32>
    %157 = vector.multi_reduction <add>, %156, %cst_65 [1] : vector<4x128xf32> to vector<4xf32>
    %158 = vector.shape_cast %157 : vector<4xf32> to vector<4x1xf32>
    %cst_66 = arith.constant 1.280000e+02 : f32
    %159 = vector.broadcast %cst_66 : f32 to vector<4x1xf32>
    %160 = arith.divf %158, %159 : vector<4x1xf32>
    %cst_67 = arith.constant 9.99999997E-7 : f32
    %161 = vector.broadcast %cst_67 : f32 to vector<4x1xf32>
    %162 = arith.addf %160, %161 : vector<4x1xf32>
    %163 = math.rsqrt %162 : vector<4x1xf32>
    %164 = vector.broadcast %163 : vector<4x1xf32> to vector<4x128xf32>
    %165 = arith.mulf %155, %164 : vector<4x128xf32>
    %166 = arith.mulf %165, %4 : vector<4x128xf32>
    %167 = arith.truncf %166 : vector<4x128xf32> to vector<4x128xbf16>
    %c0_68 = arith.constant 0 : index
    %c0_69 = arith.constant 0 : index
    %168 = vector.load %arg7[%c0_68, %c0_69] : memref<128x128xbf16, #tpu.memory_space<vmem>>, vector<128x128xbf16>
    %cst_70 = arith.constant dense<0.000000e+00> : vector<4x128xf32>
    %169 = tpu.matmul %167, %168, %cst_70 {dimension_numbers = #tpu.dot_dimension_numbers<[1], [0], [0], [1], [0, 0, 1, 1], [], []>} : vector<4x128xbf16>, vector<128x128xbf16>, vector<4x128xf32> -> vector<4x128xf32>
    %170 = arith.addf %169, %10 : vector<4x128xf32>
    %171 = vector.shape_cast %170 : vector<4x128xf32> to vector<4x1x128xf32>
    "tpu.trace_start"() <{level = 10 : i32, message = "lqh,lkh->lqk"}> : () -> ()
    %cst_71 = arith.constant dense<0.000000e+00> : vector<4x1x8xf32>
    %172 = tpu.matmul %171, %27, %cst_71 {dimension_numbers = #tpu.dot_dimension_numbers<[2], [2], [1], [1], [0, 0, 0, 1, 1, 1], [0], [0]>} : vector<4x1x128xf32>, vector<4x8x128xf32>, vector<4x1x8xf32> -> vector<4x1x8xf32>
    "tpu.trace_stop"() : () -> ()
    %cst_72 = arith.constant dense<0xFF800000> : vector<4x1xf32>
    %173 = vector.multi_reduction <maximumf>, %172, %cst_72 [2] : vector<4x1x8xf32> to vector<4x1xf32>
    %174 = vector.shape_cast %173 : vector<4x1xf32> to vector<4x1x1xf32>
    %175 = vector.broadcast %174 : vector<4x1x1xf32> to vector<4x1x8xf32>
    %176 = arith.subf %172, %175 : vector<4x1x8xf32>
    %177 = math.exp %176 : vector<4x1x8xf32>
    %cst_73 = arith.constant dense<0.000000e+00> : vector<4x1xf32>
    %178 = vector.multi_reduction <add>, %177, %cst_73 [2] : vector<4x1x8xf32> to vector<4x1xf32>
    %179 = vector.shape_cast %178 : vector<4x1xf32> to vector<4x1x1xf32>
    %180 = tpu.reciprocal %179 {approx = true} : vector<4x1x1xf32> -> vector<4x1x1xf32>
    %181 = vector.broadcast %180 : vector<4x1x1xf32> to vector<4x1x8xf32>
    %182 = arith.mulf %177, %181 : vector<4x1x8xf32>
    "tpu.trace_start"() <{level = 10 : i32, message = "lqk,lkh->lqh"}> : () -> ()
    %cst_74 = arith.constant dense<0.000000e+00> : vector<4x1x128xf32>
    %183 = tpu.matmul %182, %29, %cst_74 {dimension_numbers = #tpu.dot_dimension_numbers<[2], [1], [1], [2], [0, 0, 0, 1, 1, 2], [0], [0]>} : vector<4x1x8xf32>, vector<4x8x128xf32>, vector<4x1x128xf32> -> vector<4x1x128xf32>
    "tpu.trace_stop"() : () -> ()
    %184 = vector.shape_cast %183 : vector<4x1x128xf32> to vector<4x128xf32>
    %185 = arith.addf %155, %184 : vector<4x128xf32>
    %186 = arith.mulf %185, %185 : vector<4x128xf32>
    %cst_75 = arith.constant dense<0.000000e+00> : vector<4xf32>
    %187 = vector.multi_reduction <add>, %186, %cst_75 [1] : vector<4x128xf32> to vector<4xf32>
    %188 = vector.shape_cast %187 : vector<4xf32> to vector<4x1xf32>
    %cst_76 = arith.constant 1.280000e+02 : f32
    %189 = vector.broadcast %cst_76 : f32 to vector<4x1xf32>
    %190 = arith.divf %188, %189 : vector<4x1xf32>
    %cst_77 = arith.constant 9.99999997E-7 : f32
    %191 = vector.broadcast %cst_77 : f32 to vector<4x1xf32>
    %192 = arith.addf %190, %191 : vector<4x1xf32>
    %193 = math.rsqrt %192 : vector<4x1xf32>
    %194 = vector.broadcast %193 : vector<4x1xf32> to vector<4x128xf32>
    %195 = arith.mulf %185, %194 : vector<4x128xf32>
    %196 = arith.mulf %195, %7 : vector<4x128xf32>
    %197 = arith.truncf %196 : vector<4x128xf32> to vector<4x128xbf16>
    %c0_78 = arith.constant 0 : index
    %c0_79 = arith.constant 0 : index
    %198 = vector.load %arg11[%c0_78, %c0_79] : memref<128x512xbf16, #tpu.memory_space<vmem>>, vector<128x512xbf16>
    %cst_80 = arith.constant dense<0.000000e+00> : vector<4x512xf32>
    %199 = tpu.matmul %197, %198, %cst_80 {dimension_numbers = #tpu.dot_dimension_numbers<[1], [0], [0], [1], [0, 0, 1, 1], [], []>} : vector<4x128xbf16>, vector<128x512xbf16>, vector<4x512xf32> -> vector<4x512xf32>
    %200 = arith.addf %199, %13 : vector<4x512xf32>
    %cst_81 = arith.constant 5.000000e-01 : f32
    %201 = vector.broadcast %cst_81 : f32 to vector<4x512xf32>
    %202 = arith.mulf %201, %200 : vector<4x512xf32>
    %cst_82 = arith.constant 4.471500e-02 : f32
    %203 = vector.broadcast %cst_82 : f32 to vector<4x512xf32>
    %204 = arith.mulf %203, %200 : vector<4x512xf32>
    %205 = arith.mulf %204, %200 : vector<4x512xf32>
    %206 = arith.mulf %205, %200 : vector<4x512xf32>
    %207 = arith.addf %200, %206 : vector<4x512xf32>
    %cst_83 = arith.constant 0.797884583 : f32
    %208 = vector.broadcast %cst_83 : f32 to vector<4x512xf32>
    %209 = arith.mulf %208, %207 : vector<4x512xf32>
    %210 = math.tanh %209 : vector<4x512xf32>
    %cst_84 = arith.constant 1.000000e+00 : f32
    %211 = vector.broadcast %cst_84 : f32 to vector<4x512xf32>
    %212 = arith.addf %211, %210 : vector<4x512xf32>
    %213 = arith.mulf %202, %212 : vector<4x512xf32>
    %214 = arith.truncf %213 : vector<4x512xf32> to vector<4x512xbf16>
    %c0_85 = arith.constant 0 : index
    %c0_86 = arith.constant 0 : index
    %215 = vector.load %arg13[%c0_85, %c0_86] : memref<512x128xbf16, #tpu.memory_space<vmem>>, vector<512x128xbf16>
    %cst_87 = arith.constant dense<0.000000e+00> : vector<4x128xf32>
    %216 = tpu.matmul %214, %215, %cst_87 {dimension_numbers = #tpu.dot_dimension_numbers<[1], [0], [0], [1], [0, 0, 1, 1], [], []>} : vector<4x512xbf16>, vector<512x128xbf16>, vector<4x128xf32> -> vector<4x128xf32>
    %217 = arith.addf %216, %16 : vector<4x128xf32>
    %218 = arith.addf %185, %217 : vector<4x128xf32>
    %219 = arith.mulf %218, %218 : vector<4x128xf32>
    %cst_88 = arith.constant dense<0.000000e+00> : vector<4xf32>
    %220 = vector.multi_reduction <add>, %219, %cst_88 [1] : vector<4x128xf32> to vector<4xf32>
    %221 = vector.shape_cast %220 : vector<4xf32> to vector<4x1xf32>
    %cst_89 = arith.constant 1.280000e+02 : f32
    %222 = vector.broadcast %cst_89 : f32 to vector<4x1xf32>
    %223 = arith.divf %221, %222 : vector<4x1xf32>
    %cst_90 = arith.constant 9.99999997E-7 : f32
    %224 = vector.broadcast %cst_90 : f32 to vector<4x1xf32>
    %225 = arith.addf %223, %224 : vector<4x1xf32>
    %226 = math.rsqrt %225 : vector<4x1xf32>
    %227 = vector.broadcast %226 : vector<4x1xf32> to vector<4x128xf32>
    %228 = arith.mulf %218, %227 : vector<4x128xf32>
    %229 = arith.mulf %228, %4 : vector<4x128xf32>
    %230 = arith.truncf %229 : vector<4x128xf32> to vector<4x128xbf16>
    %c0_91 = arith.constant 0 : index
    %c0_92 = arith.constant 0 : index
    %231 = vector.load %arg7[%c0_91, %c0_92] : memref<128x128xbf16, #tpu.memory_space<vmem>>, vector<128x128xbf16>
    %cst_93 = arith.constant dense<0.000000e+00> : vector<4x128xf32>
    %232 = tpu.matmul %230, %231, %cst_93 {dimension_numbers = #tpu.dot_dimension_numbers<[1], [0], [0], [1], [0, 0, 1, 1], [], []>} : vector<4x128xbf16>, vector<128x128xbf16>, vector<4x128xf32> -> vector<4x128xf32>
    %233 = arith.addf %232, %10 : vector<4x128xf32>
    %234 = vector.shape_cast %233 : vector<4x128xf32> to vector<4x1x128xf32>
    "tpu.trace_start"() <{level = 10 : i32, message = "lqh,lkh->lqk"}> : () -> ()
    %cst_94 = arith.constant dense<0.000000e+00> : vector<4x1x8xf32>
    %235 = tpu.matmul %234, %27, %cst_94 {dimension_numbers = #tpu.dot_dimension_numbers<[2], [2], [1], [1], [0, 0, 0, 1, 1, 1], [0], [0]>} : vector<4x1x128xf32>, vector<4x8x128xf32>, vector<4x1x8xf32> -> vector<4x1x8xf32>
    "tpu.trace_stop"() : () -> ()
    %cst_95 = arith.constant dense<0xFF800000> : vector<4x1xf32>
    %236 = vector.multi_reduction <maximumf>, %235, %cst_95 [2] : vector<4x1x8xf32> to vector<4x1xf32>
    %237 = vector.shape_cast %236 : vector<4x1xf32> to vector<4x1x1xf32>
    %238 = vector.broadcast %237 : vector<4x1x1xf32> to vector<4x1x8xf32>
    %239 = arith.subf %235, %238 : vector<4x1x8xf32>
    %240 = math.exp %239 : vector<4x1x8xf32>
    %cst_96 = arith.constant dense<0.000000e+00> : vector<4x1xf32>
    %241 = vector.multi_reduction <add>, %240, %cst_96 [2] : vector<4x1x8xf32> to vector<4x1xf32>
    %242 = vector.shape_cast %241 : vector<4x1xf32> to vector<4x1x1xf32>
    %243 = tpu.reciprocal %242 {approx = true} : vector<4x1x1xf32> -> vector<4x1x1xf32>
    %244 = vector.broadcast %243 : vector<4x1x1xf32> to vector<4x1x8xf32>
    %245 = arith.mulf %240, %244 : vector<4x1x8xf32>
    "tpu.trace_start"() <{level = 10 : i32, message = "lqk,lkh->lqh"}> : () -> ()
    %cst_97 = arith.constant dense<0.000000e+00> : vector<4x1x128xf32>
    %246 = tpu.matmul %245, %29, %cst_97 {dimension_numbers = #tpu.dot_dimension_numbers<[2], [1], [1], [2], [0, 0, 0, 1, 1, 2], [0], [0]>} : vector<4x1x8xf32>, vector<4x8x128xf32>, vector<4x1x128xf32> -> vector<4x1x128xf32>
    "tpu.trace_stop"() : () -> ()
    %247 = vector.shape_cast %246 : vector<4x1x128xf32> to vector<4x128xf32>
    %248 = arith.addf %218, %247 : vector<4x128xf32>
    %249 = arith.mulf %248, %248 : vector<4x128xf32>
    %cst_98 = arith.constant dense<0.000000e+00> : vector<4xf32>
    %250 = vector.multi_reduction <add>, %249, %cst_98 [1] : vector<4x128xf32> to vector<4xf32>
    %251 = vector.shape_cast %250 : vector<4xf32> to vector<4x1xf32>
    %cst_99 = arith.constant 1.280000e+02 : f32
    %252 = vector.broadcast %cst_99 : f32 to vector<4x1xf32>
    %253 = arith.divf %251, %252 : vector<4x1xf32>
    %cst_100 = arith.constant 9.99999997E-7 : f32
    %254 = vector.broadcast %cst_100 : f32 to vector<4x1xf32>
    %255 = arith.addf %253, %254 : vector<4x1xf32>
    %256 = math.rsqrt %255 : vector<4x1xf32>
    %257 = vector.broadcast %256 : vector<4x1xf32> to vector<4x128xf32>
    %258 = arith.mulf %248, %257 : vector<4x128xf32>
    %259 = arith.mulf %258, %7 : vector<4x128xf32>
    %260 = arith.truncf %259 : vector<4x128xf32> to vector<4x128xbf16>
    %c0_101 = arith.constant 0 : index
    %c0_102 = arith.constant 0 : index
    %261 = vector.load %arg11[%c0_101, %c0_102] : memref<128x512xbf16, #tpu.memory_space<vmem>>, vector<128x512xbf16>
    %cst_103 = arith.constant dense<0.000000e+00> : vector<4x512xf32>
    %262 = tpu.matmul %260, %261, %cst_103 {dimension_numbers = #tpu.dot_dimension_numbers<[1], [0], [0], [1], [0, 0, 1, 1], [], []>} : vector<4x128xbf16>, vector<128x512xbf16>, vector<4x512xf32> -> vector<4x512xf32>
    %263 = arith.addf %262, %13 : vector<4x512xf32>
    %cst_104 = arith.constant 5.000000e-01 : f32
    %264 = vector.broadcast %cst_104 : f32 to vector<4x512xf32>
    %265 = arith.mulf %264, %263 : vector<4x512xf32>
    %cst_105 = arith.constant 4.471500e-02 : f32
    %266 = vector.broadcast %cst_105 : f32 to vector<4x512xf32>
    %267 = arith.mulf %266, %263 : vector<4x512xf32>
    %268 = arith.mulf %267, %263 : vector<4x512xf32>
    %269 = arith.mulf %268, %263 : vector<4x512xf32>
    %270 = arith.addf %263, %269 : vector<4x512xf32>
    %cst_106 = arith.constant 0.797884583 : f32
    %271 = vector.broadcast %cst_106 : f32 to vector<4x512xf32>
    %272 = arith.mulf %271, %270 : vector<4x512xf32>
    %273 = math.tanh %272 : vector<4x512xf32>
    %cst_107 = arith.constant 1.000000e+00 : f32
    %274 = vector.broadcast %cst_107 : f32 to vector<4x512xf32>
    %275 = arith.addf %274, %273 : vector<4x512xf32>
    %276 = arith.mulf %265, %275 : vector<4x512xf32>
    %277 = arith.truncf %276 : vector<4x512xf32> to vector<4x512xbf16>
    %c0_108 = arith.constant 0 : index
    %c0_109 = arith.constant 0 : index
    %278 = vector.load %arg13[%c0_108, %c0_109] : memref<512x128xbf16, #tpu.memory_space<vmem>>, vector<512x128xbf16>
    %cst_110 = arith.constant dense<0.000000e+00> : vector<4x128xf32>
    %279 = tpu.matmul %277, %278, %cst_110 {dimension_numbers = #tpu.dot_dimension_numbers<[1], [0], [0], [1], [0, 0, 1, 1], [], []>} : vector<4x512xbf16>, vector<512x128xbf16>, vector<4x128xf32> -> vector<4x128xf32>
    %280 = arith.addf %279, %16 : vector<4x128xf32>
    %281 = arith.addf %248, %280 : vector<4x128xf32>
    %282 = arith.mulf %281, %281 : vector<4x128xf32>
    %cst_111 = arith.constant dense<0.000000e+00> : vector<4xf32>
    %283 = vector.multi_reduction <add>, %282, %cst_111 [1] : vector<4x128xf32> to vector<4xf32>
    %284 = vector.shape_cast %283 : vector<4xf32> to vector<4x1xf32>
    %cst_112 = arith.constant 1.280000e+02 : f32
    %285 = vector.broadcast %cst_112 : f32 to vector<4x1xf32>
    %286 = arith.divf %284, %285 : vector<4x1xf32>
    %cst_113 = arith.constant 9.99999997E-7 : f32
    %287 = vector.broadcast %cst_113 : f32 to vector<4x1xf32>
    %288 = arith.addf %286, %287 : vector<4x1xf32>
    %289 = math.rsqrt %288 : vector<4x1xf32>
    %290 = vector.broadcast %289 : vector<4x1xf32> to vector<4x128xf32>
    %291 = arith.mulf %281, %290 : vector<4x128xf32>
    %292 = arith.mulf %291, %4 : vector<4x128xf32>
    %293 = arith.truncf %292 : vector<4x128xf32> to vector<4x128xbf16>
    %c0_114 = arith.constant 0 : index
    %c0_115 = arith.constant 0 : index
    %294 = vector.load %arg7[%c0_114, %c0_115] : memref<128x128xbf16, #tpu.memory_space<vmem>>, vector<128x128xbf16>
    %cst_116 = arith.constant dense<0.000000e+00> : vector<4x128xf32>
    %295 = tpu.matmul %293, %294, %cst_116 {dimension_numbers = #tpu.dot_dimension_numbers<[1], [0], [0], [1], [0, 0, 1, 1], [], []>} : vector<4x128xbf16>, vector<128x128xbf16>, vector<4x128xf32> -> vector<4x128xf32>
    %296 = arith.addf %295, %10 : vector<4x128xf32>
    %297 = vector.shape_cast %296 : vector<4x128xf32> to vector<4x1x128xf32>
    "tpu.trace_start"() <{level = 10 : i32, message = "lqh,lkh->lqk"}> : () -> ()
    %cst_117 = arith.constant dense<0.000000e+00> : vector<4x1x8xf32>
    %298 = tpu.matmul %297, %27, %cst_117 {dimension_numbers = #tpu.dot_dimension_numbers<[2], [2], [1], [1], [0, 0, 0, 1, 1, 1], [0], [0]>} : vector<4x1x128xf32>, vector<4x8x128xf32>, vector<4x1x8xf32> -> vector<4x1x8xf32>
    "tpu.trace_stop"() : () -> ()
    %cst_118 = arith.constant dense<0xFF800000> : vector<4x1xf32>
    %299 = vector.multi_reduction <maximumf>, %298, %cst_118 [2] : vector<4x1x8xf32> to vector<4x1xf32>
    %300 = vector.shape_cast %299 : vector<4x1xf32> to vector<4x1x1xf32>
    %301 = vector.broadcast %300 : vector<4x1x1xf32> to vector<4x1x8xf32>
    %302 = arith.subf %298, %301 : vector<4x1x8xf32>
    %303 = math.exp %302 : vector<4x1x8xf32>
    %cst_119 = arith.constant dense<0.000000e+00> : vector<4x1xf32>
    %304 = vector.multi_reduction <add>, %303, %cst_119 [2] : vector<4x1x8xf32> to vector<4x1xf32>
    %305 = vector.shape_cast %304 : vector<4x1xf32> to vector<4x1x1xf32>
    %306 = tpu.reciprocal %305 {approx = true} : vector<4x1x1xf32> -> vector<4x1x1xf32>
    %307 = vector.broadcast %306 : vector<4x1x1xf32> to vector<4x1x8xf32>
    %308 = arith.mulf %303, %307 : vector<4x1x8xf32>
    "tpu.trace_start"() <{level = 10 : i32, message = "lqk,lkh->lqh"}> : () -> ()
    %cst_120 = arith.constant dense<0.000000e+00> : vector<4x1x128xf32>
    %309 = tpu.matmul %308, %29, %cst_120 {dimension_numbers = #tpu.dot_dimension_numbers<[2], [1], [1], [2], [0, 0, 0, 1, 1, 2], [0], [0]>} : vector<4x1x8xf32>, vector<4x8x128xf32>, vector<4x1x128xf32> -> vector<4x1x128xf32>
    "tpu.trace_stop"() : () -> ()
    %310 = vector.shape_cast %309 : vector<4x1x128xf32> to vector<4x128xf32>
    %311 = arith.addf %281, %310 : vector<4x128xf32>
    %312 = arith.mulf %311, %311 : vector<4x128xf32>
    %cst_121 = arith.constant dense<0.000000e+00> : vector<4xf32>
    %313 = vector.multi_reduction <add>, %312, %cst_121 [1] : vector<4x128xf32> to vector<4xf32>
    %314 = vector.shape_cast %313 : vector<4xf32> to vector<4x1xf32>
    %cst_122 = arith.constant 1.280000e+02 : f32
    %315 = vector.broadcast %cst_122 : f32 to vector<4x1xf32>
    %316 = arith.divf %314, %315 : vector<4x1xf32>
    %cst_123 = arith.constant 9.99999997E-7 : f32
    %317 = vector.broadcast %cst_123 : f32 to vector<4x1xf32>
    %318 = arith.addf %316, %317 : vector<4x1xf32>
    %319 = math.rsqrt %318 : vector<4x1xf32>
    %320 = vector.broadcast %319 : vector<4x1xf32> to vector<4x128xf32>
    %321 = arith.mulf %311, %320 : vector<4x128xf32>
    %322 = arith.mulf %321, %7 : vector<4x128xf32>
    %323 = arith.truncf %322 : vector<4x128xf32> to vector<4x128xbf16>
    %c0_124 = arith.constant 0 : index
    %c0_125 = arith.constant 0 : index
    %324 = vector.load %arg11[%c0_124, %c0_125] : memref<128x512xbf16, #tpu.memory_space<vmem>>, vector<128x512xbf16>
    %cst_126 = arith.constant dense<0.000000e+00> : vector<4x512xf32>
    %325 = tpu.matmul %323, %324, %cst_126 {dimension_numbers = #tpu.dot_dimension_numbers<[1], [0], [0], [1], [0, 0, 1, 1], [], []>} : vector<4x128xbf16>, vector<128x512xbf16>, vector<4x512xf32> -> vector<4x512xf32>
    %326 = arith.addf %325, %13 : vector<4x512xf32>
    %cst_127 = arith.constant 5.000000e-01 : f32
    %327 = vector.broadcast %cst_127 : f32 to vector<4x512xf32>
    %328 = arith.mulf %327, %326 : vector<4x512xf32>
    %cst_128 = arith.constant 4.471500e-02 : f32
    %329 = vector.broadcast %cst_128 : f32 to vector<4x512xf32>
    %330 = arith.mulf %329, %326 : vector<4x512xf32>
    %331 = arith.mulf %330, %326 : vector<4x512xf32>
    %332 = arith.mulf %331, %326 : vector<4x512xf32>
    %333 = arith.addf %326, %332 : vector<4x512xf32>
    %cst_129 = arith.constant 0.797884583 : f32
    %334 = vector.broadcast %cst_129 : f32 to vector<4x512xf32>
    %335 = arith.mulf %334, %333 : vector<4x512xf32>
    %336 = math.tanh %335 : vector<4x512xf32>
    %cst_130 = arith.constant 1.000000e+00 : f32
    %337 = vector.broadcast %cst_130 : f32 to vector<4x512xf32>
    %338 = arith.addf %337, %336 : vector<4x512xf32>
    %339 = arith.mulf %328, %338 : vector<4x512xf32>
    %340 = arith.truncf %339 : vector<4x512xf32> to vector<4x512xbf16>
    %c0_131 = arith.constant 0 : index
    %c0_132 = arith.constant 0 : index
    %341 = vector.load %arg13[%c0_131, %c0_132] : memref<512x128xbf16, #tpu.memory_space<vmem>>, vector<512x128xbf16>
    %cst_133 = arith.constant dense<0.000000e+00> : vector<4x128xf32>
    %342 = tpu.matmul %340, %341, %cst_133 {dimension_numbers = #tpu.dot_dimension_numbers<[1], [0], [0], [1], [0, 0, 1, 1], [], []>} : vector<4x512xbf16>, vector<512x128xbf16>, vector<4x128xf32> -> vector<4x128xf32>
    %343 = arith.addf %342, %16 : vector<4x128xf32>
    %344 = arith.addf %311, %343 : vector<4x128xf32>
    %345 = arith.mulf %344, %344 : vector<4x128xf32>
    %cst_134 = arith.constant dense<0.000000e+00> : vector<4xf32>
    %346 = vector.multi_reduction <add>, %345, %cst_134 [1] : vector<4x128xf32> to vector<4xf32>
    %347 = vector.shape_cast %346 : vector<4xf32> to vector<4x1xf32>
    %cst_135 = arith.constant 1.280000e+02 : f32
    %348 = vector.broadcast %cst_135 : f32 to vector<4x1xf32>
    %349 = arith.divf %347, %348 : vector<4x1xf32>
    %cst_136 = arith.constant 9.99999997E-7 : f32
    %350 = vector.broadcast %cst_136 : f32 to vector<4x1xf32>
    %351 = arith.addf %349, %350 : vector<4x1xf32>
    %352 = math.rsqrt %351 : vector<4x1xf32>
    %353 = vector.broadcast %352 : vector<4x1xf32> to vector<4x128xf32>
    %354 = arith.mulf %344, %353 : vector<4x128xf32>
    %355 = arith.mulf %354, %4 : vector<4x128xf32>
    %356 = arith.truncf %355 : vector<4x128xf32> to vector<4x128xbf16>
    %c0_137 = arith.constant 0 : index
    %c0_138 = arith.constant 0 : index
    %357 = vector.load %arg7[%c0_137, %c0_138] : memref<128x128xbf16, #tpu.memory_space<vmem>>, vector<128x128xbf16>
    %cst_139 = arith.constant dense<0.000000e+00> : vector<4x128xf32>
    %358 = tpu.matmul %356, %357, %cst_139 {dimension_numbers = #tpu.dot_dimension_numbers<[1], [0], [0], [1], [0, 0, 1, 1], [], []>} : vector<4x128xbf16>, vector<128x128xbf16>, vector<4x128xf32> -> vector<4x128xf32>
    %359 = arith.addf %358, %10 : vector<4x128xf32>
    %360 = vector.shape_cast %359 : vector<4x128xf32> to vector<4x1x128xf32>
    "tpu.trace_start"() <{level = 10 : i32, message = "lqh,lkh->lqk"}> : () -> ()
    %cst_140 = arith.constant dense<0.000000e+00> : vector<4x1x8xf32>
    %361 = tpu.matmul %360, %27, %cst_140 {dimension_numbers = #tpu.dot_dimension_numbers<[2], [2], [1], [1], [0, 0, 0, 1, 1, 1], [0], [0]>} : vector<4x1x128xf32>, vector<4x8x128xf32>, vector<4x1x8xf32> -> vector<4x1x8xf32>
    "tpu.trace_stop"() : () -> ()
    %cst_141 = arith.constant dense<0xFF800000> : vector<4x1xf32>
    %362 = vector.multi_reduction <maximumf>, %361, %cst_141 [2] : vector<4x1x8xf32> to vector<4x1xf32>
    %363 = vector.shape_cast %362 : vector<4x1xf32> to vector<4x1x1xf32>
    %364 = vector.broadcast %363 : vector<4x1x1xf32> to vector<4x1x8xf32>
    %365 = arith.subf %361, %364 : vector<4x1x8xf32>
    %366 = math.exp %365 : vector<4x1x8xf32>
    %cst_142 = arith.constant dense<0.000000e+00> : vector<4x1xf32>
    %367 = vector.multi_reduction <add>, %366, %cst_142 [2] : vector<4x1x8xf32> to vector<4x1xf32>
    %368 = vector.shape_cast %367 : vector<4x1xf32> to vector<4x1x1xf32>
    %369 = tpu.reciprocal %368 {approx = true} : vector<4x1x1xf32> -> vector<4x1x1xf32>
    %370 = vector.broadcast %369 : vector<4x1x1xf32> to vector<4x1x8xf32>
    %371 = arith.mulf %366, %370 : vector<4x1x8xf32>
    "tpu.trace_start"() <{level = 10 : i32, message = "lqk,lkh->lqh"}> : () -> ()
    %cst_143 = arith.constant dense<0.000000e+00> : vector<4x1x128xf32>
    %372 = tpu.matmul %371, %29, %cst_143 {dimension_numbers = #tpu.dot_dimension_numbers<[2], [1], [1], [2], [0, 0, 0, 1, 1, 2], [0], [0]>} : vector<4x1x8xf32>, vector<4x8x128xf32>, vector<4x1x128xf32> -> vector<4x1x128xf32>
    "tpu.trace_stop"() : () -> ()
    %373 = vector.shape_cast %372 : vector<4x1x128xf32> to vector<4x128xf32>
    %374 = arith.addf %344, %373 : vector<4x128xf32>
    %375 = arith.mulf %374, %374 : vector<4x128xf32>
    %cst_144 = arith.constant dense<0.000000e+00> : vector<4xf32>
    %376 = vector.multi_reduction <add>, %375, %cst_144 [1] : vector<4x128xf32> to vector<4xf32>
    %377 = vector.shape_cast %376 : vector<4xf32> to vector<4x1xf32>
    %cst_145 = arith.constant 1.280000e+02 : f32
    %378 = vector.broadcast %cst_145 : f32 to vector<4x1xf32>
    %379 = arith.divf %377, %378 : vector<4x1xf32>
    %cst_146 = arith.constant 9.99999997E-7 : f32
    %380 = vector.broadcast %cst_146 : f32 to vector<4x1xf32>
    %381 = arith.addf %379, %380 : vector<4x1xf32>
    %382 = math.rsqrt %381 : vector<4x1xf32>
    %383 = vector.broadcast %382 : vector<4x1xf32> to vector<4x128xf32>
    %384 = arith.mulf %374, %383 : vector<4x128xf32>
    %385 = arith.mulf %384, %7 : vector<4x128xf32>
    %386 = arith.truncf %385 : vector<4x128xf32> to vector<4x128xbf16>
    %c0_147 = arith.constant 0 : index
    %c0_148 = arith.constant 0 : index
    %387 = vector.load %arg11[%c0_147, %c0_148] : memref<128x512xbf16, #tpu.memory_space<vmem>>, vector<128x512xbf16>
    %cst_149 = arith.constant dense<0.000000e+00> : vector<4x512xf32>
    %388 = tpu.matmul %386, %387, %cst_149 {dimension_numbers = #tpu.dot_dimension_numbers<[1], [0], [0], [1], [0, 0, 1, 1], [], []>} : vector<4x128xbf16>, vector<128x512xbf16>, vector<4x512xf32> -> vector<4x512xf32>
    %389 = arith.addf %388, %13 : vector<4x512xf32>
    %cst_150 = arith.constant 5.000000e-01 : f32
    %390 = vector.broadcast %cst_150 : f32 to vector<4x512xf32>
    %391 = arith.mulf %390, %389 : vector<4x512xf32>
    %cst_151 = arith.constant 4.471500e-02 : f32
    %392 = vector.broadcast %cst_151 : f32 to vector<4x512xf32>
    %393 = arith.mulf %392, %389 : vector<4x512xf32>
    %394 = arith.mulf %393, %389 : vector<4x512xf32>
    %395 = arith.mulf %394, %389 : vector<4x512xf32>
    %396 = arith.addf %389, %395 : vector<4x512xf32>
    %cst_152 = arith.constant 0.797884583 : f32
    %397 = vector.broadcast %cst_152 : f32 to vector<4x512xf32>
    %398 = arith.mulf %397, %396 : vector<4x512xf32>
    %399 = math.tanh %398 : vector<4x512xf32>
    %cst_153 = arith.constant 1.000000e+00 : f32
    %400 = vector.broadcast %cst_153 : f32 to vector<4x512xf32>
    %401 = arith.addf %400, %399 : vector<4x512xf32>
    %402 = arith.mulf %391, %401 : vector<4x512xf32>
    %403 = arith.truncf %402 : vector<4x512xf32> to vector<4x512xbf16>
    %c0_154 = arith.constant 0 : index
    %c0_155 = arith.constant 0 : index
    %404 = vector.load %arg13[%c0_154, %c0_155] : memref<512x128xbf16, #tpu.memory_space<vmem>>, vector<512x128xbf16>
    %cst_156 = arith.constant dense<0.000000e+00> : vector<4x128xf32>
    %405 = tpu.matmul %403, %404, %cst_156 {dimension_numbers = #tpu.dot_dimension_numbers<[1], [0], [0], [1], [0, 0, 1, 1], [], []>} : vector<4x512xbf16>, vector<512x128xbf16>, vector<4x128xf32> -> vector<4x128xf32>
    %406 = arith.addf %405, %16 : vector<4x128xf32>
    %407 = arith.addf %374, %406 : vector<4x128xf32>
    %408 = vector.shape_cast %92 : vector<4x128xf32> to vector<4x1x128xf32>
    %409 = vector.shape_cast %155 : vector<4x128xf32> to vector<4x1x128xf32>
    %410 = vector.shape_cast %218 : vector<4x128xf32> to vector<4x1x128xf32>
    %411 = vector.shape_cast %281 : vector<4x128xf32> to vector<4x1x128xf32>
    %412 = vector.shape_cast %344 : vector<4x128xf32> to vector<4x1x128xf32>
    %413 = vector.shape_cast %407 : vector<4x128xf32> to vector<4x1x128xf32>
    %414 = tpu.concatenate %408, %409, %410, %411, %412, %413 in 1 : vector<4x1x128xf32>, vector<4x1x128xf32>, vector<4x1x128xf32>, vector<4x1x128xf32>, vector<4x1x128xf32>, vector<4x1x128xf32> -> vector<4x6x128xf32>
    %c0_157 = arith.constant 0 : index
    %c0_158 = arith.constant 0 : index
    %c0_159 = arith.constant 0 : index
    %415 = vector.load %arg17[%c0_157, %c0_158, %c0_159] : memref<4x6x128xf32, #tpu.memory_space<vmem>>, vector<4x6x128xf32>
    tpu.vector_store %arg17[%c0_157, %c0_158, %c0_159], %414 {strides = array<i32>} : memref<4x6x128xf32, #tpu.memory_space<vmem>>, vector<4x6x128xf32>,
    %c0_160 = arith.constant 0 : index
    %c0_161 = arith.constant 0 : index
    %416 = vector.load %arg5[%c0_160, %c0_161] : memref<1x128xf32, #tpu.memory_space<vmem>>, vector<1x128xf32>
    %417 = vector.shape_cast %416 : vector<1x128xf32> to vector<1x128xf32>
    %418 = vector.broadcast %417 : vector<1x128xf32> to vector<4x128xf32>
    %419 = arith.mulf %407, %407 : vector<4x128xf32>
    %cst_162 = arith.constant dense<0.000000e+00> : vector<4xf32>
    %420 = vector.multi_reduction <add>, %419, %cst_162 [1] : vector<4x128xf32> to vector<4xf32>
    %421 = vector.shape_cast %420 : vector<4xf32> to vector<4x1xf32>
    %cst_163 = arith.constant 1.280000e+02 : f32
    %422 = vector.broadcast %cst_163 : f32 to vector<4x1xf32>
    %423 = arith.divf %421, %422 : vector<4x1xf32>
    %cst_164 = arith.constant 9.99999997E-7 : f32
    %424 = vector.broadcast %cst_164 : f32 to vector<4x1xf32>
    %425 = arith.addf %423, %424 : vector<4x1xf32>
    %426 = math.rsqrt %425 : vector<4x1xf32>
    %427 = vector.broadcast %426 : vector<4x1xf32> to vector<4x128xf32>
    %428 = arith.mulf %407, %427 : vector<4x128xf32>
    %429 = arith.mulf %428, %418 : vector<4x128xf32>
    %430 = arith.truncf %429 : vector<4x128xf32> to vector<4x128xbf16>
    %c0_165 = arith.constant 0 : index
    %c0_166 = arith.constant 0 : index
    %431 = vector.load %arg15[%c0_165, %c0_166] : memref<128x128xbf16, #tpu.memory_space<vmem>>, vector<128x128xbf16>
    %cst_167 = arith.constant dense<0.000000e+00> : vector<4x128xf32>
    %432 = tpu.matmul %430, %431, %cst_167 {dimension_numbers = #tpu.dot_dimension_numbers<[1], [0], [0], [1], [0, 0, 1, 1], [], []>} : vector<4x128xbf16>, vector<128x128xbf16>, vector<4x128xf32> -> vector<4x128xf32>
    %c0_168 = arith.constant 0 : index
    %c0_169 = arith.constant 0 : index
    %433 = vector.load %arg16[%c0_168, %c0_169] : memref<1x128xf32, #tpu.memory_space<vmem>>, vector<1x128xf32>
    %434 = vector.shape_cast %433 : vector<1x128xf32> to vector<1x128xf32>
    %435 = vector.broadcast %434 : vector<1x128xf32> to vector<4x128xf32>
    %436 = arith.addf %432, %435 : vector<4x128xf32>
    %c0_170 = arith.constant 0 : index
    %c0_171 = arith.constant 0 : index
    %437 = vector.load %arg6[%c0_170, %c0_171] : memref<1x128xf32, #tpu.memory_space<vmem>>, vector<1x128xf32>
    %438 = vector.shape_cast %437 : vector<1x128xf32> to vector<1x128xf32>
    %439 = vector.broadcast %438 : vector<1x128xf32> to vector<4x128xf32>
    %440 = arith.mulf %436, %436 : vector<4x128xf32>
    %cst_172 = arith.constant dense<0.000000e+00> : vector<4xf32>
    %441 = vector.multi_reduction <add>, %440, %cst_172 [1] : vector<4x128xf32> to vector<4xf32>
    %442 = vector.shape_cast %441 : vector<4xf32> to vector<4x1xf32>
    %cst_173 = arith.constant 1.280000e+02 : f32
    %443 = vector.broadcast %cst_173 : f32 to vector<4x1xf32>
    %444 = arith.divf %442, %443 : vector<4x1xf32>
    %cst_174 = arith.constant 9.99999997E-7 : f32
    %445 = vector.broadcast %cst_174 : f32 to vector<4x1xf32>
    %446 = arith.addf %444, %445 : vector<4x1xf32>
    %447 = math.rsqrt %446 : vector<4x1xf32>
    %448 = vector.broadcast %447 : vector<4x1xf32> to vector<4x128xf32>
    %449 = arith.mulf %436, %448 : vector<4x128xf32>
    %450 = arith.mulf %449, %439 : vector<4x128xf32>
    %c0_175 = arith.constant 0 : index
    %c0_176 = arith.constant 0 : index
    %c0_177 = arith.constant 0 : index
    %451 = vector.load %arg18[%c0_175, %c0_176, %c0_177] : memref<4x1x128xf32, #tpu.memory_space<vmem>>, vector<4x1x128xf32>
    %452 = vector.shape_cast %451 : vector<4x1x128xf32> to vector<4x128xf32>
    %453 = vector.shape_cast %450 : vector<4x128xf32> to vector<4x1x128xf32>
    tpu.vector_store %arg18[%c0_175, %c0_176, %c0_177], %453 {strides = array<i32>} : memref<4x1x128xf32, #tpu.memory_space<vmem>>, vector<4x1x128xf32>,
    return
  }
  func.func @transform_0(%arg0: i32) -> (i32, i32, i32) {
    %c0_i32 = arith.constant 0 : i32
    %c0_i32_0 = arith.constant 0 : i32
    %c0_i32_1 = arith.constant 0 : i32
    return %arg0, %c0_i32, %c0_i32_0 : i32, i32, i32
  }
  func.func @transform_1(%arg0: i32) -> (i32, i32, i32) {
    %c0_i32 = arith.constant 0 : i32
    %c0_i32_0 = arith.constant 0 : i32
    %c0_i32_1 = arith.constant 0 : i32
    return %arg0, %c0_i32, %c0_i32_0 : i32, i32, i32
  }
  func.func @transform_2(%arg0: i32) -> (i32, i32) {
    %c0_i32 = arith.constant 0 : i32
    %c0_i32_0 = arith.constant 0 : i32
    %c0_i32_1 = arith.constant 0 : i32
    return %c0_i32, %c0_i32_0 : i32, i32
  }
  func.func @transform_3(%arg0: i32) -> (i32, i32) {
    %c0_i32 = arith.constant 0 : i32
    %c0_i32_0 = arith.constant 0 : i32
    %c0_i32_1 = arith.constant 0 : i32
    return %c0_i32, %c0_i32_0 : i32, i32
  }
  func.func @transform_4(%arg0: i32) -> (i32, i32) {
    %c0_i32 = arith.constant 0 : i32
    %c0_i32_0 = arith.constant 0 : i32
    %c0_i32_1 = arith.constant 0 : i32
    return %c0_i32, %c0_i32_0 : i32, i32
  }
  func.func @transform_5(%arg0: i32) -> (i32, i32) {
    %c0_i32 = arith.constant 0 : i32
    %c0_i32_0 = arith.constant 0 : i32
    %c0_i32_1 = arith.constant 0 : i32
    return %c0_i32, %c0_i32_0 : i32, i32
  }
  func.func @transform_6(%arg0: i32) -> (i32, i32) {
    %c0_i32 = arith.constant 0 : i32
    %c0_i32_0 = arith.constant 0 : i32
    %c0_i32_1 = arith.constant 0 : i32
    return %c0_i32, %c0_i32_0 : i32, i32
  }
  func.func @transform_7(%arg0: i32) -> (i32, i32) {
    %c0_i32 = arith.constant 0 : i32
    %c0_i32_0 = arith.constant 0 : i32
    %c0_i32_1 = arith.constant 0 : i32
    return %c0_i32, %c0_i32_0 : i32, i32
  }
  func.func @transform_8(%arg0: i32) -> (i32, i32) {
    %c0_i32 = arith.constant 0 : i32
    %c0_i32_0 = arith.constant 0 : i32
    %c0_i32_1 = arith.constant 0 : i32
    return %c0_i32, %c0_i32_0 : i32, i32
  }
  func.func @transform_9(%arg0: i32) -> (i32, i32) {
    %c0_i32 = arith.constant 0 : i32
    %c0_i32_0 = arith.constant 0 : i32
    %c0_i32_1 = arith.constant 0 : i32
    return %c0_i32, %c0_i32_0 : i32, i32
  }
  func.func @transform_10(%arg0: i32) -> (i32, i32) {
    %c0_i32 = arith.constant 0 : i32
    %c0_i32_0 = arith.constant 0 : i32
    %c0_i32_1 = arith.constant 0 : i32
    return %c0_i32, %c0_i32_0 : i32, i32
  }
  func.func @transform_11(%arg0: i32) -> (i32, i32) {
    %c0_i32 = arith.constant 0 : i32
    %c0_i32_0 = arith.constant 0 : i32
    %c0_i32_1 = arith.constant 0 : i32
    return %c0_i32, %c0_i32_0 : i32, i32
  }
  func.func @transform_12(%arg0: i32) -> (i32, i32) {
    %c0_i32 = arith.constant 0 : i32
    %c0_i32_0 = arith.constant 0 : i32
    %c0_i32_1 = arith.constant 0 : i32
    return %c0_i32, %c0_i32_0 : i32, i32
  }
  func.func @transform_13(%arg0: i32) -> (i32, i32) {
    %c0_i32 = arith.constant 0 : i32
    %c0_i32_0 = arith.constant 0 : i32
    %c0_i32_1 = arith.constant 0 : i32
    return %c0_i32, %c0_i32_0 : i32, i32
  }
  func.func @transform_14(%arg0: i32) -> (i32, i32) {
    %c0_i32 = arith.constant 0 : i32
    %c0_i32_0 = arith.constant 0 : i32
    %c0_i32_1 = arith.constant 0 : i32
    return %c0_i32, %c0_i32_0 : i32, i32
  }
  func.func @transform_15(%arg0: i32) -> (i32, i32) {
    %c0_i32 = arith.constant 0 : i32
    %c0_i32_0 = arith.constant 0 : i32
    %c0_i32_1 = arith.constant 0 : i32
    return %c0_i32, %c0_i32_0 : i32, i32
  }
  func.func @transform_16(%arg0: i32) -> (i32, i32, i32) {
    %c0_i32 = arith.constant 0 : i32
    %c0_i32_0 = arith.constant 0 : i32
    %c0_i32_1 = arith.constant 0 : i32
    return %arg0, %c0_i32, %c0_i32_0 : i32, i32, i32
  }
  func.func @transform_17(%arg0: i32) -> (i32, i32, i32) {
    %c0_i32 = arith.constant 0 : i32
    %c0_i32_0 = arith.constant 0 : i32
    %c0_i32_1 = arith.constant 0 : i32
    return %arg0, %c0_i32, %c0_i32_0 : i32, i32, i32
  }
}

</mosaic_0001>

<bundles_post_ra>
// kernel: tpu_custom_call.1
= control target key start
LH: loop header
LB: loop body
LE: loop exit
PB: predicated region body
PF: predicated region fallthrough
CT: control target
= control target key end

     0   :  { %s14128_s0 = inlined_call_operand.hbm [shape: f32[4,8,128], index: 0, kind: input, shape index: {}]   ;;  %s14129_s1 = inlined_call_operand.hbm [shape: f32[4,1,128], index: 1, kind: input, shape index: {}]   ;;  %s14130_s2 = inlined_call_operand.vmem [shape: f32[1,128], index: 2, kind: input, shape index: {}]   ;;  %s14131_s3 = inlined_call_operand.hbm [shape: f32[1,128], index: 3, kind: input, shape index: {}]   ;;  %s14132_s4 = inlined_call_operand.hbm [shape: f32[1,128], index: 4, kind: input, shape index: {}]   ;;  %s14133_s5 = inlined_call_operand.vmem [shape: f32[1,128], index: 5, kind: input, shape index: {}]   ;;  %s14134_s6 = inlined_call_operand.hbm [shape: bf16[128,128], index: 6, kind: input, shape index: {}]   ;;  %s14135_s7 = inlined_call_operand.vmem [shape: f32[1,128], index: 7, kind: input, shape index: {}]   ;;  %s14136_s8 = inlined_call_operand.hbm [shape: bf16[128,256], index: 8, kind: input, shape index: {}]   ;;  %s14137_s9 = inlined_call_operand.vmem [shape: f32[1,256], index: 9, kind: input, shape index: {}]   ;;  %s14138_s10 = inlined_call_operand.hbm [shape: bf16[128,512], index: 10, kind: input, shape index: {}]   ;;  %s14139_s11 = inlined_call_operand.vmem [shape: f32[1,512], index: 11, kind: input, shape index: {}]   ;;  %s14140_s12 = inlined_call_operand.hbm [shape: bf16[512,128], index: 12, kind: input, shape index: {}]   ;;  %s14141_s13 = inlined_call_operand.vmem [shape: f32[1,128], index: 13, kind: input, shape index: {}]   ;;  %s14142_s14 = inlined_call_operand.hbm [shape: bf16[128,128], index: 14, kind: input, shape index: {}]   ;;  %s14143_s15 = inlined_call_operand.vmem [shape: f32[1,128], index: 15, kind: input, shape index: {}]   ;;  %s14144_s16 = inlined_call_operand.vmem [shape: f32[4,6,128], index: 16, kind: output, shape index: {0}]   ;;  %s14145_s17 = inlined_call_operand.hbm [shape: f32[4,1,128], index: 17, kind: output, shape index: {1}]  }
   0x1   :  { %14163 = sst [smem:[#allocation34_spill]] %s14128_s0 }
   0x2   :  { %14164 = sst [smem:[#allocation35_spill]] %s14129_s1 }
   0x3   :  { %23 = vsyncpa [#allocation3], 0 }
   0x4   :  { %24 = vsyncpa [#allocation6], 0 }
   0x5   :  { %25 = vsyncpa [#allocation9], 0 }
   0x6   :  { %26 = vsyncpa [#allocation12], 0 }
   0x7   :  { %27 = vsyncpa [#allocation15], 0 }
   0x8   :  { %28 = vsyncpa [#allocation4], 0  ;;  %s12849_s24 = smov [#allocation5]  }
   0x9   :  { %s46_s25 = sshll.u32 %s12849_s24, 4  ;;  %s47_s25 = int_to_ptr.vmem [resolvable:$true] %s46_s25 }
   0xa   :  { %s12645_s26 = scalar_lea.vmem %s47_s25, 64  ;;  %p12650_p1 = scmp.lt.s32.totalorder %s47_s25, %s47_s25 }
   0xb   :  { %p12646_p0 = scmp.ne.s32.totalorder %s47_s25, %s12645_s26  ;;  %p12651_p2 = scmp.lt.s32.totalorder %s12645_s26, %s12645_s26 }
   0xd   :  { %p12652_p3 = por %p12651_p2, %p12650_p1 }
   0xf   :  { %p12653_p4 = pnand %p12652_p3, %p12646_p0 }
  0x11   :  { %12656 = shalt.err (!%p12653_p4)
}
  0x12   :  { %s14147_s27 = smov 16   ;;  %s14146_s28 = smov 1  }
  0x13   :  { %s14165_s30 = sld [smem:[#allocation35_spill]]  ;;  %s12852_s18 = smov [#allocation8]  }
  0x14   :  { %s71_s19 = sshll.u32 %s12852_s18, 4  ;;  %s72_s19 = int_to_ptr.vmem [resolvable:$true] %s71_s19 }
  0x15   :  { %s12665_s1 = scalar_lea.vmem %s72_s19, 16  ;;  %s12669_s20 = scalar_lea.vmem %s72_s19, 32 }
  0x16   :  { %p12666_p5 = scmp.ne.s32.totalorder %s72_s19, %s12665_s1  ;;  %p12670_p6 = scmp.lt.s32.totalorder %s72_s19, %s72_s19 }
  0x17   :  { %p12671_p7 = scmp.lt.s32.totalorder %s12669_s20, %s12665_s1 }
  0x19   :  { %52 = dma.hbm_to_vmem [thread:$0]  %s14165_s30, 64, %s47_s25, [#allocation6], %s14147_s27, %s14147_s27, %s14146_s28  }
  0x1a   :  { %p12672_p8 = por %p12671_p7, %p12670_p6 }
  0x1c   :  { %p12673_p9 = pnand %p12672_p8, %p12666_p5 }
  0x1e   :  { %12676 = shalt.err (!%p12673_p9)
}
  0x1f   :  { %74 = dma.hbm_to_vmem [thread:$0]  %s14132_s4, 16, %s72_s19, [#allocation9]  }
  0x20   :  { %s12853_s23 = smov [#allocation11]  }
  0x21   :  { %s96_s24 = sshll.u32 %s12853_s23, 4  ;;  %s97_s24 = int_to_ptr.vmem [resolvable:$true] %s96_s24 }
  0x22   :  { %s12685_s26 = scalar_lea.vmem %s97_s24, 2048  ;;  %p12690_p11 = scmp.lt.s32.totalorder %s97_s24, %s97_s24 }
  0x23   :  { %p12686_p10 = scmp.ne.s32.totalorder %s97_s24, %s12685_s26  ;;  %p12691_p12 = scmp.lt.s32.totalorder %s12685_s26, %s12685_s26 }
  0x25   :  { %p12692_p13 = por %p12691_p12, %p12690_p11 }
  0x27   :  { %p12693_p0 = pnand %p12692_p13, %p12686_p10 }
  0x29   :  { %12696 = shalt.err (!%p12693_p0)
}
  0x2a   :  { %s12854_s25 = smov 128   ;;  %s12855_s29 = smov 8  }
  0x2b   :  { %102 = dma.hbm_to_vmem [thread:$0]  %s14136_s8, 2048, %s97_s24, [#allocation12], %s12854_s25, %s12854_s25, %s12855_s29  }
  0x2c   :  { %s12856_s18 = smov [#allocation14]   ;;  %s12857_s4 = smov [#allocation2]  }
  0x2d   :  { %s124_s1 = sshll.u32 %s12856_s18, 4  ;;  %s34_s19 = sshll.u32 %s12857_s4, 4  ;;  %s125_s1 = int_to_ptr.vmem [resolvable:$true] %s124_s1  ;;  %s35_s19 = int_to_ptr.vmem [resolvable:$true] %s34_s19 }
  0x2e   :  { %s12705_s20 = scalar_lea.vmem %s125_s1, 4096  ;;  %p12710_p2 = scmp.lt.s32.totalorder %s125_s1, %s125_s1 }
  0x2f   :  { %p12706_p1 = scmp.ne.s32.totalorder %s125_s1, %s12705_s20  ;;  %p12711_p3 = scmp.lt.s32.totalorder %s12705_s20, %s12705_s20 }
  0x31   :  { %p12712_p4 = por %p12711_p3, %p12710_p2 }
  0x33   :  { %p12713_p5 = pnand %p12712_p4, %p12706_p1 }
  0x35   :  { %12716 = shalt.err (!%p12713_p5)
}
  0x36   :  { %s12858_s21 = smov 64   ;;  %s12859_s22 = smov 4  }
  0x37   :  { %130 = dma.hbm_to_vmem [thread:$0]  %s14140_s12, 4096, %s125_s1, [#allocation15], %s12858_s21, %s12858_s21, %s12859_s22  }
  0x38   :  { %s12725_s8 = scalar_lea.vmem %s35_s19, 512  ;;  %p12730_p7 = scmp.lt.s32.totalorder %s35_s19, %s35_s19 }
  0x39   :  { %p12726_p6 = scmp.ne.s32.totalorder %s35_s19, %s12725_s8  ;;  %p12731_p8 = scmp.lt.s32.totalorder %s12725_s8, %s12725_s8 }
  0x3b   :  { %p12732_p9 = por %p12731_p8, %p12730_p7 }
  0x3d   :  { %p12733_p10 = pnand %p12732_p9, %p12726_p6 }
  0x3f   :  { %12736 = shalt.err (!%p12733_p10)
}
  0x40   :  { %s14166_s30 = sld [smem:[#allocation34_spill]]  ;;  %s12860_s18 = smov [#allocation7]  }
  0x41   :  { %s61_s4 = sshll.u32 %s12860_s18, 4  ;;  %s12861_s20 = smov [#allocation10]   ;;  %s62_s4 = int_to_ptr.vmem [resolvable:$true] %s61_s4 }
  0x42   :  { %s82_s28 = sshll.u32 %s12861_s20, 4  ;;  %s12745_s27 = scalar_lea.vmem %s62_s4, 16  ;;  %s83_s28 = int_to_ptr.vmem [resolvable:$true] %s82_s28 }
  0x43   :  { %p12746_p11 = scmp.ne.s32.totalorder %s62_s4, %s12745_s27  ;;  %s12749_s12 = scalar_lea.vmem %s62_s4, 32 }
  0x44   :  { %p12750_p12 = scmp.lt.s32.totalorder %s62_s4, %s62_s4  ;;  %p12751_p13 = scmp.lt.s32.totalorder %s12749_s12, %s12745_s27 }
  0x46   :  { %40 = dma.hbm_to_vmem [thread:$0]  %s14166_s30, 512, %s35_s19, [#allocation3], %s12854_s25, %s12854_s25, %s12855_s29  }
  0x47   :  { %p12752_p0 = por %p12751_p13, %p12750_p12 }
  0x49   :  { %p12753_p1 = pnand %p12752_p0, %p12746_p11 }
  0x4b   :  { %12756 = shalt.err (!%p12753_p1)
}
  0x4c   :  { %64 = dma.hbm_to_vmem [thread:$0]  %s14131_s3, 16, %s62_s4, [#allocation6]  }
  0x4d   :  { %s12765_s26 = scalar_lea.vmem %s83_s28, 1024  ;;  %p12770_p3 = scmp.lt.s32.totalorder %s83_s28, %s83_s28 }
  0x4e   :  { %p12766_p2 = scmp.ne.s32.totalorder %s83_s28, %s12765_s26  ;;  %p12771_p4 = scmp.lt.s32.totalorder %s12765_s26, %s12765_s26 }
  0x50   :  { %p12772_p5 = por %p12771_p4, %p12770_p3 }
  0x52   :  { %p12773_p6 = pnand %p12772_p5, %p12766_p2 }
  0x54   :  { %12776 = shalt.err (!%p12773_p6)
}
  0x55   :  { %88 = dma.hbm_to_vmem [thread:$0]  %s14134_s6, 1024, %s83_s28, [#allocation9], %s12858_s21, %s12858_s21, %s12859_s22  }
  0x56   :  { %s12862_s29 = smov [#allocation13]  }
  0x57   :  { %s110_s19 = sshll.u32 %s12862_s29, 4  ;;  %s111_s19 = int_to_ptr.vmem [resolvable:$true] %s110_s19 }
  0x58   :  { %s12785_s8 = scalar_lea.vmem %s111_s19, 4096  ;;  %p12790_p8 = scmp.lt.s32.totalorder %s111_s19, %s111_s19 }
  0x59   :  { %p12786_p7 = scmp.ne.s32.totalorder %s111_s19, %s12785_s8  ;;  %p12791_p9 = scmp.lt.s32.totalorder %s12785_s8, %s12785_s8 }
  0x5b   :  { %p12792_p10 = por %p12791_p9, %p12790_p8 }
  0x5d   :  { %p12793_p11 = pnand %p12792_p10, %p12786_p7 }
  0x5f   :  { %12796 = shalt.err (!%p12793_p11)
}
  0x60   :  { %s12863_s3 = smov 256   ;;  %s14167_s24 = smov 16  }
  0x61   :  { %116 = dma.hbm_to_vmem [thread:$0]  %s14138_s10, 4096, %s111_s19, [#allocation12], %s12863_s3, %s12863_s3, %s14167_s24  }
  0x62   :  { %s12864_s18 = smov [#allocation16]  }
  0x63   :  { %s138_s4 = sshll.u32 %s12864_s18, 4  ;;  %s139_s4 = int_to_ptr.vmem [resolvable:$true] %s138_s4 }
  0x64   :  { %s12805_s6 = scalar_lea.vmem %s139_s4, 1024  ;;  %p12810_p13 = scmp.lt.s32.totalorder %s139_s4, %s139_s4 }
  0x65   :  { %p12806_p12 = scmp.ne.s32.totalorder %s139_s4, %s12805_s6  ;;  %p12811_p0 = scmp.lt.s32.totalorder %s12805_s6, %s12805_s6 }
  0x67   :  { %p12812_p1 = por %p12811_p0, %p12810_p13 }
  0x69   :  { %p12813_p2 = pnand %p12812_p1, %p12806_p12 }
  0x6b   :  { %12816 = shalt.err (!%p12813_p2)
}
  0x6c   :  { %144 = dma.hbm_to_vmem [thread:$0]  %s14142_s14, 1024, %s139_s4, [#allocation15], %s12858_s21, %s12858_s21, %s12859_s22  }
  0x6d   :  { %12837 = dma.done.wait [#allocation3], 512  }
  0x6e   :  { %12838 = vsyncadd [#allocation3], 4294966784 }
  0x6f   :  { %12839 = dma.done.wait [#allocation6], 80  }
  0x70   :  { %12840 = vsyncadd [#allocation6], 4294967216 }
  0x71   :  { %12841 = dma.done.wait [#allocation9], 1040  }
  0x72   :  { %12842 = vsyncadd [#allocation9], 4294966256 }
  0x73   :  { %12843 = dma.done.wait [#allocation12], 6144  }
  0x74   :  { %12844 = vsyncadd [#allocation12], 4294961152 }
  0x75   :  { %12845 = dma.done.wait [#allocation15], 5120  }
  0x76   :  { %12846 = vsyncadd [#allocation15], 4294962176  ;;  %v200_v0 = vlaneseq  ;;  %v12865_v1 = vmov 1966171168   ;;  %v175_v5 = vld [vmem:[#allocation5] sm:$0x1] }
  0x77   :  { %v405_v2 = vunpack.c.l.s4 %v12865_v1  ;;  %v176_v6 = vld [vmem:[#allocation5 + $0x1] sm:$0x1]  ;;  %v177_v7 = vld [vmem:[#allocation5 + $0x2] sm:$0x1]  ;;  %v178_v8 = vld [vmem:[#allocation5 + $0x3] sm:$0x1]  ;;  %v394_v9 = vmul.f32 %v175_v5, %v175_v5 }
  0x78   :  { %v13000_v3 = vshrl.u32 %v200_v0, 7  ;;  %v395_v10 = vmul.f32 %v176_v6, %v176_v6  ;;  %v396_v11 = vmul.f32 %v177_v7, %v177_v7  ;;  %v397_v13 = vmul.f32 %v178_v8, %v178_v8  ;;  %v11897_v14 = vld [vmem:[#allocation11 + $0x74] ss:$8 sps:$4 sm:$0xff]   ;;  %v11899_v15 = vld [vmem:[#allocation11 + $0x70] ss:$8 sps:$4 sm:$0xff]   ;;  %v11914_v34 = vld [vmem:[#allocation10 + $0x28] sm:$0xff]  }
  0x79   :  { %v406_v4 = vunpack.c.0.s8 %v405_v2  ;;  %v11900_v17 = vld [vmem:[#allocation11 + $0x64] ss:$8 sps:$4 sm:$0xff]   ;;  %v11902_v18 = vld [vmem:[#allocation11 + $0x60] ss:$8 sps:$4 sm:$0xff]   ;;  %341 = vmatprep.subr.bf16.mxu0 %v11897_v14  ;;  %vm427_vm0 = vcmask 1043456   ;;  %v11906_v25 = vld [vmem:[#allocation10 + $0x38] sm:$0xff]  }
  0x7a   :  { %v402_v16 = vcombine.low %v394_v9, %v395_v10  ;;  %v403_v19 = vcombine.low %v396_v11, %v397_v13  ;;  %342 = vmatpush1.bf16.msra.mxu0 %v11899_v15  ;;  %v14151_v26 = vmov 0.0   ;;  %v11903_v27 = vld [vmem:[#allocation11 + $0x54] ss:$8 sps:$4 sm:$0xff]   ;;  %v11905_v28 = vld [vmem:[#allocation11 + $0x50] ss:$8 sps:$4 sm:$0xff]   ;;  %v14149_v31 = vmov 0  }
  0x7b   :  { %v13003_v12 = vsub.s32 %v406_v4, %v13000_v3  ;;  %343 = vmatprep.subr.bf16.mxu0 %v11900_v17  ;;  %11496 = vmatprep.subr.bf16.mxu1 %v14151_v26  ;;  %v11907_v29 = vld [vmem:[#allocation11 + $0x44] ss:$8 sps:$4 sm:$0xff]   ;;  %v11910_v30 = vld [vmem:[#allocation10 + $0x30] sm:$0xff]   ;;  %v11909_v32 = vld [vmem:[#allocation11 + $0x40] ss:$8 sps:$4 sm:$0xff]   ;;  %vm12868_vm1 = vmmov 0  }
  0x7c   :  { %11497 = vmatpush3.bf16.msra.mxu1 %v11906_v25  ;;  %373 = vmatprep.mubr.bf16.mxu0 %v14149_v31  ;;  %v11911_v33 = vld [vmem:[#allocation11 + $0x34] ss:$8 sps:$4 sm:$0xff]   ;;  %v11913_v35 = vld [vmem:[#allocation11 + $0x30] ss:$8 sps:$4 sm:$0xff]   ;;  %v11915_v36 = vld [vmem:[#allocation11 + $0x24] ss:$8 sps:$4 sm:$0xff]  }
  0x7d   :  { %v410_v20 = vrot.slane %v402_v16, %v13003_v12  ;;  %v417_v21 = vrot.slane %v403_v19, %v13003_v12  ;;  %11498 = vmatprep.subr.bf16.mxu1 %v14151_v26  ;;  %11512 = vmatprep.mubr.msk.bf16.mxu1 %vm12868_vm1, %v14151_v26  ;;  %v11918_v37 = vld [vmem:[#allocation10 + $0x20] sm:$0xff]   ;;  %v11919_v39 = vld [vmem:[#allocation11 + $0x14] ss:$8 sps:$4 sm:$0xff]   ;;  %v11921_v41 = vld [vmem:[#allocation11 + $0x10] ss:$8 sps:$4 sm:$0xff]   ;;  %v13026_v53 = vsub.s32 0, %v13000_v3 }
  0x7e   :  { %344 = vmatpush1.bf16.msra.mxu0 %v11902_v18  ;;  %v11917_v38 = vld [vmem:[#allocation11 + $0x20] ss:$8 sps:$4 sm:$0xff]   ;;  %v11922_v40 = vld [vmem:[#allocation10 + $0x18] sm:$0xff]   ;;  %v11923_v42 = vld [vmem:[#allocation11 + $0x4] ss:$8 sps:$4 sm:$0xff]   ;;  %v13029_v54 = vsub.s32 1, %v13000_v3 }
  0x7f   :  { %v418_v22 = vcombine.low %v410_v20, %v417_v21  ;;  %345 = vmatprep.subr.bf16.mxu0 %v11903_v27  ;;  %v11926_v43 = vld [vmem:[#allocation10 + $0x10] sm:$0xff]   ;;  %v11925_v44 = vld [vmem:[#allocation11] ss:$8 sps:$4 sm:$0xff]   ;;  %v227_v45 = vld [vmem:[#allocation2] sm:$0xff]  ;;  %v13032_v55 = vsub.s32 2, %v13000_v3  ;;  %v13035_v56 = vsub.s32 3, %v13000_v3 }
  0x80   :  { %11499 = vmatpush3.bf16.msra.mxu1 %v11910_v30  ;;  %v228_v46 = vld [vmem:[#allocation2 + $0x8] sm:$0xff]  ;;  %v11927_v47 = vld [vmem:[#allocation10 + $0x8] sm:$0xff]   ;;  %v230_v51 = vld [vmem:[#allocation2 + $0x18] sm:$0xff]  ;;  %vm521_vm2 = vcmask 1041409   ;;  %vm524_vm3 = vcmask 1042434   ;;  %vm527_vm4 = vcmask 1043459  }
  0x81   :  { %v425_v23 = vrot.slane %v418_v22, %v13003_v12  ;;  %11500 = vmatprep.subr.bf16.mxu1 %v14151_v26  ;;  %v231_v48 = vpack.c.bf16 %v228_v46, %v227_v45  ;;  %v11928_v49 = vld [vmem:[#allocation10] sm:$0xff]   ;;  %v229_v50 = vld [vmem:[#allocation2 + $0x10] sm:$0xff]  ;;  %v10584_v59 = vld [vmem:[%s14130_s2] ss:$0 sm:$0xff]  ;;  %vm928_vm5 = vcmask 57344   ;;  %vm973_vm6 = vcmask 64512  }
  0x82   :  { %346 = vmatpush1.bf16.msra.mxu0 %v11905_v28  ;;  %v232_v52 = vpack.c.bf16 %v230_v51, %v229_v50  ;;  %v466_v61 = vrot.slane %v10584_v59, %v13003_v12  ;;  %v13059_v8 = vld [vmem:[#allocation5] sm:$0x1]  ;;  %v13062_v10 = vld [vmem:[#allocation5 + $0x1] sm:$0x1]  ;;  %v13065_v13 = vld [vmem:[#allocation5 + $0x2] sm:$0x1] }
  0x83   :  { %v428_v24 = vsel %vm427_vm0, %v425_v23, 0.0  ;;  %347 = vmatprep.subr.bf16.mxu0 %v11907_v29  ;;  %v13068_v15 = vld [vmem:[#allocation5 + $0x3] sm:$0x1]  ;;  %vm10249_vm7 = vcmask 1040384   ;;  %vm10254_vm8 = vcmask 1041408   ;;  %vm10259_vm9 = vcmask 1042432  }
  0x84   :  { %429 = vadd.xlane.f32.xlu0 %v428_v24  ;;  %11501 = vmatpush3.bf16.msra.mxu1 %v11914_v34  ;;  %v467_v62 = vcombine.high %v466_v61, %v466_v61  ;;  %v13042_v63 = vrot.slane %v466_v61, %v13003_v12  ;;  %vm10268_vm10 = vcmask 1044480  }
  0x85   :  { %11502 = vmatprep.subr.bf16.mxu1 %v14151_v26 }
  0x86   :  { %348 = vmatpush1.bf16.msra.mxu0 %v11909_v32  ;;  %v13045_v0 = vrot.slane %v467_v62, %v13003_v12  ;;  %v13049_v2 = vcombine.high %v13042_v63, %v13042_v63 }
  0x87   :  { %349 = vmatprep.subr.bf16.mxu0 %v11911_v33 }
  0x88   :  { %11503 = vmatpush3.bf16.msra.mxu1 %v11918_v37  ;;  %v13053_v3 = vcombine.high %v13045_v0, %v13045_v0 }
  0x89   :  { %11504 = vmatprep.subr.bf16.mxu1 %v14151_v26 }
  0x8a   :  { %350 = vmatpush1.bf16.msra.mxu0 %v11913_v35 }
  0x8b   :  { %351 = vmatprep.subr.bf16.mxu0 %v11915_v36 }
  0x8c   :  { %11505 = vmatpush3.bf16.msra.mxu1 %v11922_v40 }
  0x8d   :  { %11506 = vmatprep.subr.bf16.mxu1 %v14151_v26 }
  0x8e   :  { %352 = vmatpush1.bf16.msra.mxu0 %v11917_v38  ;;  %v249_v38 = vld [vmem:[%s14137_s9] sm:$0x3] }
  0x8f   :  { %353 = vmatprep.subr.bf16.mxu0 %v11919_v39  ;;  %v254_v39 = vrot.slane %v249_v38, %v13026_v53  ;;  %v13085_v40 = vrot.slane %v249_v38, %v13029_v54 }
  0x90   :  { %11507 = vmatpush3.bf16.msra.mxu1 %v11926_v43 }
  0x91   :  { %11508 = vmatprep.subr.bf16.mxu1 %v14151_v26 }
  0x92   :  { %354 = vmatpush1.bf16.msra.mxu0 %v11921_v41 }
  0x93   :  { %355 = vmatprep.subr.bf16.mxu0 %v11923_v42 }
  0x94   :  { %11509 = vmatpush3.bf16.msra.mxu1 %v11927_v47 }
  0x95   :  { %11510 = vmatprep.subr.bf16.mxu1 %v14151_v26 }
  0x96   :  { %356 = vmatpush1.bf16.msra.mxu0 %v11925_v44 }
  0x97   :  { %11546 = vmatprep.subr.mxu0 %v14151_v26 }
  0x98   :  { %11511 = vmatpush3.bf16.msra.mxu1 %v11928_v49 }
  0x99   :  { %374 = vmatmul.mubr.bf16.vlgmr.msra.gmra.mxu0 %v231_v48  ;;  %11516 = vmatprep.subr.mxu1 %v14151_v26 }
  0x9a   :  { %383 = vmatprep.mubr.bf16.mxu0 %v14149_v31 }
  0xa1   :  { %384 = vmatmul.mubr.bf16.gmra.mxu0 %v232_v52 }
  0xa2   :  { %11548 = vmatprep.mubr.msk.f32.mxu0 %vm12868_vm1, %v14151_v26 }
 0x10d   :  { %v430_v57 = vpop.xlane.xlu0 %429 }
 0x10e   :  { %v432_v58 = vmul.f32 0.0078125, %v430_v57  ;;  %v13108_v57 = vld [vmem:[%s14135_s7] ss:$0 sm:$0xff] }
 0x110   :  { %v433_v60 = vadd.f32 1e-06, %v432_v58 }
 0x112   :  { %12457 = vrsqrt.f32 %v433_v60 }
 0x11f   :  { %v12458_v1 = vpop.eup %12457 }
 0x120   :  { %v439_v4 = vrot.slane %v12458_v1, %v13026_v53  ;;  %v443_v5 = vrot.slane %v12458_v1, %v13029_v54  ;;  %v447_v6 = vrot.slane %v12458_v1, %v13032_v55  ;;  %v451_v7 = vrot.slane %v12458_v1, %v13035_v56 }
 0x122   :  { %v456_v9 = vmul.f32 %v13059_v8, %v439_v4  ;;  %v457_v11 = vmul.f32 %v13062_v10, %v443_v5  ;;  %v458_v14 = vmul.f32 %v13065_v13, %v447_v6  ;;  %v459_v16 = vmul.f32 %v13068_v15, %v451_v7 }
 0x124   :  { %v488_v17 = vmul.f32 %v13042_v63, %v456_v9  ;;  %v489_v18 = vmul.f32 %v13045_v0, %v457_v11  ;;  %v490_v19 = vmul.f32 %v13049_v2, %v458_v14  ;;  %v491_v20 = vmul.f32 %v13053_v3, %v459_v16 }
 0x126   :  { %v492_v21 = vpack.c.bf16 %v488_v17, %v488_v17  ;;  %v493_v22 = vpack.c.bf16 %v489_v18, %v489_v18  ;;  %v494_v23 = vpack.c.bf16 %v490_v19, %v490_v19  ;;  %v495_v24 = vpack.c.bf16 %v491_v20, %v491_v20 }
 0x128   :  { %v517_v25 = vunpack.c.l.b16 %v493_v22  ;;  %v518_v27 = vunpack.c.l.b16 %v494_v23  ;;  %v519_v28 = vunpack.c.l.b16 %v495_v24  ;;  %v516_v29 = vunpack.c.l.b16 %v492_v21 }
 0x12a   :  { %v520_v30 = vrot.slane %v517_v25, 7  ;;  %v523_v32 = vrot.slane %v518_v27, 6  ;;  %v526_v34 = vrot.slane %v519_v28, 5 }
 0x12c   :  { %v522_v33 = vsel %vm521_vm2, %v520_v30, %v516_v29 }
 0x12d   :  { %v525_v35 = vsel %vm524_vm3, %v523_v32, %v522_v33 }
 0x12e   :  { %v528_v36 = vsel %vm527_vm4, %v526_v34, %v525_v35 }
 0x12f   :  { %v529_v37 = vpack.c.b16 %v528_v36, %v528_v36 }
 0x131   :  { %11513 = vmatmul.mubr.bf16.vlgmr.msra.gmra.mxu1 %v529_v37 }
 0x132   :  { %11518 = vmatprep.mubr.msk.f32.mxu1 %vm12868_vm1, %v14151_v26 }
 0x159   :  { %v375_v41 = vpop.f32.mrf.mxu0 }
 0x15a   :  { %v13087_v42 = vadd.f32 %v375_v41, %v254_v39 }
 0x15b   :  { %v377_v43 = vpop.f32.mrf.mxu0 }
 0x15c   :  { %v13090_v44 = vadd.f32 %v377_v43, %v13085_v40  ;;  %11517 = vmatpush3.xpose.msra.mxu1 %v13087_v42 }
 0x15d   :  { %v379_v45 = vpop.f32.mrf.mxu0  ;;  %11521 = vmatprep.subr.mxu1 %v14151_v26 }
 0x15e   :  { %v13094_v46 = vadd.f32 %v379_v45, %v254_v39 }
 0x15f   :  { %v381_v47 = vpop.f32.mrf.mxu0 }
 0x160   :  { %v13097_v48 = vadd.f32 %v381_v47, %v13085_v40 }
 0x161   :  { %v385_v49 = vpop.f32.mrf.mxu0 }
 0x162   :  { %v13099_v51 = vadd.f32 %v385_v49, %v254_v39 }
 0x163   :  { %v387_v50 = vpop.f32.mrf.mxu0 }
 0x164   :  { %v13102_v52 = vadd.f32 %v387_v50, %v13085_v40 }
 0x165   :  { %v389_v9 = vpop.f32.mrf.mxu0 }
 0x166   :  { %11547 = vmatpush3.msra.mxu0 %v13102_v52  ;;  %v13122_v11 = vadd.f32 %v389_v9, %v254_v39 }
 0x167   :  { %v391_v9 = vpop.f32.mrf.mxu0 }
 0x1f1   :  { %v613_v58 = vpop.f32.mrf.mxu1 }
 0x1f2   :  { %v614_v59 = vadd.f32 %v13108_v57, %v613_v58 }
 0x1f3   :  { %v11514_v60 = vpop.f32.mrf.mxu1 }
 0x1f4   :  { %v626_v61 = vrot.slane %v614_v59, %v13003_v12 }
 0x1f5   :  { %v616_v62 = vpop.f32.mrf.mxu1 }
 0x1f6   :  { %v627_v1 = vcombine.high %v626_v61, %v626_v61  ;;  %v634_v4 = vrot.slane %v626_v61, %v13003_v12 }
 0x1f7   :  { %v11515_v5 = vpop.f32.mrf.mxu1 }
 0x1f8   :  { %11519 = vmatmul.mubr.f32.vlgmr.msra.gmra.mxu1 %v634_v4  ;;  %v641_v6 = vrot.slane %v627_v1, %v13003_v12  ;;  %v642_v7 = vcombine.high %v634_v4, %v634_v4 }
 0x1f9   :  { %11522 = vmatpush3.xpose.msra.mxu1 %v13094_v46  ;;  %11523 = vmatprep.mubr.msk.f32.mxu1 %vm12868_vm1, %v14151_v26 }
 0x1fa   :  { %11526 = vmatprep.subr.mxu1 %v14151_v26  ;;  %v643_v14 = vcombine.high %v641_v6, %v641_v6 }
 0x1fc   :  { %11524 = vmatmul.mubr.f32.vlgmr.msra.gmra.mxu1 %v641_v6 }
 0x1fd   :  { %11527 = vmatpush3.xpose.msra.mxu1 %v13099_v51  ;;  %11528 = vmatprep.mubr.msk.f32.mxu1 %vm12868_vm1, %v14151_v26 }
 0x1fe   :  { %11531 = vmatprep.subr.mxu1 %v14151_v26 }
 0x200   :  { %11529 = vmatmul.mubr.f32.vlgmr.msra.gmra.mxu1 %v642_v7 }
 0x201   :  { %11532 = vmatpush3.xpose.msra.mxu1 %v13122_v11  ;;  %11533 = vmatprep.mubr.msk.f32.mxu1 %vm12868_vm1, %v14151_v26 }
 0x202   :  { %11536 = vmatprep.subr.mxu1 %v14151_v26 }
 0x204   :  { %11534 = vmatmul.mubr.f32.vlgmr.msra.gmra.mxu1 %v643_v14 }
 0x205   :  { %11537 = vmatpush3.msra.mxu1 %v13090_v44  ;;  %11538 = vmatprep.mubr.msk.f32.mxu1 %vm12868_vm1, %v14151_v26 }
 0x206   :  { %11541 = vmatprep.subr.mxu1 %v14151_v26 }
 0x2b8   :  { %v714_v16 = vpop.f32.mrf.mxu1 }
 0x2b9   :  { %v929_v17 = vsel %vm928_vm5, %v714_v16, -inf }
 0x2ba   :  { %930 = vmax.xlane.f32.xlu0 %v929_v17  ;;  %v11520_v18 = vpop.f32.mrf.mxu1  ;;  %v13146_v17 = vadd.f32 %v391_v9, %v13085_v40  ;;  %v11947_v9 = vld [vmem:[#allocation13 + $0x80] ss:$16 sps:$4 sm:$0xff]  }
 0x2bc   :  { %v784_v19 = vpop.f32.mrf.mxu1 }
 0x2bd   :  { %v932_v20 = vsel %vm928_vm5, %v784_v19, -inf }
 0x2be   :  { %933 = vmax.xlane.f32.xlu1 %v932_v20  ;;  %v11525_v21 = vpop.f32.mrf.mxu1 }
 0x2c0   :  { %v854_v22 = vpop.f32.mrf.mxu1 }
 0x2c1   :  { %v935_v23 = vsel %vm928_vm5, %v854_v22, -inf }
 0x2c2   :  { %936 = vmax.xlane.f32.xlu1 %v935_v23  ;;  %v11530_v24 = vpop.f32.mrf.mxu1 }
 0x2c4   :  { %v924_v25 = vpop.f32.mrf.mxu1 }
 0x2c5   :  { %v938_v27 = vsel %vm928_vm5, %v924_v25, -inf }
 0x2c6   :  { %939 = vmax.xlane.f32.xlu0 %v938_v27  ;;  %v11535_v28 = vpop.f32.mrf.mxu1 }
 0x343   :  { %v931_v29 = vpop.xlane.xlu0 %930 }
 0x344   :  { %v941_v30 = vsub.f32 %v714_v16, %v931_v29 }
 0x346   :  { %v945_v32 = vmul.f32 1.442695, %v941_v30 }
 0x347   :  { %v934_v33 = vpop.xlane.xlu1 %933 }
 0x348   :  { %12459 = vpow2.f32 %v945_v32  ;;  %v942_v34 = vsub.f32 %v784_v19, %v934_v33 }
 0x34a   :  { %v947_v35 = vmul.f32 1.442695, %v942_v34 }
 0x34b   :  { %v937_v36 = vpop.xlane.xlu1 %936 }
 0x34c   :  { %12461 = vpow2.f32 %v947_v35  ;;  %v943_v37 = vsub.f32 %v854_v22, %v937_v36 }
 0x34e   :  { %v949_v38 = vmul.f32 1.442695, %v943_v37 }
 0x34f   :  { %v940_v39 = vpop.xlane.xlu0 %939 }
 0x350   :  { %12463 = vpow2.f32 %v949_v38  ;;  %v944_v41 = vsub.f32 %v924_v25, %v940_v39 }
 0x352   :  { %v951_v43 = vmul.f32 1.442695, %v944_v41 }
 0x354   :  { %12465 = vpow2.f32 %v951_v43 }
 0x355   :  { %v12460_v45 = vpop.eup %12459 }
 0x356   :  { %v953_v47 = vsel %vm928_vm5, %v12460_v45, 0.0 }
 0x357   :  { %954 = vadd.xlane.f32.xlu1 %v953_v47  ;;  %v11934_v47 = vld [vmem:[#allocation13 + $0xec] ss:$16 sps:$4 sm:$0xff]  }
 0x359   :  { %v12462_v49 = vpop.eup %12461 }
 0x35a   :  { %v956_v50 = vsel %vm928_vm5, %v12462_v49, 0.0 }
 0x35b   :  { %957 = vadd.xlane.f32.xlu0 %v956_v50  ;;  %v11932_v50 = vld [vmem:[#allocation13 + $0xe8] ss:$16 sps:$4 sm:$0xff]  }
 0x35d   :  { %v12464_v58 = vpop.eup %12463 }
 0x35e   :  { %v959_v59 = vsel %vm928_vm5, %v12464_v58, 0.0 }
 0x35f   :  { %960 = vadd.xlane.f32.xlu1 %v959_v59  ;;  %v11935_v59 = vld [vmem:[#allocation13 + $0xc0] ss:$16 sps:$4 sm:$0xff]  }
 0x361   :  { %v12466_v60 = vpop.eup %12465 }
 0x362   :  { %v962_v61 = vsel %vm928_vm5, %v12466_v60, 0.0 }
 0x363   :  { %963 = vadd.xlane.f32.xlu0 %v962_v61  ;;  %v11940_v61 = vld [vmem:[#allocation13 + $0xcc] ss:$16 sps:$4 sm:$0xff]  }
 0x3e0   :  { %v955_v62 = vpop.xlane.xlu1 %954 }
 0x3e1   :  { %12467 = vrcp.f32 %v955_v62  ;;  %v11943_v62 = vld [vmem:[#allocation13 + $0xa4] ss:$16 sps:$4 sm:$0xff]  }
 0x3e4   :  { %v958_v1 = vpop.xlane.xlu0 %957 }
 0x3e5   :  { %12469 = vrcp.f32 %v958_v1  ;;  %v11946_v1 = vld [vmem:[#allocation13 + $0xac] ss:$16 sps:$4 sm:$0xff]  }
 0x3e8   :  { %v961_v4 = vpop.xlane.xlu1 %960 }
 0x3e9   :  { %12471 = vrcp.f32 %v961_v4  ;;  %v11941_v4 = vld [vmem:[#allocation13 + $0xa0] ss:$16 sps:$4 sm:$0xff]  }
 0x3ec   :  { %v964_v5 = vpop.xlane.xlu0 %963 }
 0x3ed   :  { %12473 = vrcp.f32 %v964_v5  ;;  %v11944_v5 = vld [vmem:[#allocation13 + $0xa8] ss:$16 sps:$4 sm:$0xff]  }
 0x3ee   :  { %v12468_v6 = vpop.eup %12467 }
 0x3ef   :  { %v969_v7 = vmul.f32 %v12468_v6, %v12460_v45  ;;  %v11949_v6 = vld [vmem:[#allocation13 + $0x84] ss:$16 sps:$4 sm:$0xff]  }
 0x3f1   :  { %11539 = vmatmul.mubr.msk.f32.vlgmr.msra.gmra.mxu1 %vm973_vm6, %v969_v7  ;;  %v11952_v7 = vld [vmem:[#allocation13 + $0x8c] ss:$16 sps:$4 sm:$0xff]  }
 0x3f2   :  { %v12470_v14 = vpop.eup %12469  ;;  %11542 = vmatpush3.msra.mxu1 %v13097_v48  ;;  %11543 = vmatprep.mubr.msk.f32.mxu1 %vm12868_vm1, %v14151_v26 }
 0x3f3   :  { %11551 = vmatprep.subr.mxu1 %v14151_v26  ;;  %v970_v16 = vmul.f32 %v12470_v14, %v12462_v49  ;;  %v11929_v49 = vld [vmem:[#allocation13 + $0xe0] ss:$16 sps:$4 sm:$0xff]   ;;  %v11950_v14 = vld [vmem:[#allocation13 + $0x88] ss:$16 sps:$4 sm:$0xff]  }
 0x3f5   :  { %11544 = vmatmul.mubr.msk.f32.vlgmr.msra.gmra.mxu1 %vm973_vm6, %v970_v16  ;;  %v11955_v16 = vld [vmem:[#allocation13 + $0x64] ss:$16 sps:$4 sm:$0xff]  }
 0x3f6   :  { %v12472_v18 = vpop.eup %12471  ;;  %11552 = vmatpush3.msra.mxu1 %v13146_v17  ;;  %11553 = vmatprep.mubr.msk.f32.mxu1 %vm12868_vm1, %v14151_v26 }
 0x3f7   :  { %v971_v19 = vmul.f32 %v12472_v18, %v12464_v58  ;;  %1619 = vmatprep.subr.bf16.mxu1 %v11934_v47  ;;  %v11937_v58 = vld [vmem:[#allocation13 + $0xc4] ss:$16 sps:$4 sm:$0xff]   ;;  %v11958_v18 = vld [vmem:[#allocation13 + $0x6c] ss:$16 sps:$4 sm:$0xff]  }
 0x3f9   :  { %11549 = vmatmul.mubr.msk.f32.vlgmr.msra.gmra.mxu0 %vm973_vm6, %v971_v19  ;;  %v11953_v19 = vld [vmem:[#allocation13 + $0x60] ss:$16 sps:$4 sm:$0xff]  }
 0x3fa   :  { %v12474_v20 = vpop.eup %12473  ;;  %1610 = vmatprep.mubr.bf16.mxu0 %v14149_v31 }
 0x3fb   :  { %v972_v21 = vmul.f32 %v12474_v20, %v12466_v60  ;;  %v11938_v60 = vld [vmem:[#allocation13 + $0xc8] ss:$16 sps:$4 sm:$0xff]  }
 0x3fc   :  { %v11956_v20 = vld [vmem:[#allocation13 + $0x68] ss:$16 sps:$4 sm:$0xff]  }
 0x3fd   :  { %11554 = vmatmul.mubr.msk.f32.vlgmr.msra.gmra.mxu1 %vm973_vm6, %v972_v21  ;;  %v11961_v21 = vld [vmem:[#allocation13 + $0x44] ss:$16 sps:$4 sm:$0xff]  }
 0x3fe   :  { %1651 = vmatprep.mubr.bf16.mxu1 %v14149_v31  ;;  %1620 = vmatpush1.bf16.msra.mxu1 %v11932_v50 }
 0x3ff   :  { %1621 = vmatprep.subr.bf16.mxu1 %v11940_v61 }
 0x402   :  { %1622 = vmatpush1.bf16.msra.mxu1 %v11938_v60 }
 0x403   :  { %1623 = vmatprep.subr.bf16.mxu1 %v11946_v1 }
 0x406   :  { %1624 = vmatpush1.bf16.msra.mxu1 %v11944_v5 }
 0x407   :  { %1625 = vmatprep.subr.bf16.mxu1 %v11952_v7 }
 0x40a   :  { %1626 = vmatpush1.bf16.msra.mxu1 %v11950_v14 }
 0x40b   :  { %1627 = vmatprep.subr.bf16.mxu1 %v11958_v18 }
 0x40e   :  { %1628 = vmatpush1.bf16.msra.mxu1 %v11956_v20 }
 0x4b1   :  { %v1043_v40 = vpop.f32.mrf.mxu1 }
 0x4b2   :  { %v13160_v28 = vadd.f32 %v13059_v8, %v1043_v40  ;;  %v11964_v40 = vld [vmem:[#allocation13 + $0x4c] ss:$16 sps:$4 sm:$0xff]  }
 0x4b3   :  { %v11540_v22 = vpop.f32.mrf.mxu1  ;;  %1629 = vmatprep.subr.bf16.mxu1 %v11964_v40 }
 0x4b4   :  { %v1270_v34 = vmul.f32 %v13160_v28, %v13160_v28  ;;  %v11959_v22 = vld [vmem:[#allocation13 + $0x40] ss:$16 sps:$4 sm:$0xff]  }
 0x4b5   :  { %v1116_v23 = vpop.f32.mrf.mxu1 }
 0x4b6   :  { %v13157_v25 = vadd.f32 %v13062_v10, %v1116_v23  ;;  %v11962_v23 = vld [vmem:[#allocation13 + $0x48] ss:$16 sps:$4 sm:$0xff]  }
 0x4b7   :  { %v11545_v24 = vpop.f32.mrf.mxu1  ;;  %1630 = vmatpush1.bf16.msra.mxu1 %v11962_v23 }
 0x4b8   :  { %v1271_v30 = vmul.f32 %v13157_v25, %v13157_v25  ;;  %v11967_v24 = vld [vmem:[#allocation13 + $0x24] ss:$16 sps:$4 sm:$0xff]  }
 0x4b9   :  { %v1189_v27 = vpop.f32.mrf.mxu0 }
 0x4ba   :  { %v13165_v32 = vadd.f32 %v13065_v13, %v1189_v27  ;;  %v1278_v36 = vcombine.low %v1270_v34, %v1271_v30  ;;  %v11970_v27 = vld [vmem:[#allocation13 + $0x2c] ss:$16 sps:$4 sm:$0xff]   ;;  %v11968_v30 = vld [vmem:[#allocation13 + $0x28] ss:$16 sps:$4 sm:$0xff]  }
 0x4bb   :  { %v11550_v29 = vpop.f32.mrf.mxu0  ;;  %1631 = vmatprep.subr.bf16.mxu1 %v11970_v27  ;;  %v11976_v34 = vld [vmem:[#allocation13 + $0xc] ss:$16 sps:$4 sm:$0xff]  }
 0x4bc   :  { %v1272_v8 = vmul.f32 %v13165_v32, %v13165_v32  ;;  %v1286_v39 = vrot.slane %v1278_v36, %v13003_v12  ;;  %v11965_v29 = vld [vmem:[#allocation13 + $0x20] ss:$16 sps:$4 sm:$0xff]   ;;  %1632 = vmatpush1.bf16.msra.mxu1 %v11968_v30  ;;  %v11974_v36 = vld [vmem:[#allocation13 + $0x8] ss:$16 sps:$4 sm:$0xff]  }
 0x4bd   :  { %v1262_v33 = vpop.f32.mrf.mxu1  ;;  %1633 = vmatprep.subr.bf16.mxu1 %v11976_v34 }
 0x4be   :  { %v13170_v35 = vadd.f32 %v13068_v15, %v1262_v33  ;;  %v11931_v15 = vld [vmem:[#allocation13 + $0xe4] ss:$16 sps:$4 sm:$0xff]  }
 0x4bf   :  { %v11555_v10 = vpop.f32.mrf.mxu1  ;;  %1578 = vmatprep.subr.bf16.mxu0 %v11931_v15  ;;  %v11973_v33 = vld [vmem:[#allocation13 + $0x4] ss:$16 sps:$4 sm:$0xff]  }
 0x4c0   :  { %v1273_v37 = vmul.f32 %v13170_v35, %v13170_v35  ;;  %1579 = vmatpush1.bf16.msra.mxu0 %v11929_v49  ;;  %v11971_v10 = vld [vmem:[#allocation13] ss:$16 sps:$4 sm:$0xff]   ;;  %1634 = vmatpush1.bf16.msra.mxu1 %v11974_v36  ;;  %v11978_v36 = vld [vmem:[#allocation14 + $0x78] sm:$0xff]  }
 0x4c1   :  { %1580 = vmatprep.subr.bf16.mxu0 %v11937_v58 }
 0x4c2   :  { %v1279_v38 = vcombine.low %v1272_v8, %v1273_v37 }
 0x4c4   :  { %v1293_v13 = vrot.slane %v1279_v38, %v13003_v12  ;;  %1581 = vmatpush1.bf16.msra.mxu0 %v11935_v59 }
 0x4c5   :  { %1582 = vmatprep.subr.bf16.mxu0 %v11943_v62 }
 0x4c6   :  { %v1294_v41 = vcombine.low %v1286_v39, %v1293_v13  ;;  %v10585_v39 = vld [vmem:[#allocation7] ss:$0 sm:$0xff] }
 0x4c7   :  { %v1340_v13 = vrot.slane %v10585_v39, %v13003_v12  ;;  %v11982_v39 = vld [vmem:[#allocation14 + $0x70] sm:$0xff]  }
 0x4c8   :  { %v1301_v43 = vrot.slane %v1294_v41, %v13003_v12  ;;  %1583 = vmatpush1.bf16.msra.mxu0 %v11941_v4 }
 0x4c9   :  { %1584 = vmatprep.subr.bf16.mxu0 %v11949_v6  ;;  %v1341_v41 = vcombine.high %v1340_v13, %v1340_v13 }
 0x4ca   :  { %v1303_v45 = vsel %vm427_vm0, %v1301_v43, 0.0  ;;  %v13182_v43 = vrot.slane %v1340_v13, %v13003_v12  ;;  %v11983_v13 = vld [vmem:[#allocation14 + $0xb0] sm:$0xff]  }
 0x4cb   :  { %1304 = vadd.xlane.f32.xlu1 %v1303_v45  ;;  %v13185_v45 = vrot.slane %v1341_v41, %v13003_v12  ;;  %v11984_v41 = vld [vmem:[#allocation14 + $0x30] sm:$0xff]  }
 0x4cc   :  { %1585 = vmatpush1.bf16.msra.mxu0 %v11947_v9  ;;  %v13189_v47 = vcombine.high %v13182_v43, %v13182_v43 }
 0x4cd   :  { %1586 = vmatprep.subr.bf16.mxu0 %v11955_v16  ;;  %v13193_v49 = vcombine.high %v13185_v45, %v13185_v45 }
 0x4d0   :  { %1587 = vmatpush1.bf16.msra.mxu0 %v11953_v19 }
 0x4d1   :  { %1588 = vmatprep.subr.bf16.mxu0 %v11961_v21 }
 0x4d4   :  { %1589 = vmatpush1.bf16.msra.mxu0 %v11959_v22 }
 0x4d5   :  { %1590 = vmatprep.subr.bf16.mxu0 %v11967_v24 }
 0x4d8   :  { %1591 = vmatpush1.bf16.msra.mxu0 %v11965_v29 }
 0x4d9   :  { %1592 = vmatprep.subr.bf16.mxu0 %v11973_v33 }
 0x4dc   :  { %1593 = vmatpush1.bf16.msra.mxu0 %v11971_v10  ;;  %v11977_v10 = vld [vmem:[#allocation14 + $0xf8] sm:$0xff]  }
 0x4dd   :  { %11120 = vmatprep.subr.bf16.mxu1 %v11977_v10  ;;  %11098 = vmatprep.subr.bf16.mxu0 %v11978_v36 }
 0x554   :  { %v1305_v8 = vpop.xlane.xlu1 %1304 }
 0x555   :  { %v1306_v37 = vmul.f32 0.0078125, %v1305_v8  ;;  %v11979_v8 = vld [vmem:[#allocation14 + $0xb8] sm:$0xff]  }
 0x557   :  { %v1307_v38 = vadd.f32 1e-06, %v1306_v37  ;;  %v11980_v37 = vld [vmem:[#allocation14 + $0x38] sm:$0xff]  }
 0x559   :  { %12475 = vrsqrt.f32 %v1307_v38  ;;  %v11981_v38 = vld [vmem:[#allocation14 + $0xf0] sm:$0xff]  }
 0x566   :  { %v12476_v15 = vpop.eup %12475 }
 0x567   :  { %v1313_v50 = vrot.slane %v12476_v15, %v13026_v53  ;;  %v1317_v58 = vrot.slane %v12476_v15, %v13029_v54  ;;  %v1321_v59 = vrot.slane %v12476_v15, %v13032_v55  ;;  %v1325_v60 = vrot.slane %v12476_v15, %v13035_v56  ;;  %v11985_v15 = vld [vmem:[#allocation14 + $0xe8] sm:$0xff]  }
 0x569   :  { %v1330_v61 = vmul.f32 %v1313_v50, %v13160_v28  ;;  %v1331_v62 = vmul.f32 %v1317_v58, %v13157_v25  ;;  %v1332_v1 = vmul.f32 %v1321_v59, %v13165_v32  ;;  %v1333_v4 = vmul.f32 %v1325_v60, %v13170_v35  ;;  %v11986_v50 = vld [vmem:[#allocation14 + $0x68] sm:$0xff]   ;;  %v11989_v60 = vld [vmem:[#allocation14 + $0xe0] sm:$0xff]  }
 0x56a   :  { %v11987_v58 = vld [vmem:[#allocation14 + $0xa8] sm:$0xff]  }
 0x56b   :  { %v1362_v5 = vmul.f32 %v13182_v43, %v1330_v61  ;;  %v1363_v6 = vmul.f32 %v13185_v45, %v1331_v62  ;;  %v1364_v7 = vmul.f32 %v13189_v47, %v1332_v1  ;;  %v1365_v9 = vmul.f32 %v13193_v49, %v1333_v4  ;;  %v11988_v59 = vld [vmem:[#allocation14 + $0x28] sm:$0xff]   ;;  %v11990_v61 = vld [vmem:[#allocation14 + $0x60] sm:$0xff]   ;;  %v11993_v4 = vld [vmem:[#allocation14 + $0xd8] sm:$0xff]  }
 0x56c   :  { %v11991_v62 = vld [vmem:[#allocation14 + $0xa0] sm:$0xff]  }
 0x56d   :  { %v1366_v14 = vpack.c.bf16 %v1362_v5, %v1362_v5  ;;  %v1367_v16 = vpack.c.bf16 %v1363_v6, %v1363_v6  ;;  %v1368_v18 = vpack.c.bf16 %v1364_v7, %v1364_v7  ;;  %v1369_v19 = vpack.c.bf16 %v1365_v9, %v1365_v9  ;;  %v11992_v1 = vld [vmem:[#allocation14 + $0x20] sm:$0xff]   ;;  %v11994_v5 = vld [vmem:[#allocation14 + $0x58] sm:$0xff]   ;;  %v11997_v9 = vld [vmem:[#allocation14 + $0xd0] sm:$0xff]  }
 0x56e   :  { %v11995_v6 = vld [vmem:[#allocation14 + $0x98] sm:$0xff]  }
 0x56f   :  { %v1407_v20 = vunpack.c.l.b16 %v1367_v16  ;;  %v1408_v21 = vunpack.c.l.b16 %v1368_v18  ;;  %v1409_v40 = vunpack.c.l.b16 %v1369_v19  ;;  %v1406_v22 = vunpack.c.l.b16 %v1366_v14  ;;  %v11996_v7 = vld [vmem:[#allocation14 + $0x18] sm:$0xff]   ;;  %v11998_v14 = vld [vmem:[#allocation14 + $0x50] sm:$0xff]   ;;  %v12001_v19 = vld [vmem:[#allocation14 + $0xc8] sm:$0xff]  }
 0x570   :  { %v11999_v16 = vld [vmem:[#allocation14 + $0x90] sm:$0xff]  }
 0x571   :  { %v1410_v23 = vrot.slane %v1407_v20, 7  ;;  %v1412_v24 = vrot.slane %v1408_v21, 6  ;;  %v1414_v29 = vrot.slane %v1409_v40, 5  ;;  %v12000_v18 = vld [vmem:[#allocation14 + $0x10] sm:$0xff]   ;;  %v12002_v20 = vld [vmem:[#allocation14 + $0x48] sm:$0xff]  }
 0x572   :  { %v12003_v21 = vld [vmem:[#allocation14 + $0x88] sm:$0xff]  }
 0x573   :  { %v1411_v27 = vsel %vm521_vm2, %v1410_v23, %v1406_v22  ;;  %v12004_v40 = vld [vmem:[#allocation14 + $0x8] sm:$0xff]   ;;  %v12005_v22 = vld [vmem:[#allocation14 + $0xc0] sm:$0xff]  }
 0x574   :  { %v1413_v30 = vsel %vm524_vm3, %v1412_v24, %v1411_v27  ;;  %v12006_v23 = vld [vmem:[#allocation14 + $0x40] sm:$0xff]  }
 0x575   :  { %v1415_v33 = vsel %vm527_vm4, %v1414_v29, %v1413_v30  ;;  %v12007_v24 = vld [vmem:[#allocation14 + $0x80] sm:$0xff]   ;;  %v198_v29 = vld [vmem:[%s14139_s11] sm:$0xf] }
 0x576   :  { %v1416_v34 = vpack.c.b16 %v1415_v33, %v1415_v33  ;;  %v12008_v27 = vld [vmem:[#allocation14] sm:$0xff]   ;;  %v13216_v30 = vrot.slane %v198_v29, %v13026_v53  ;;  %v13219_v33 = vrot.slane %v198_v29, %v13032_v55  ;;  %v13225_v10 = vrot.slane %v198_v29, %v13035_v56 }
 0x578   :  { %1611 = vmatmul.mubr.bf16.vlgmr.msra.gmra.mxu0 %v1416_v34  ;;  %1652 = vmatmul.mubr.bf16.vlgmr.msra.gmra.mxu1 %v1416_v34  ;;  %v13222_v34 = vrot.slane %v198_v29, %v13029_v54 }
 0x579   :  { %11121 = vmatpush3.bf16.msra.mxu1 %v11979_v8  ;;  %11099 = vmatpush3.bf16.msra.mxu0 %v11980_v37 }
 0x57a   :  { %11122 = vmatprep.subr.bf16.mxu1 %v11981_v38  ;;  %11100 = vmatprep.subr.bf16.mxu0 %v11982_v39 }
 0x57d   :  { %11123 = vmatpush3.bf16.msra.mxu1 %v11983_v13  ;;  %11101 = vmatpush3.bf16.msra.mxu0 %v11984_v41 }
 0x57e   :  { %11124 = vmatprep.subr.bf16.mxu1 %v11985_v15  ;;  %11102 = vmatprep.subr.bf16.mxu0 %v11986_v50 }
 0x581   :  { %11125 = vmatpush3.bf16.msra.mxu1 %v11987_v58  ;;  %11103 = vmatpush3.bf16.msra.mxu0 %v11988_v59 }
 0x582   :  { %11126 = vmatprep.subr.bf16.mxu1 %v11989_v60  ;;  %11104 = vmatprep.subr.bf16.mxu0 %v11990_v61 }
 0x585   :  { %11127 = vmatpush3.bf16.msra.mxu1 %v11991_v62  ;;  %11105 = vmatpush3.bf16.msra.mxu0 %v11992_v1 }
 0x586   :  { %11128 = vmatprep.subr.bf16.mxu1 %v11993_v4  ;;  %11106 = vmatprep.subr.bf16.mxu0 %v11994_v5 }
 0x589   :  { %11129 = vmatpush3.bf16.msra.mxu1 %v11995_v6  ;;  %11107 = vmatpush3.bf16.msra.mxu0 %v11996_v7 }
 0x58a   :  { %11130 = vmatprep.subr.bf16.mxu1 %v11997_v9  ;;  %11108 = vmatprep.subr.bf16.mxu0 %v11998_v14 }
 0x58d   :  { %11131 = vmatpush3.bf16.msra.mxu1 %v11999_v16  ;;  %11109 = vmatpush3.bf16.msra.mxu0 %v12000_v18 }
 0x58e   :  { %11132 = vmatprep.subr.bf16.mxu1 %v12001_v19  ;;  %11110 = vmatprep.subr.bf16.mxu0 %v12002_v20 }
 0x591   :  { %11133 = vmatpush3.bf16.msra.mxu1 %v12003_v21  ;;  %11111 = vmatpush3.bf16.msra.mxu0 %v12004_v40 }
 0x592   :  { %11134 = vmatprep.subr.bf16.mxu1 %v12005_v22  ;;  %11112 = vmatprep.subr.bf16.mxu0 %v12006_v23 }
 0x595   :  { %11135 = vmatpush3.bf16.msra.mxu1 %v12007_v24  ;;  %11113 = vmatpush3.bf16.msra.mxu0 %v12008_v27 }
 0x596   :  { %11576 = vmatprep.subr.mxu1 %v14151_v26  ;;  %11556 = vmatprep.subr.bf16.mxu0 %v14151_v26 }
 0x638   :  { %v1612_v36 = vpop.f32.mrf.mxu0  ;;  %v1653_v8 = vpop.f32.mrf.mxu1 }
 0x639   :  { %v1613_v37 = vadd.f32 %v1612_v36, %v13216_v30  ;;  %v1654_v38 = vadd.f32 %v1653_v8, %v13219_v33 }
 0x63a   :  { %v1614_v39 = vpop.f32.mrf.mxu0  ;;  %v1655_v13 = vpop.f32.mrf.mxu1 }
 0x63b   :  { %v1664_v41 = vmul.f32 0.044715, %v1613_v37  ;;  %v1666_v15 = vmul.f32 0.044715, %v1654_v38  ;;  %v1615_v50 = vadd.f32 %v1614_v39, %v13222_v34  ;;  %v1656_v58 = vadd.f32 %v1655_v13, %v13225_v10 }
 0x63c   :  { %v1616_v59 = vpop.f32.mrf.mxu0  ;;  %v1657_v60 = vpop.f32.mrf.mxu1 }
 0x63d   :  { %v1668_v61 = vmul.f32 %v1664_v41, %v1613_v37  ;;  %v1670_v62 = vmul.f32 %v1666_v15, %v1654_v38  ;;  %v1665_v1 = vmul.f32 0.044715, %v1615_v50  ;;  %v1667_v4 = vmul.f32 0.044715, %v1656_v58 }
 0x63e   :  { %v1617_v5 = vpop.f32.mrf.mxu0  ;;  %v1658_v6 = vpop.f32.mrf.mxu1  ;;  %v1660_v41 = vmul.f32 0.5, %v1613_v37  ;;  %v1661_v60 = vmul.f32 0.5, %v1615_v50 }
 0x63f   :  { %v1672_v7 = vmul.f32 %v1668_v61, %v1613_v37  ;;  %v1674_v9 = vmul.f32 %v1670_v62, %v1654_v38  ;;  %v1669_v14 = vmul.f32 %v1665_v1, %v1615_v50  ;;  %v1671_v16 = vmul.f32 %v1667_v4, %v1656_v58 }
 0x640   :  { %v1662_v62 = vmul.f32 0.5, %v1654_v38  ;;  %v1663_v1 = vmul.f32 0.5, %v1656_v58 }
 0x641   :  { %v1676_v18 = vadd.f32 %v1672_v7, %v1613_v37  ;;  %v1678_v19 = vadd.f32 %v1674_v9, %v1654_v38  ;;  %v1673_v20 = vmul.f32 %v1669_v14, %v1615_v50  ;;  %v1675_v21 = vmul.f32 %v1671_v16, %v1656_v58 }
 0x643   :  { %v1680_v40 = vmul.f32 0.7978846, %v1676_v18  ;;  %v1682_v22 = vmul.f32 0.7978846, %v1678_v19  ;;  %v1677_v23 = vadd.f32 %v1673_v20, %v1615_v50  ;;  %v1679_v24 = vadd.f32 %v1675_v21, %v1656_v58  ;;  %v13240_v50 = vld [vmem:[%s14141_s13] ss:$0 sm:$0xff] }
 0x645   :  { %v1681_v27 = vmul.f32 0.7978846, %v1677_v23  ;;  %v1683_v29 = vmul.f32 0.7978846, %v1679_v24  ;;  %12477 = vtanh.f32 %v1680_v40 }
 0x646   :  { %12479 = vtanh.f32 %v1682_v22 }
 0x647   :  { %12481 = vtanh.f32 %v1681_v27 }
 0x648   :  { %12483 = vtanh.f32 %v1683_v29 }
 0x652   :  { %v12478_v36 = vpop.eup %12477 }
 0x653   :  { %v12480_v8 = vpop.eup %12479  ;;  %v1688_v39 = vadd.f32 1.0, %v12478_v36 }
 0x654   :  { %v12482_v13 = vpop.eup %12481  ;;  %v1690_v15 = vadd.f32 1.0, %v12480_v8 }
 0x655   :  { %v12484_v59 = vpop.eup %12483  ;;  %v1689_v61 = vadd.f32 1.0, %v12482_v13  ;;  %v1692_v5 = vmul.f32 %v1688_v39, %v1660_v41 }
 0x656   :  { %v1691_v4 = vadd.f32 1.0, %v12484_v59  ;;  %v1694_v7 = vmul.f32 %v1690_v15, %v1662_v62 }
 0x657   :  { %v1693_v6 = vmul.f32 %v1689_v61, %v1661_v60  ;;  %v1696_v18 = vpack.c.bf16 %v1692_v5, %v1692_v5 }
 0x658   :  { %v1695_v9 = vmul.f32 %v1691_v4, %v1663_v1  ;;  %v1698_v19 = vpack.c.bf16 %v1694_v7, %v1694_v7 }
 0x659   :  { %v1697_v14 = vpack.c.bf16 %v1693_v6, %v1693_v6 }
 0x65a   :  { %v1699_v16 = vpack.c.bf16 %v1695_v9, %v1695_v9 }
 0x65b   :  { %1988 = vmatprep.mubr.bf16.mxu0 %v1697_v14 }
 0x65c   :  { %2028 = vmatprep.mubr.bf16.mxu1 %v1699_v16  ;;  %1989 = vmatmul.mubr.bf16.vlgmr.msra.gmra.mxu0 %v1696_v18  ;;  %v12009_v18 = vld [vmem:[#allocation10 + $0x38] sm:$0xff]  }
 0x65d   :  { %2029 = vmatmul.mubr.bf16.vlgmr.msra.gmra.mxu1 %v1698_v19  ;;  %11572 = vmatprep.mubr.msk.bf16.mxu0 %vm12868_vm1, %v14151_v26  ;;  %v12010_v19 = vld [vmem:[#allocation10 + $0x30] sm:$0xff]  }
 0x65e   :  { %11577 = vmatpush3.xpose.msra.mxu1 %v13087_v42  ;;  %11578 = vmatprep.mubr.msk.f32.mxu1 %vm12868_vm1, %v14151_v26 }
 0x65f   :  { %11581 = vmatprep.subr.mxu1 %v14151_v26  ;;  %11557 = vmatpush3.bf16.msra.mxu0 %v12009_v18 }
 0x660   :  { %11558 = vmatprep.subr.bf16.mxu0 %v14151_v26 }
 0x663   :  { %11559 = vmatpush3.bf16.msra.mxu0 %v12010_v19 }
 0x664   :  { %11560 = vmatprep.subr.bf16.mxu0 %v14151_v26 }
 0x71c   :  { %v11114_v37 = vpop.f32.mrf.mxu0 }
 0x71d   :  { %v11136_v38 = vpop.f32.mrf.mxu1 }
 0x71e   :  { %v11115_v58 = vpop.f32.mrf.mxu0 }
 0x71f   :  { %v11116_v20 = vadd.f32 %v11115_v58, %v11114_v37  ;;  %v11137_v21 = vpop.f32.mrf.mxu1  ;;  %v12011_v37 = vld [vmem:[#allocation10 + $0x28] sm:$0xff]   ;;  %v12013_v58 = vld [vmem:[#allocation10 + $0x18] sm:$0xff]  }
 0x720   :  { %v11117_v40 = vpop.f32.mrf.mxu0  ;;  %v11138_v23 = vadd.f32 %v11137_v21, %v11136_v38  ;;  %11561 = vmatpush3.bf16.msra.mxu0 %v12011_v37  ;;  %v12012_v38 = vld [vmem:[#allocation10 + $0x20] sm:$0xff]   ;;  %v12015_v21 = vld [vmem:[#allocation10 + $0x8] sm:$0xff]  }
 0x721   :  { %v1991_v22 = vadd.f32 %v11116_v20, %v13240_v50  ;;  %v11139_v24 = vpop.f32.mrf.mxu1  ;;  %11562 = vmatprep.subr.bf16.mxu0 %v14151_v26  ;;  %v12014_v20 = vld [vmem:[#allocation10 + $0x10] sm:$0xff]   ;;  %v12016_v40 = vld [vmem:[#allocation10] sm:$0xff]  }
 0x722   :  { %v11118_v27 = vpop.f32.mrf.mxu0 }
 0x723   :  { %v2031_v29 = vadd.f32 %v11138_v23, %v1991_v22  ;;  %v11140_v36 = vpop.f32.mrf.mxu1 }
 0x724   :  { %11563 = vmatpush3.bf16.msra.mxu0 %v12012_v38 }
 0x725   :  { %v2043_v8 = vrot.slane %v2031_v29, %v13003_v12  ;;  %11564 = vmatprep.subr.bf16.mxu0 %v14151_v26 }
 0x727   :  { %v2044_v39 = vcombine.high %v2043_v8, %v2043_v8  ;;  %v2051_v13 = vrot.slane %v2043_v8, %v13003_v12 }
 0x728   :  { %11565 = vmatpush3.bf16.msra.mxu0 %v12013_v58 }
 0x729   :  { %v2058_v41 = vrot.slane %v2044_v39, %v13003_v12  ;;  %v2059_v15 = vcombine.high %v2051_v13, %v2051_v13  ;;  %v13247_v59 = vadd.f32 %v2051_v13, %v13160_v28  ;;  %11566 = vmatprep.subr.bf16.mxu0 %v14151_v26 }
 0x72b   :  { %14168 = vst [vmem:[#allocation24_spill] sm:$0xff] %v13247_v59  ;;  %v2060_v60 = vcombine.high %v2058_v41, %v2058_v41  ;;  %v13250_v61 = vadd.f32 %v2058_v41, %v13157_v25  ;;  %v13253_v62 = vadd.f32 %v2059_v15, %v13165_v32  ;;  %v2069_v4 = vmul.f32 %v13247_v59, %v13247_v59 }
 0x72c   :  { %11567 = vmatpush3.bf16.msra.mxu0 %v12014_v20 }
 0x72d   :  { %14169 = vst [vmem:[#allocation25_spill] sm:$0xff] %v13250_v61  ;;  %14170 = vst [vmem:[#allocation26_spill] sm:$0xff] %v13253_v62  ;;  %v13256_v1 = vadd.f32 %v2060_v60, %v13170_v35  ;;  %v2070_v5 = vmul.f32 %v13250_v61, %v13250_v61  ;;  %v2071_v28 = vmul.f32 %v13253_v62, %v13253_v62  ;;  %11568 = vmatprep.subr.bf16.mxu0 %v14151_v26 }
 0x72f   :  { %14171 = vst [vmem:[#allocation27_spill] sm:$0xff] %v13256_v1  ;;  %v2072_v6 = vmul.f32 %v13256_v1, %v13256_v1  ;;  %v2077_v25 = vcombine.low %v2069_v4, %v2070_v5 }
 0x730   :  { %11569 = vmatpush3.bf16.msra.mxu0 %v12015_v21 }
 0x731   :  { %v2078_v7 = vcombine.low %v2071_v28, %v2072_v6  ;;  %v2085_v32 = vrot.slane %v2077_v25, %v13003_v12  ;;  %11570 = vmatprep.subr.bf16.mxu0 %v14151_v26 }
 0x733   :  { %v2092_v9 = vrot.slane %v2078_v7, %v13003_v12 }
 0x734   :  { %11571 = vmatpush3.bf16.msra.mxu0 %v12016_v40 }
 0x735   :  { %v2093_v35 = vcombine.low %v2085_v32, %v2092_v9 }
 0x737   :  { %v2100_v14 = vrot.slane %v2093_v35, %v13003_v12 }
 0x739   :  { %v2102_v16 = vsel %vm427_vm0, %v2100_v14, 0.0 }
 0x73a   :  { %2103 = vadd.xlane.f32.xlu0 %v2102_v16 }
 0x7c3   :  { %v2104_v22 = vpop.xlane.xlu0 %2103 }
 0x7c4   :  { %v2105_v23 = vmul.f32 0.0078125, %v2104_v22 }
 0x7c6   :  { %v2106_v24 = vadd.f32 1e-06, %v2105_v23 }
 0x7c8   :  { %12485 = vrsqrt.f32 %v2106_v24 }
 0x7d5   :  { %v12486_v27 = vpop.eup %12485 }
 0x7d6   :  { %v2112_v29 = vrot.slane %v12486_v27, %v13026_v53  ;;  %v2116_v36 = vrot.slane %v12486_v27, %v13029_v54  ;;  %v2120_v8 = vrot.slane %v12486_v27, %v13032_v55  ;;  %v2124_v39 = vrot.slane %v12486_v27, %v13035_v56 }
 0x7d8   :  { %v2129_v13 = vmul.f32 %v2112_v29, %v13247_v59  ;;  %v2130_v41 = vmul.f32 %v2116_v36, %v13250_v61  ;;  %v2131_v15 = vmul.f32 %v2120_v8, %v13253_v62  ;;  %v2132_v60 = vmul.f32 %v2124_v39, %v13256_v1 }
 0x7da   :  { %v2133_v4 = vmul.f32 %v2129_v13, %v13042_v63  ;;  %v2134_v5 = vmul.f32 %v2130_v41, %v13045_v0  ;;  %v2135_v28 = vmul.f32 %v2131_v15, %v13049_v2  ;;  %v2136_v6 = vmul.f32 %v2132_v60, %v13053_v3 }
 0x7dc   :  { %v2137_v25 = vpack.c.bf16 %v2133_v4, %v2133_v4  ;;  %v2138_v7 = vpack.c.bf16 %v2134_v5, %v2134_v5  ;;  %v2139_v32 = vpack.c.bf16 %v2135_v28, %v2135_v28  ;;  %v2140_v9 = vpack.c.bf16 %v2136_v6, %v2136_v6 }
 0x7de   :  { %v2162_v35 = vunpack.c.l.b16 %v2138_v7  ;;  %v2163_v14 = vunpack.c.l.b16 %v2139_v32  ;;  %v2164_v16 = vunpack.c.l.b16 %v2140_v9  ;;  %v2161_v18 = vunpack.c.l.b16 %v2137_v25 }
 0x7e0   :  { %v2165_v19 = vrot.slane %v2162_v35, 7  ;;  %v2167_v37 = vrot.slane %v2163_v14, 6  ;;  %v2169_v58 = vrot.slane %v2164_v16, 5 }
 0x7e2   :  { %v2166_v38 = vsel %vm521_vm2, %v2165_v19, %v2161_v18 }
 0x7e3   :  { %v2168_v20 = vsel %vm524_vm3, %v2167_v37, %v2166_v38 }
 0x7e4   :  { %v2170_v21 = vsel %vm527_vm4, %v2169_v58, %v2168_v20 }
 0x7e5   :  { %v2171_v40 = vpack.c.b16 %v2170_v21, %v2170_v21 }
 0x7e7   :  { %11573 = vmatmul.mubr.bf16.vlgmr.msra.gmra.mxu0 %v2171_v40 }
 0x7e8   :  { %3222 = vmatprep.mubr.bf16.mxu0 %v14149_v31 }
 0x8a7   :  { %v2255_v22 = vpop.f32.mrf.mxu0 }
 0x8a8   :  { %v2256_v23 = vadd.f32 %v13108_v57, %v2255_v22 }
 0x8a9   :  { %v11574_v24 = vpop.f32.mrf.mxu0 }
 0x8aa   :  { %v2268_v27 = vrot.slane %v2256_v23, %v13003_v12 }
 0x8ab   :  { %v2258_v29 = vpop.f32.mrf.mxu0 }
 0x8ac   :  { %v2269_v36 = vcombine.high %v2268_v27, %v2268_v27  ;;  %v2276_v8 = vrot.slane %v2268_v27, %v13003_v12 }
 0x8ad   :  { %v11575_v39 = vpop.f32.mrf.mxu0 }
 0x8ae   :  { %11579 = vmatmul.mubr.f32.vlgmr.msra.gmra.mxu1 %v2276_v8  ;;  %v2283_v13 = vrot.slane %v2269_v36, %v13003_v12  ;;  %v2284_v57 = vcombine.high %v2276_v8, %v2276_v8 }
 0x8af   :  { %11582 = vmatpush3.xpose.msra.mxu1 %v13094_v46  ;;  %11583 = vmatprep.mubr.msk.f32.mxu1 %vm12868_vm1, %v14151_v26 }
 0x8b0   :  { %11586 = vmatprep.subr.mxu1 %v14151_v26  ;;  %v2285_v41 = vcombine.high %v2283_v13, %v2283_v13 }
 0x8b2   :  { %11584 = vmatmul.mubr.f32.vlgmr.msra.gmra.mxu1 %v2283_v13 }
 0x8b3   :  { %11587 = vmatpush3.xpose.msra.mxu1 %v13099_v51  ;;  %11588 = vmatprep.mubr.msk.f32.mxu1 %vm12868_vm1, %v14151_v26 }
 0x8b4   :  { %11591 = vmatprep.subr.mxu1 %v14151_v26 }
 0x8b6   :  { %11589 = vmatmul.mubr.f32.vlgmr.msra.gmra.mxu1 %v2284_v57 }
 0x8b7   :  { %11592 = vmatpush3.xpose.msra.mxu1 %v13122_v11  ;;  %11593 = vmatprep.mubr.msk.f32.mxu1 %vm12868_vm1, %v14151_v26 }
 0x8b8   :  { %11596 = vmatprep.subr.mxu1 %v14151_v26 }
 0x8ba   :  { %11594 = vmatmul.mubr.f32.vlgmr.msra.gmra.mxu1 %v2285_v41 }
 0x8bb   :  { %11597 = vmatpush3.msra.mxu1 %v13090_v44  ;;  %11598 = vmatprep.mubr.msk.f32.mxu1 %vm12868_vm1, %v14151_v26 }
 0x8bc   :  { %11601 = vmatprep.subr.mxu1 %v14151_v26 }
 0x96e   :  { %v2356_v15 = vpop.f32.mrf.mxu1 }
 0x96f   :  { %v2570_v60 = vsel %vm928_vm5, %v2356_v15, -inf }
 0x970   :  { %2571 = vmax.xlane.f32.xlu1 %v2570_v60  ;;  %v11580_v4 = vpop.f32.mrf.mxu1 }
 0x972   :  { %v2426_v5 = vpop.f32.mrf.mxu1 }
 0x973   :  { %v2573_v28 = vsel %vm928_vm5, %v2426_v5, -inf }
 0x974   :  { %2574 = vmax.xlane.f32.xlu0 %v2573_v28  ;;  %v11585_v6 = vpop.f32.mrf.mxu1 }
 0x976   :  { %v2496_v25 = vpop.f32.mrf.mxu1 }
 0x977   :  { %v2576_v7 = vsel %vm928_vm5, %v2496_v25, -inf }
 0x978   :  { %2577 = vmax.xlane.f32.xlu1 %v2576_v7  ;;  %v11590_v32 = vpop.f32.mrf.mxu1 }
 0x97a   :  { %v2566_v9 = vpop.f32.mrf.mxu1 }
 0x97b   :  { %v2579_v35 = vsel %vm928_vm5, %v2566_v9, -inf }
 0x97c   :  { %2580 = vmax.xlane.f32.xlu0 %v2579_v35  ;;  %v11595_v14 = vpop.f32.mrf.mxu1 }
 0x9f9   :  { %v2572_v16 = vpop.xlane.xlu1 %2571 }
 0x9fa   :  { %v2582_v18 = vsub.f32 %v2356_v15, %v2572_v16 }
 0x9fc   :  { %v2586_v19 = vmul.f32 1.442695, %v2582_v18 }
 0x9fd   :  { %v2575_v37 = vpop.xlane.xlu0 %2574 }
 0x9fe   :  { %12487 = vpow2.f32 %v2586_v19  ;;  %v2583_v38 = vsub.f32 %v2426_v5, %v2575_v37 }
 0xa00   :  { %v2588_v58 = vmul.f32 1.442695, %v2583_v38 }
 0xa01   :  { %v2578_v20 = vpop.xlane.xlu1 %2577 }
 0xa02   :  { %12489 = vpow2.f32 %v2588_v58  ;;  %v2584_v21 = vsub.f32 %v2496_v25, %v2578_v20 }
 0xa04   :  { %v2590_v40 = vmul.f32 1.442695, %v2584_v21 }
 0xa05   :  { %v2581_v22 = vpop.xlane.xlu0 %2580 }
 0xa06   :  { %12491 = vpow2.f32 %v2590_v40  ;;  %v2585_v23 = vsub.f32 %v2566_v9, %v2581_v22 }
 0xa08   :  { %v2592_v24 = vmul.f32 1.442695, %v2585_v23 }
 0xa0a   :  { %12493 = vpow2.f32 %v2592_v24 }
 0xa0b   :  { %v12488_v27 = vpop.eup %12487 }
 0xa0c   :  { %v2594_v29 = vsel %vm928_vm5, %v12488_v27, 0.0 }
 0xa0d   :  { %2595 = vadd.xlane.f32.xlu1 %v2594_v29 }
 0xa0f   :  { %v12490_v36 = vpop.eup %12489 }
 0xa10   :  { %v2597_v8 = vsel %vm928_vm5, %v12490_v36, 0.0 }
 0xa11   :  { %2598 = vadd.xlane.f32.xlu0 %v2597_v8 }
 0xa13   :  { %v12492_v39 = vpop.eup %12491 }
 0xa14   :  { %v2600_v13 = vsel %vm928_vm5, %v12492_v39, 0.0 }
 0xa15   :  { %2601 = vadd.xlane.f32.xlu1 %v2600_v13 }
 0xa17   :  { %v12494_v57 = vpop.eup %12493 }
 0xa18   :  { %v2603_v41 = vsel %vm928_vm5, %v12494_v57, 0.0 }
 0xa19   :  { %2604 = vadd.xlane.f32.xlu0 %v2603_v41 }
 0xa96   :  { %v2596_v15 = vpop.xlane.xlu1 %2595 }
 0xa97   :  { %12495 = vrcp.f32 %v2596_v15 }
 0xa9a   :  { %v2599_v60 = vpop.xlane.xlu0 %2598 }
 0xa9b   :  { %12497 = vrcp.f32 %v2599_v60 }
 0xa9e   :  { %v2602_v4 = vpop.xlane.xlu1 %2601 }
 0xa9f   :  { %12499 = vrcp.f32 %v2602_v4 }
 0xaa2   :  { %v2605_v5 = vpop.xlane.xlu0 %2604 }
 0xaa3   :  { %12501 = vrcp.f32 %v2605_v5  ;;  %v12019_v5 = vld [vmem:[#allocation13 + $0xe4] ss:$16 sps:$4 sm:$0xff]  }
 0xaa4   :  { %v12496_v28 = vpop.eup %12495  ;;  %3190 = vmatprep.subr.bf16.mxu0 %v12019_v5  ;;  %v12061_v5 = vld [vmem:[#allocation13 + $0x4] ss:$16 sps:$4 sm:$0xff]  }
 0xaa5   :  { %v2610_v6 = vmul.f32 %v12496_v28, %v12488_v27  ;;  %v12022_v28 = vld [vmem:[#allocation13 + $0xec] ss:$16 sps:$4 sm:$0xff]  }
 0xaa7   :  { %11599 = vmatmul.mubr.msk.f32.vlgmr.msra.gmra.mxu1 %vm973_vm6, %v2610_v6  ;;  %v12017_v6 = vld [vmem:[#allocation13 + $0xe0] ss:$16 sps:$4 sm:$0xff]  }
 0xaa8   :  { %v12498_v25 = vpop.eup %12497  ;;  %11602 = vmatpush3.msra.mxu1 %v13097_v48  ;;  %11603 = vmatprep.mubr.msk.f32.mxu1 %vm12868_vm1, %v14151_v26 }
 0xaa9   :  { %11606 = vmatprep.subr.mxu1 %v14151_v26  ;;  %v2611_v7 = vmul.f32 %v12498_v25, %v12490_v36  ;;  %v12020_v25 = vld [vmem:[#allocation13 + $0xe8] ss:$16 sps:$4 sm:$0xff]   ;;  %3191 = vmatpush1.bf16.msra.mxu0 %v12017_v6  ;;  %v12059_v6 = vld [vmem:[#allocation13] ss:$16 sps:$4 sm:$0xff]  }
 0xaab   :  { %11604 = vmatmul.mubr.msk.f32.vlgmr.msra.gmra.mxu1 %vm973_vm6, %v2611_v7  ;;  %v12025_v7 = vld [vmem:[#allocation13 + $0xc4] ss:$16 sps:$4 sm:$0xff]  }
 0xaac   :  { %v12500_v32 = vpop.eup %12499  ;;  %11607 = vmatpush3.msra.mxu1 %v13102_v52  ;;  %11608 = vmatprep.mubr.msk.f32.mxu1 %vm12868_vm1, %v14151_v26 }
 0xaad   :  { %11611 = vmatprep.subr.mxu1 %v14151_v26  ;;  %v2612_v9 = vmul.f32 %v12500_v32, %v12492_v39  ;;  %v12028_v32 = vld [vmem:[#allocation13 + $0xcc] ss:$16 sps:$4 sm:$0xff]   ;;  %3192 = vmatprep.subr.bf16.mxu0 %v12025_v7 }
 0xaaf   :  { %11609 = vmatmul.mubr.msk.f32.vlgmr.msra.gmra.mxu1 %vm973_vm6, %v2612_v9  ;;  %v12023_v9 = vld [vmem:[#allocation13 + $0xc0] ss:$16 sps:$4 sm:$0xff]  }
 0xab0   :  { %v12502_v35 = vpop.eup %12501  ;;  %11612 = vmatpush3.msra.mxu1 %v13146_v17  ;;  %11613 = vmatprep.mubr.msk.f32.mxu1 %vm12868_vm1, %v14151_v26 }
 0xab1   :  { %v2613_v14 = vmul.f32 %v12502_v35, %v12494_v57  ;;  %3231 = vmatprep.subr.bf16.mxu1 %v12022_v28  ;;  %v12026_v35 = vld [vmem:[#allocation13 + $0xc8] ss:$16 sps:$4 sm:$0xff]   ;;  %3193 = vmatpush1.bf16.msra.mxu0 %v12023_v9  ;;  %v12064_v28 = vld [vmem:[#allocation13 + $0xc] ss:$16 sps:$4 sm:$0xff]  }
 0xab3   :  { %11614 = vmatmul.mubr.msk.f32.vlgmr.msra.gmra.mxu1 %vm973_vm6, %v2613_v14  ;;  %v12031_v14 = vld [vmem:[#allocation13 + $0xa4] ss:$16 sps:$4 sm:$0xff]  }
 0xab4   :  { %3263 = vmatprep.mubr.bf16.mxu1 %v14149_v31  ;;  %3232 = vmatpush1.bf16.msra.mxu1 %v12020_v25  ;;  %v12062_v25 = vld [vmem:[#allocation13 + $0x8] ss:$16 sps:$4 sm:$0xff]  }
 0xab5   :  { %3233 = vmatprep.subr.bf16.mxu1 %v12028_v32  ;;  %3194 = vmatprep.subr.bf16.mxu0 %v12031_v14 }
 0xab8   :  { %3234 = vmatpush1.bf16.msra.mxu1 %v12026_v35 }
 0xb67   :  { %v2683_v16 = vpop.f32.mrf.mxu1 }
 0xb68   :  { %v13341_v20 = vadd.f32 %v2683_v16, %v13247_v59  ;;  %v12034_v16 = vld [vmem:[#allocation13 + $0xac] ss:$16 sps:$4 sm:$0xff]  }
 0xb69   :  { %v11600_v18 = vpop.f32.mrf.mxu1  ;;  %3235 = vmatprep.subr.bf16.mxu1 %v12034_v16 }
 0xb6a   :  { %v2910_v24 = vmul.f32 %v13341_v20, %v13341_v20  ;;  %v12029_v18 = vld [vmem:[#allocation13 + $0xa0] ss:$16 sps:$4 sm:$0xff]  }
 0xb6b   :  { %v2756_v19 = vpop.f32.mrf.mxu1  ;;  %3195 = vmatpush1.bf16.msra.mxu0 %v12029_v18 }
 0xb6c   :  { %v13338_v38 = vadd.f32 %v2756_v19, %v13250_v61  ;;  %v12032_v19 = vld [vmem:[#allocation13 + $0xa8] ss:$16 sps:$4 sm:$0xff]  }
 0xb6d   :  { %v11605_v37 = vpop.f32.mrf.mxu1  ;;  %3236 = vmatpush1.bf16.msra.mxu1 %v12032_v19 }
 0xb6e   :  { %v2911_v40 = vmul.f32 %v13338_v38, %v13338_v38  ;;  %v12037_v37 = vld [vmem:[#allocation13 + $0x84] ss:$16 sps:$4 sm:$0xff]  }
 0xb6f   :  { %v2829_v58 = vpop.f32.mrf.mxu1  ;;  %3196 = vmatprep.subr.bf16.mxu0 %v12037_v37 }
 0xb70   :  { %v13346_v22 = vadd.f32 %v2829_v58, %v13253_v62  ;;  %v2918_v36 = vcombine.low %v2910_v24, %v2911_v40  ;;  %v12040_v58 = vld [vmem:[#allocation13 + $0x8c] ss:$16 sps:$4 sm:$0xff]   ;;  %v12038_v40 = vld [vmem:[#allocation13 + $0x88] ss:$16 sps:$4 sm:$0xff]  }
 0xb71   :  { %v11610_v21 = vpop.f32.mrf.mxu1  ;;  %3237 = vmatprep.subr.bf16.mxu1 %v12040_v58  ;;  %v12046_v24 = vld [vmem:[#allocation13 + $0x6c] ss:$16 sps:$4 sm:$0xff]  }
 0xb72   :  { %v2912_v8 = vmul.f32 %v13346_v22, %v13346_v22  ;;  %v2926_v57 = vrot.slane %v2918_v36, %v13003_v12  ;;  %v12035_v21 = vld [vmem:[#allocation13 + $0x80] ss:$16 sps:$4 sm:$0xff]   ;;  %3238 = vmatpush1.bf16.msra.mxu1 %v12038_v40  ;;  %v12044_v36 = vld [vmem:[#allocation13 + $0x68] ss:$16 sps:$4 sm:$0xff]  }
 0xb73   :  { %v2902_v23 = vpop.f32.mrf.mxu1  ;;  %3197 = vmatpush1.bf16.msra.mxu0 %v12035_v21  ;;  %3239 = vmatprep.subr.bf16.mxu1 %v12046_v24 }
 0xb74   :  { %v13351_v27 = vadd.f32 %v2902_v23, %v13256_v1  ;;  %v12043_v23 = vld [vmem:[#allocation13 + $0x64] ss:$16 sps:$4 sm:$0xff]  }
 0xb75   :  { %v11615_v29 = vpop.f32.mrf.mxu1  ;;  %3198 = vmatprep.subr.bf16.mxu0 %v12043_v23 }
 0xb76   :  { %v2913_v39 = vmul.f32 %v13351_v27, %v13351_v27  ;;  %v12041_v29 = vld [vmem:[#allocation13 + $0x60] ss:$16 sps:$4 sm:$0xff]   ;;  %3240 = vmatpush1.bf16.msra.mxu1 %v12044_v36 }
 0xb77   :  { %3199 = vmatpush1.bf16.msra.mxu0 %v12041_v29 }
 0xb78   :  { %v2919_v13 = vcombine.low %v2912_v8, %v2913_v39  ;;  %v12049_v8 = vld [vmem:[#allocation13 + $0x44] ss:$16 sps:$4 sm:$0xff]   ;;  %v12052_v39 = vld [vmem:[#allocation13 + $0x4c] ss:$16 sps:$4 sm:$0xff]  }
 0xb79   :  { %3200 = vmatprep.subr.bf16.mxu0 %v12049_v8  ;;  %3241 = vmatprep.subr.bf16.mxu1 %v12052_v39 }
 0xb7a   :  { %v2933_v41 = vrot.slane %v2919_v13, %v13003_v12  ;;  %v12047_v13 = vld [vmem:[#allocation13 + $0x40] ss:$16 sps:$4 sm:$0xff]  }
 0xb7b   :  { %3201 = vmatpush1.bf16.msra.mxu0 %v12047_v13 }
 0xb7c   :  { %v2934_v15 = vcombine.low %v2926_v57, %v2933_v41  ;;  %v12050_v57 = vld [vmem:[#allocation13 + $0x48] ss:$16 sps:$4 sm:$0xff]   ;;  %v12055_v41 = vld [vmem:[#allocation13 + $0x24] ss:$16 sps:$4 sm:$0xff]  }
 0xb7d   :  { %3242 = vmatpush1.bf16.msra.mxu1 %v12050_v57  ;;  %3202 = vmatprep.subr.bf16.mxu0 %v12055_v41 }
 0xb7e   :  { %v2941_v60 = vrot.slane %v2934_v15, %v13003_v12  ;;  %v12058_v15 = vld [vmem:[#allocation13 + $0x2c] ss:$16 sps:$4 sm:$0xff]  }
 0xb7f   :  { %3243 = vmatprep.subr.bf16.mxu1 %v12058_v15 }
 0xb80   :  { %v2943_v4 = vsel %vm427_vm0, %v2941_v60, 0.0  ;;  %v12053_v60 = vld [vmem:[#allocation13 + $0x20] ss:$16 sps:$4 sm:$0xff]  }
 0xb81   :  { %2944 = vadd.xlane.f32.xlu1 %v2943_v4  ;;  %v12056_v4 = vld [vmem:[#allocation13 + $0x28] ss:$16 sps:$4 sm:$0xff]   ;;  %3203 = vmatpush1.bf16.msra.mxu0 %v12053_v60 }
 0xb82   :  { %3244 = vmatpush1.bf16.msra.mxu1 %v12056_v4  ;;  %3204 = vmatprep.subr.bf16.mxu0 %v12061_v5 }
 0xb83   :  { %3245 = vmatprep.subr.bf16.mxu1 %v12064_v28 }
 0xb85   :  { %3205 = vmatpush1.bf16.msra.mxu0 %v12059_v6 }
 0xb86   :  { %3246 = vmatpush1.bf16.msra.mxu1 %v12062_v25 }
 0xc0a   :  { %v2945_v7 = vpop.xlane.xlu1 %2944 }
 0xc0b   :  { %v2946_v32 = vmul.f32 0.0078125, %v2945_v7 }
 0xc0d   :  { %v2947_v9 = vadd.f32 1e-06, %v2946_v32 }
 0xc0f   :  { %12503 = vrsqrt.f32 %v2947_v9 }
 0xc1c   :  { %v12504_v35 = vpop.eup %12503 }
 0xc1d   :  { %v2953_v14 = vrot.slane %v12504_v35, %v13026_v53  ;;  %v2957_v16 = vrot.slane %v12504_v35, %v13029_v54  ;;  %v2961_v18 = vrot.slane %v12504_v35, %v13032_v55  ;;  %v2965_v19 = vrot.slane %v12504_v35, %v13035_v56  ;;  %v12065_v35 = vld [vmem:[#allocation14 + $0xf8] sm:$0xff]  }
 0xc1e   :  { %11189 = vmatprep.subr.bf16.mxu1 %v12065_v35  ;;  %v12093_v35 = vld [vmem:[#allocation14 + $0xc0] sm:$0xff]  }
 0xc1f   :  { %v2970_v37 = vmul.f32 %v2953_v14, %v13341_v20  ;;  %v2971_v58 = vmul.f32 %v2957_v16, %v13338_v38  ;;  %v2972_v21 = vmul.f32 %v2961_v18, %v13346_v22  ;;  %v2973_v40 = vmul.f32 %v2965_v19, %v13351_v27  ;;  %v12066_v14 = vld [vmem:[#allocation14 + $0x78] sm:$0xff]   ;;  %v12069_v19 = vld [vmem:[#allocation14 + $0xf0] sm:$0xff]  }
 0xc20   :  { %v12067_v16 = vld [vmem:[#allocation14 + $0xb8] sm:$0xff]   ;;  %11167 = vmatprep.subr.bf16.mxu0 %v12066_v14  ;;  %v12094_v14 = vld [vmem:[#allocation14 + $0x40] sm:$0xff]  }
 0xc21   :  { %v2974_v23 = vmul.f32 %v2970_v37, %v13182_v43  ;;  %v2975_v24 = vmul.f32 %v2971_v58, %v13185_v45  ;;  %v2976_v29 = vmul.f32 %v2972_v21, %v13189_v47  ;;  %v2977_v36 = vmul.f32 %v2973_v40, %v13193_v49  ;;  %v12068_v18 = vld [vmem:[#allocation14 + $0x38] sm:$0xff]   ;;  %v12070_v37 = vld [vmem:[#allocation14 + $0x70] sm:$0xff]   ;;  %v12073_v40 = vld [vmem:[#allocation14 + $0xe8] sm:$0xff]  }
 0xc22   :  { %v12071_v58 = vld [vmem:[#allocation14 + $0xb0] sm:$0xff]  }
 0xc23   :  { %v2978_v8 = vpack.c.bf16 %v2974_v23, %v2974_v23  ;;  %v2979_v39 = vpack.c.bf16 %v2975_v24, %v2975_v24  ;;  %v2980_v13 = vpack.c.bf16 %v2976_v29, %v2976_v29  ;;  %v2981_v57 = vpack.c.bf16 %v2977_v36, %v2977_v36  ;;  %v12072_v21 = vld [vmem:[#allocation14 + $0x30] sm:$0xff]   ;;  %v12074_v23 = vld [vmem:[#allocation14 + $0x68] sm:$0xff]   ;;  %v12077_v36 = vld [vmem:[#allocation14 + $0xe0] sm:$0xff]  }
 0xc24   :  { %v12075_v24 = vld [vmem:[#allocation14 + $0xa8] sm:$0xff]  }
 0xc25   :  { %v3019_v41 = vunpack.c.l.b16 %v2979_v39  ;;  %v3020_v15 = vunpack.c.l.b16 %v2980_v13  ;;  %v3021_v60 = vunpack.c.l.b16 %v2981_v57  ;;  %v3018_v4 = vunpack.c.l.b16 %v2978_v8  ;;  %v12076_v29 = vld [vmem:[#allocation14 + $0x28] sm:$0xff]   ;;  %v12078_v8 = vld [vmem:[#allocation14 + $0x60] sm:$0xff]   ;;  %v12081_v57 = vld [vmem:[#allocation14 + $0xd8] sm:$0xff]  }
 0xc26   :  { %v12079_v39 = vld [vmem:[#allocation14 + $0xa0] sm:$0xff]  }
 0xc27   :  { %v3022_v5 = vrot.slane %v3019_v41, 7  ;;  %v3024_v28 = vrot.slane %v3020_v15, 6  ;;  %v3026_v25 = vrot.slane %v3021_v60, 5  ;;  %v12080_v13 = vld [vmem:[#allocation14 + $0x20] sm:$0xff]   ;;  %v12082_v41 = vld [vmem:[#allocation14 + $0x58] sm:$0xff]  }
 0xc28   :  { %v12083_v15 = vld [vmem:[#allocation14 + $0x98] sm:$0xff]  }
 0xc29   :  { %v3023_v6 = vsel %vm521_vm2, %v3022_v5, %v3018_v4  ;;  %v12084_v60 = vld [vmem:[#allocation14 + $0x18] sm:$0xff]   ;;  %v12085_v4 = vld [vmem:[#allocation14 + $0xd0] sm:$0xff]  }
 0xc2a   :  { %v3025_v7 = vsel %vm524_vm3, %v3024_v28, %v3023_v6  ;;  %v12086_v5 = vld [vmem:[#allocation14 + $0x50] sm:$0xff]  }
 0xc2b   :  { %v3027_v32 = vsel %vm527_vm4, %v3026_v25, %v3025_v7  ;;  %v12087_v28 = vld [vmem:[#allocation14 + $0x90] sm:$0xff]   ;;  %v12089_v25 = vld [vmem:[#allocation14 + $0xc8] sm:$0xff]  }
 0xc2c   :  { %v3028_v9 = vpack.c.b16 %v3027_v32, %v3027_v32  ;;  %v12088_v6 = vld [vmem:[#allocation14 + $0x10] sm:$0xff]   ;;  %v12090_v7 = vld [vmem:[#allocation14 + $0x48] sm:$0xff]  }
 0xc2d   :  { %v12091_v32 = vld [vmem:[#allocation14 + $0x88] sm:$0xff]  }
 0xc2e   :  { %3223 = vmatmul.mubr.bf16.vlgmr.msra.gmra.mxu0 %v3028_v9  ;;  %3264 = vmatmul.mubr.bf16.vlgmr.msra.gmra.mxu1 %v3028_v9  ;;  %v12092_v9 = vld [vmem:[#allocation14 + $0x8] sm:$0xff]  }
 0xc2f   :  { %11190 = vmatpush3.bf16.msra.mxu1 %v12067_v16  ;;  %11168 = vmatpush3.bf16.msra.mxu0 %v12068_v18  ;;  %v12095_v16 = vld [vmem:[#allocation14 + $0x80] sm:$0xff]  }
 0xc30   :  { %11191 = vmatprep.subr.bf16.mxu1 %v12069_v19  ;;  %11169 = vmatprep.subr.bf16.mxu0 %v12070_v37  ;;  %v12096_v18 = vld [vmem:[#allocation14] sm:$0xff]  }
 0xc33   :  { %11192 = vmatpush3.bf16.msra.mxu1 %v12071_v58  ;;  %11170 = vmatpush3.bf16.msra.mxu0 %v12072_v21 }
 0xc34   :  { %11193 = vmatprep.subr.bf16.mxu1 %v12073_v40  ;;  %11171 = vmatprep.subr.bf16.mxu0 %v12074_v23 }
 0xc37   :  { %11194 = vmatpush3.bf16.msra.mxu1 %v12075_v24  ;;  %11172 = vmatpush3.bf16.msra.mxu0 %v12076_v29 }
 0xc38   :  { %11195 = vmatprep.subr.bf16.mxu1 %v12077_v36  ;;  %11173 = vmatprep.subr.bf16.mxu0 %v12078_v8 }
 0xc3b   :  { %11196 = vmatpush3.bf16.msra.mxu1 %v12079_v39  ;;  %11174 = vmatpush3.bf16.msra.mxu0 %v12080_v13 }
 0xc3c   :  { %11197 = vmatprep.subr.bf16.mxu1 %v12081_v57  ;;  %11175 = vmatprep.subr.bf16.mxu0 %v12082_v41 }
 0xc3f   :  { %11198 = vmatpush3.bf16.msra.mxu1 %v12083_v15  ;;  %11176 = vmatpush3.bf16.msra.mxu0 %v12084_v60 }
 0xc40   :  { %11199 = vmatprep.subr.bf16.mxu1 %v12085_v4  ;;  %11177 = vmatprep.subr.bf16.mxu0 %v12086_v5 }
 0xc43   :  { %11200 = vmatpush3.bf16.msra.mxu1 %v12087_v28  ;;  %11178 = vmatpush3.bf16.msra.mxu0 %v12088_v6 }
 0xc44   :  { %11201 = vmatprep.subr.bf16.mxu1 %v12089_v25  ;;  %11179 = vmatprep.subr.bf16.mxu0 %v12090_v7 }
 0xc47   :  { %11202 = vmatpush3.bf16.msra.mxu1 %v12091_v32  ;;  %11180 = vmatpush3.bf16.msra.mxu0 %v12092_v9 }
 0xc48   :  { %11203 = vmatprep.subr.bf16.mxu1 %v12093_v35  ;;  %11181 = vmatprep.subr.bf16.mxu0 %v12094_v14 }
 0xc4b   :  { %11204 = vmatpush3.bf16.msra.mxu1 %v12095_v16  ;;  %11182 = vmatpush3.bf16.msra.mxu0 %v12096_v18 }
 0xc4c   :  { %11636 = vmatprep.subr.mxu1 %v14151_v26  ;;  %11616 = vmatprep.subr.bf16.mxu0 %v14151_v26 }
 0xcee   :  { %v3224_v19 = vpop.f32.mrf.mxu0  ;;  %v3265_v37 = vpop.f32.mrf.mxu1 }
 0xcef   :  { %v3225_v58 = vadd.f32 %v3224_v19, %v13216_v30  ;;  %v3266_v21 = vadd.f32 %v3265_v37, %v13219_v33 }
 0xcf0   :  { %v3226_v40 = vpop.f32.mrf.mxu0  ;;  %v3267_v23 = vpop.f32.mrf.mxu1 }
 0xcf1   :  { %v3276_v24 = vmul.f32 0.044715, %v3225_v58  ;;  %v3278_v29 = vmul.f32 0.044715, %v3266_v21  ;;  %v3227_v36 = vadd.f32 %v3226_v40, %v13222_v34  ;;  %v3268_v8 = vadd.f32 %v3267_v23, %v13225_v10 }
 0xcf2   :  { %v3228_v39 = vpop.f32.mrf.mxu0  ;;  %v3269_v13 = vpop.f32.mrf.mxu1 }
 0xcf3   :  { %v3280_v57 = vmul.f32 %v3276_v24, %v3225_v58  ;;  %v3282_v41 = vmul.f32 %v3278_v29, %v3266_v21  ;;  %v3277_v15 = vmul.f32 0.044715, %v3227_v36  ;;  %v3279_v60 = vmul.f32 0.044715, %v3268_v8 }
 0xcf4   :  { %v3229_v4 = vpop.f32.mrf.mxu0  ;;  %v3270_v5 = vpop.f32.mrf.mxu1 }
 0xcf5   :  { %v3284_v28 = vmul.f32 %v3280_v57, %v3225_v58  ;;  %v3286_v6 = vmul.f32 %v3282_v41, %v3266_v21  ;;  %v3281_v25 = vmul.f32 %v3277_v15, %v3227_v36  ;;  %v3283_v7 = vmul.f32 %v3279_v60, %v3268_v8 }
 0xcf6   :  { %v3272_v57 = vmul.f32 0.5, %v3225_v58  ;;  %v3273_v60 = vmul.f32 0.5, %v3227_v36  ;;  %v3274_v5 = vmul.f32 0.5, %v3266_v21 }
 0xcf7   :  { %v3288_v32 = vadd.f32 %v3284_v28, %v3225_v58  ;;  %v3290_v9 = vadd.f32 %v3286_v6, %v3266_v21  ;;  %v3285_v35 = vmul.f32 %v3281_v25, %v3227_v36  ;;  %v3287_v14 = vmul.f32 %v3283_v7, %v3268_v8 }
 0xcf8   :  { %v3275_v28 = vmul.f32 0.5, %v3268_v8 }
 0xcf9   :  { %v3292_v16 = vmul.f32 0.7978846, %v3288_v32  ;;  %v3294_v18 = vmul.f32 0.7978846, %v3290_v9  ;;  %v3289_v19 = vadd.f32 %v3285_v35, %v3227_v36  ;;  %v3291_v37 = vadd.f32 %v3287_v14, %v3268_v8 }
 0xcfb   :  { %v3293_v40 = vmul.f32 0.7978846, %v3289_v19  ;;  %v3295_v23 = vmul.f32 0.7978846, %v3291_v37  ;;  %12505 = vtanh.f32 %v3292_v16 }
 0xcfc   :  { %12507 = vtanh.f32 %v3294_v18 }
 0xcfd   :  { %12509 = vtanh.f32 %v3293_v40 }
 0xcfe   :  { %12511 = vtanh.f32 %v3295_v23 }
 0xd08   :  { %v12506_v24 = vpop.eup %12505 }
 0xd09   :  { %v12508_v29 = vpop.eup %12507  ;;  %v3300_v39 = vadd.f32 1.0, %v12506_v24 }
 0xd0a   :  { %v12510_v13 = vpop.eup %12509  ;;  %v3302_v41 = vadd.f32 1.0, %v12508_v29 }
 0xd0b   :  { %v12512_v15 = vpop.eup %12511  ;;  %v3301_v4 = vadd.f32 1.0, %v12510_v13  ;;  %v3304_v25 = vmul.f32 %v3300_v39, %v3272_v57 }
 0xd0c   :  { %v3303_v6 = vadd.f32 1.0, %v12512_v15  ;;  %v3306_v32 = vmul.f32 %v3302_v41, %v3274_v5 }
 0xd0d   :  { %v3305_v7 = vmul.f32 %v3301_v4, %v3273_v60  ;;  %v3308_v16 = vpack.c.bf16 %v3304_v25, %v3304_v25 }
 0xd0e   :  { %v3307_v9 = vmul.f32 %v3303_v6, %v3275_v28  ;;  %v3310_v18 = vpack.c.bf16 %v3306_v32, %v3306_v32 }
 0xd0f   :  { %v3309_v35 = vpack.c.bf16 %v3305_v7, %v3305_v7 }
 0xd10   :  { %v3311_v14 = vpack.c.bf16 %v3307_v9, %v3307_v9 }
 0xd11   :  { %3600 = vmatprep.mubr.bf16.mxu0 %v3309_v35 }
 0xd12   :  { %3640 = vmatprep.mubr.bf16.mxu1 %v3311_v14  ;;  %3601 = vmatmul.mubr.bf16.vlgmr.msra.gmra.mxu0 %v3308_v16 }
 0xd13   :  { %3641 = vmatmul.mubr.bf16.vlgmr.msra.gmra.mxu1 %v3310_v18  ;;  %11632 = vmatprep.mubr.msk.bf16.mxu0 %vm12868_vm1, %v14151_v26 }
 0xd14   :  { %11637 = vmatpush3.xpose.msra.mxu1 %v13087_v42  ;;  %11638 = vmatprep.mubr.msk.f32.mxu1 %vm12868_vm1, %v14151_v26 }
 0xd15   :  { %11641 = vmatprep.subr.mxu1 %v14151_v26 }
 0xdd2   :  { %v11183_v58 = vpop.f32.mrf.mxu0 }
 0xdd3   :  { %v11205_v21 = vpop.f32.mrf.mxu1 }
 0xdd4   :  { %v11184_v36 = vpop.f32.mrf.mxu0 }
 0xdd5   :  { %v11185_v8 = vadd.f32 %v11184_v36, %v11183_v58  ;;  %v11206_v19 = vpop.f32.mrf.mxu1  ;;  %v12097_v58 = vld [vmem:[#allocation10 + $0x38] sm:$0xff]   ;;  %v12099_v36 = vld [vmem:[#allocation10 + $0x28] sm:$0xff]  }
 0xdd6   :  { %v11186_v37 = vpop.f32.mrf.mxu0  ;;  %v11207_v23 = vadd.f32 %v11206_v19, %v11205_v21  ;;  %11617 = vmatpush3.bf16.msra.mxu0 %v12097_v58  ;;  %v12098_v21 = vld [vmem:[#allocation10 + $0x30] sm:$0xff]   ;;  %v12101_v19 = vld [vmem:[#allocation10 + $0x18] sm:$0xff]  }
 0xdd7   :  { %v3603_v40 = vadd.f32 %v11185_v8, %v13240_v50  ;;  %v11208_v24 = vpop.f32.mrf.mxu1  ;;  %11618 = vmatprep.subr.bf16.mxu0 %v14151_v26  ;;  %v12100_v8 = vld [vmem:[#allocation10 + $0x20] sm:$0xff]   ;;  %v12102_v37 = vld [vmem:[#allocation10 + $0x10] sm:$0xff]  }
 0xdd8   :  { %v11187_v29 = vpop.f32.mrf.mxu0 }
 0xdd9   :  { %v3643_v39 = vadd.f32 %v11207_v23, %v3603_v40  ;;  %v11209_v13 = vpop.f32.mrf.mxu1  ;;  %v12103_v40 = vld [vmem:[#allocation10 + $0x8] sm:$0xff]   ;;  %v12104_v23 = vld [vmem:[#allocation10] sm:$0xff]  }
 0xdda   :  { %11619 = vmatpush3.bf16.msra.mxu0 %v12098_v21 }
 0xddb   :  { %v3655_v57 = vrot.slane %v3643_v39, %v13003_v12  ;;  %11620 = vmatprep.subr.bf16.mxu0 %v14151_v26 }
 0xddd   :  { %v3656_v41 = vcombine.high %v3655_v57, %v3655_v57  ;;  %v3663_v15 = vrot.slane %v3655_v57, %v13003_v12 }
 0xdde   :  { %11621 = vmatpush3.bf16.msra.mxu0 %v12099_v36 }
 0xddf   :  { %v3670_v60 = vrot.slane %v3656_v41, %v13003_v12  ;;  %v3671_v4 = vcombine.high %v3663_v15, %v3663_v15  ;;  %v13393_v5 = vadd.f32 %v3663_v15, %v13341_v20  ;;  %11622 = vmatprep.subr.bf16.mxu0 %v14151_v26 }
 0xde1   :  { %v3672_v28 = vcombine.high %v3670_v60, %v3670_v60  ;;  %v13396_v6 = vadd.f32 %v3670_v60, %v13338_v38  ;;  %v13399_v50 = vadd.f32 %v3671_v4, %v13346_v22  ;;  %v3681_v7 = vmul.f32 %v13393_v5, %v13393_v5 }
 0xde2   :  { %11623 = vmatpush3.bf16.msra.mxu0 %v12100_v8 }
 0xde3   :  { %v13402_v25 = vadd.f32 %v3672_v28, %v13351_v27  ;;  %v3682_v32 = vmul.f32 %v13396_v6, %v13396_v6  ;;  %v3683_v20 = vmul.f32 %v13399_v50, %v13399_v50  ;;  %11624 = vmatprep.subr.bf16.mxu0 %v14151_v26 }
 0xde5   :  { %v3684_v9 = vmul.f32 %v13402_v25, %v13402_v25  ;;  %v3689_v38 = vcombine.low %v3681_v7, %v3682_v32 }
 0xde6   :  { %11625 = vmatpush3.bf16.msra.mxu0 %v12101_v19 }
 0xde7   :  { %v3690_v35 = vcombine.low %v3683_v20, %v3684_v9  ;;  %v3697_v22 = vrot.slane %v3689_v38, %v13003_v12  ;;  %11626 = vmatprep.subr.bf16.mxu0 %v14151_v26 }
 0xde9   :  { %v3704_v14 = vrot.slane %v3690_v35, %v13003_v12 }
 0xdea   :  { %11627 = vmatpush3.bf16.msra.mxu0 %v12102_v37 }
 0xdeb   :  { %v3705_v27 = vcombine.low %v3697_v22, %v3704_v14  ;;  %11628 = vmatprep.subr.bf16.mxu0 %v14151_v26 }
 0xded   :  { %v3712_v16 = vrot.slane %v3705_v27, %v13003_v12 }
 0xdee   :  { %11629 = vmatpush3.bf16.msra.mxu0 %v12103_v40 }
 0xdef   :  { %v3714_v18 = vsel %vm427_vm0, %v3712_v16, 0.0  ;;  %11630 = vmatprep.subr.bf16.mxu0 %v14151_v26 }
 0xdf0   :  { %3715 = vadd.xlane.f32.xlu0 %v3714_v18 }
 0xdf2   :  { %11631 = vmatpush3.bf16.msra.mxu0 %v12104_v23 }
 0xe79   :  { %v3716_v24 = vpop.xlane.xlu0 %3715 }
 0xe7a   :  { %v3717_v29 = vmul.f32 0.0078125, %v3716_v24 }
 0xe7c   :  { %v3718_v39 = vadd.f32 1e-06, %v3717_v29 }
 0xe7e   :  { %12513 = vrsqrt.f32 %v3718_v39 }
 0xe8b   :  { %v12514_v13 = vpop.eup %12513 }
 0xe8c   :  { %v3724_v57 = vrot.slane %v12514_v13, %v13026_v53  ;;  %v3728_v41 = vrot.slane %v12514_v13, %v13029_v54  ;;  %v3732_v15 = vrot.slane %v12514_v13, %v13032_v55  ;;  %v3736_v60 = vrot.slane %v12514_v13, %v13035_v56  ;;  %v13442_v13 = vld [vmem:[%s14135_s7] ss:$0 sm:$0xff] }
 0xe8e   :  { %v3741_v4 = vmul.f32 %v3724_v57, %v13393_v5  ;;  %v3742_v28 = vmul.f32 %v3728_v41, %v13396_v6  ;;  %v3743_v7 = vmul.f32 %v3732_v15, %v13399_v50  ;;  %v3744_v32 = vmul.f32 %v3736_v60, %v13402_v25 }
 0xe90   :  { %v3745_v20 = vmul.f32 %v3741_v4, %v13042_v63  ;;  %v3746_v9 = vmul.f32 %v3742_v28, %v13045_v0  ;;  %v3747_v38 = vmul.f32 %v3743_v7, %v13049_v2  ;;  %v3748_v35 = vmul.f32 %v3744_v32, %v13053_v3 }
 0xe92   :  { %v3749_v22 = vpack.c.bf16 %v3745_v20, %v3745_v20  ;;  %v3750_v14 = vpack.c.bf16 %v3746_v9, %v3746_v9  ;;  %v3751_v27 = vpack.c.bf16 %v3747_v38, %v3747_v38  ;;  %v3752_v16 = vpack.c.bf16 %v3748_v35, %v3748_v35 }
 0xe94   :  { %v3774_v18 = vunpack.c.l.b16 %v3750_v14  ;;  %v3775_v58 = vunpack.c.l.b16 %v3751_v27  ;;  %v3776_v21 = vunpack.c.l.b16 %v3752_v16  ;;  %v3773_v36 = vunpack.c.l.b16 %v3749_v22 }
 0xe96   :  { %v3777_v8 = vrot.slane %v3774_v18, 7  ;;  %v3779_v19 = vrot.slane %v3775_v58, 6  ;;  %v3781_v40 = vrot.slane %v3776_v21, 5 }
 0xe98   :  { %v3778_v37 = vsel %vm521_vm2, %v3777_v8, %v3773_v36 }
 0xe99   :  { %v3780_v23 = vsel %vm524_vm3, %v3779_v19, %v3778_v37 }
 0xe9a   :  { %v3782_v24 = vsel %vm527_vm4, %v3781_v40, %v3780_v23 }
 0xe9b   :  { %v3783_v29 = vpack.c.b16 %v3782_v24, %v3782_v24 }
 0xe9d   :  { %11633 = vmatmul.mubr.bf16.vlgmr.msra.gmra.mxu0 %v3783_v29 }
 0xe9e   :  { %4875 = vmatprep.mubr.bf16.mxu0 %v14149_v31 }
 0xf5d   :  { %v3867_v39 = vpop.f32.mrf.mxu0 }
 0xf5e   :  { %v3868_v57 = vadd.f32 %v13442_v13, %v3867_v39 }
 0xf5f   :  { %v11634_v41 = vpop.f32.mrf.mxu0 }
 0xf60   :  { %v3880_v15 = vrot.slane %v3868_v57, %v13003_v12 }
 0xf61   :  { %v3870_v60 = vpop.f32.mrf.mxu0 }
 0xf62   :  { %v3881_v4 = vcombine.high %v3880_v15, %v3880_v15  ;;  %v3888_v28 = vrot.slane %v3880_v15, %v13003_v12 }
 0xf63   :  { %v11635_v7 = vpop.f32.mrf.mxu0 }
 0xf64   :  { %11639 = vmatmul.mubr.f32.vlgmr.msra.gmra.mxu1 %v3888_v28  ;;  %v3895_v32 = vrot.slane %v3881_v4, %v13003_v12  ;;  %v3896_v20 = vcombine.high %v3888_v28, %v3888_v28 }
 0xf65   :  { %11642 = vmatpush3.xpose.msra.mxu1 %v13094_v46  ;;  %11643 = vmatprep.mubr.msk.f32.mxu1 %vm12868_vm1, %v14151_v26 }
 0xf66   :  { %11646 = vmatprep.subr.mxu1 %v14151_v26  ;;  %v3897_v9 = vcombine.high %v3895_v32, %v3895_v32 }
 0xf68   :  { %11644 = vmatmul.mubr.f32.vlgmr.msra.gmra.mxu1 %v3895_v32 }
 0xf69   :  { %11647 = vmatpush3.xpose.msra.mxu1 %v13099_v51  ;;  %11648 = vmatprep.mubr.msk.f32.mxu1 %vm12868_vm1, %v14151_v26 }
 0xf6a   :  { %11651 = vmatprep.subr.mxu1 %v14151_v26 }
 0xf6c   :  { %11649 = vmatmul.mubr.f32.vlgmr.msra.gmra.mxu1 %v3896_v20 }
 0xf6d   :  { %11652 = vmatpush3.xpose.msra.mxu1 %v13122_v11  ;;  %11653 = vmatprep.mubr.msk.f32.mxu1 %vm12868_vm1, %v14151_v26 }
 0xf6e   :  { %11656 = vmatprep.subr.mxu1 %v14151_v26 }
 0xf70   :  { %11654 = vmatmul.mubr.f32.vlgmr.msra.gmra.mxu1 %v3897_v9 }
 0xf71   :  { %11657 = vmatpush3.msra.mxu1 %v13090_v44  ;;  %11658 = vmatprep.mubr.msk.f32.mxu1 %vm12868_vm1, %v14151_v26 }
 0xf72   :  { %11661 = vmatprep.subr.mxu1 %v14151_v26 }
0x1024   :  { %v3968_v38 = vpop.f32.mrf.mxu1 }
0x1025   :  { %v4182_v35 = vsel %vm928_vm5, %v3968_v38, -inf }
0x1026   :  { %4183 = vmax.xlane.f32.xlu1 %v4182_v35  ;;  %v11640_v22 = vpop.f32.mrf.mxu1 }
0x1028   :  { %v4038_v14 = vpop.f32.mrf.mxu1 }
0x1029   :  { %v4185_v27 = vsel %vm928_vm5, %v4038_v14, -inf }
0x102a   :  { %4186 = vmax.xlane.f32.xlu0 %v4185_v27  ;;  %v11645_v16 = vpop.f32.mrf.mxu1 }
0x102c   :  { %v4108_v18 = vpop.f32.mrf.mxu1 }
0x102d   :  { %v4188_v58 = vsel %vm928_vm5, %v4108_v18, -inf }
0x102e   :  { %4189 = vmax.xlane.f32.xlu1 %v4188_v58  ;;  %v11650_v21 = vpop.f32.mrf.mxu1 }
0x1030   :  { %v4178_v36 = vpop.f32.mrf.mxu1 }
0x1031   :  { %v4191_v8 = vsel %vm928_vm5, %v4178_v36, -inf }
0x1032   :  { %4192 = vmax.xlane.f32.xlu0 %v4191_v8  ;;  %v11655_v19 = vpop.f32.mrf.mxu1 }
0x10af   :  { %v4184_v37 = vpop.xlane.xlu1 %4183 }
0x10b0   :  { %v4194_v40 = vsub.f32 %v3968_v38, %v4184_v37 }
0x10b2   :  { %v4198_v23 = vmul.f32 1.442695, %v4194_v40 }
0x10b3   :  { %v4187_v24 = vpop.xlane.xlu0 %4186 }
0x10b4   :  { %12515 = vpow2.f32 %v4198_v23  ;;  %v4195_v29 = vsub.f32 %v4038_v14, %v4187_v24 }
0x10b6   :  { %v4200_v39 = vmul.f32 1.442695, %v4195_v29 }
0x10b7   :  { %v4190_v57 = vpop.xlane.xlu1 %4189 }
0x10b8   :  { %12517 = vpow2.f32 %v4200_v39  ;;  %v4196_v41 = vsub.f32 %v4108_v18, %v4190_v57 }
0x10ba   :  { %v4202_v15 = vmul.f32 1.442695, %v4196_v41 }
0x10bb   :  { %v4193_v60 = vpop.xlane.xlu0 %4192 }
0x10bc   :  { %12519 = vpow2.f32 %v4202_v15  ;;  %v4197_v4 = vsub.f32 %v4178_v36, %v4193_v60 }
0x10be   :  { %v4204_v28 = vmul.f32 1.442695, %v4197_v4 }
0x10c0   :  { %12521 = vpow2.f32 %v4204_v28 }
0x10c1   :  { %v12516_v7 = vpop.eup %12515 }
0x10c2   :  { %v4206_v32 = vsel %vm928_vm5, %v12516_v7, 0.0 }
0x10c3   :  { %4207 = vadd.xlane.f32.xlu1 %v4206_v32 }
0x10c5   :  { %v12518_v20 = vpop.eup %12517 }
0x10c6   :  { %v4209_v9 = vsel %vm928_vm5, %v12518_v20, 0.0 }
0x10c7   :  { %4210 = vadd.xlane.f32.xlu0 %v4209_v9 }
0x10c9   :  { %v12520_v38 = vpop.eup %12519 }
0x10ca   :  { %v4212_v35 = vsel %vm928_vm5, %v12520_v38, 0.0 }
0x10cb   :  { %4213 = vadd.xlane.f32.xlu1 %v4212_v35 }
0x10cd   :  { %v12522_v22 = vpop.eup %12521 }
0x10ce   :  { %v4215_v14 = vsel %vm928_vm5, %v12522_v22, 0.0 }
0x10cf   :  { %4216 = vadd.xlane.f32.xlu0 %v4215_v14 }
0x114c   :  { %v4208_v27 = vpop.xlane.xlu1 %4207 }
0x114d   :  { %12523 = vrcp.f32 %v4208_v27 }
0x1150   :  { %v4211_v16 = vpop.xlane.xlu0 %4210 }
0x1151   :  { %12525 = vrcp.f32 %v4211_v16 }
0x1154   :  { %v4214_v18 = vpop.xlane.xlu1 %4213 }
0x1155   :  { %12527 = vrcp.f32 %v4214_v18 }
0x1158   :  { %v4217_v58 = vpop.xlane.xlu0 %4216 }
0x1159   :  { %12529 = vrcp.f32 %v4217_v58 }
0x115a   :  { %v12524_v21 = vpop.eup %12523 }
0x115b   :  { %v4222_v36 = vmul.f32 %v12524_v21, %v12516_v7 }
0x115d   :  { %11659 = vmatmul.mubr.msk.f32.vlgmr.msra.gmra.mxu1 %vm973_vm6, %v4222_v36 }
0x115e   :  { %v12526_v8 = vpop.eup %12525  ;;  %11662 = vmatpush3.msra.mxu1 %v13097_v48  ;;  %11663 = vmatprep.mubr.msk.f32.mxu1 %vm12868_vm1, %v14151_v26 }
0x115f   :  { %11666 = vmatprep.subr.mxu1 %v14151_v26  ;;  %v4223_v19 = vmul.f32 %v12526_v8, %v12518_v20 }
0x1161   :  { %11664 = vmatmul.mubr.msk.f32.vlgmr.msra.gmra.mxu1 %vm973_vm6, %v4223_v19  ;;  %v12107_v19 = vld [vmem:[#allocation13 + $0xe4] ss:$16 sps:$4 sm:$0xff]  }
0x1162   :  { %v12528_v37 = vpop.eup %12527  ;;  %11667 = vmatpush3.msra.mxu1 %v13102_v52  ;;  %11668 = vmatprep.mubr.msk.f32.mxu1 %vm12868_vm1, %v14151_v26 }
0x1163   :  { %11671 = vmatprep.subr.mxu1 %v14151_v26  ;;  %v4224_v40 = vmul.f32 %v12528_v37, %v12520_v38  ;;  %v12110_v37 = vld [vmem:[#allocation13 + $0xec] ss:$16 sps:$4 sm:$0xff]  }
0x1164   :  { %4843 = vmatprep.subr.bf16.mxu0 %v12110_v37  ;;  %v12146_v37 = vld [vmem:[#allocation13 + $0x2c] ss:$16 sps:$4 sm:$0xff]  }
0x1165   :  { %11669 = vmatmul.mubr.msk.f32.vlgmr.msra.gmra.mxu1 %vm973_vm6, %v4224_v40  ;;  %v12105_v40 = vld [vmem:[#allocation13 + $0xe0] ss:$16 sps:$4 sm:$0xff]  }
0x1166   :  { %v12530_v23 = vpop.eup %12529  ;;  %11672 = vmatpush3.msra.mxu1 %v13146_v17  ;;  %11673 = vmatprep.mubr.msk.f32.mxu1 %vm12868_vm1, %v14151_v26 }
0x1167   :  { %v4225_v24 = vmul.f32 %v12530_v23, %v12522_v22  ;;  %v12108_v23 = vld [vmem:[#allocation13 + $0xe8] ss:$16 sps:$4 sm:$0xff]   ;;  %4802 = vmatprep.subr.bf16.mxu1 %v12107_v19  ;;  %v12143_v19 = vld [vmem:[#allocation13 + $0x24] ss:$16 sps:$4 sm:$0xff]  }
0x1168   :  { %4844 = vmatpush1.bf16.msra.mxu0 %v12108_v23  ;;  %v12144_v23 = vld [vmem:[#allocation13 + $0x28] ss:$16 sps:$4 sm:$0xff]  }
0x1169   :  { %11674 = vmatmul.mubr.msk.f32.vlgmr.msra.gmra.mxu1 %vm973_vm6, %v4225_v24  ;;  %v12113_v24 = vld [vmem:[#allocation13 + $0xc4] ss:$16 sps:$4 sm:$0xff]  }
0x116a   :  { %4834 = vmatprep.mubr.bf16.mxu1 %v14149_v31  ;;  %4803 = vmatpush1.bf16.msra.mxu1 %v12105_v40  ;;  %v12141_v40 = vld [vmem:[#allocation13 + $0x20] ss:$16 sps:$4 sm:$0xff]  }
0x116b   :  { %4804 = vmatprep.subr.bf16.mxu1 %v12113_v24  ;;  %v12149_v24 = vld [vmem:[#allocation13 + $0x4] ss:$16 sps:$4 sm:$0xff]  }
0x121d   :  { %v4295_v29 = vpop.f32.mrf.mxu1 }
0x121e   :  { %v13492_v4 = vadd.f32 %v4295_v29, %v13393_v5  ;;  %v12116_v29 = vld [vmem:[#allocation13 + $0xcc] ss:$16 sps:$4 sm:$0xff]  }
0x121f   :  { %v11660_v39 = vpop.f32.mrf.mxu1  ;;  %4845 = vmatprep.subr.bf16.mxu0 %v12116_v29  ;;  %v12152_v29 = vld [vmem:[#allocation13 + $0xc] ss:$16 sps:$4 sm:$0xff]  }
0x1220   :  { %v4522_v9 = vmul.f32 %v13492_v4, %v13492_v4  ;;  %v12111_v39 = vld [vmem:[#allocation13 + $0xc0] ss:$16 sps:$4 sm:$0xff]  }
0x1221   :  { %v4368_v57 = vpop.f32.mrf.mxu1  ;;  %4805 = vmatpush1.bf16.msra.mxu1 %v12111_v39  ;;  %v12147_v39 = vld [vmem:[#allocation13] ss:$16 sps:$4 sm:$0xff]  }
0x1222   :  { %v13489_v15 = vadd.f32 %v4368_v57, %v13396_v6  ;;  %v12114_v57 = vld [vmem:[#allocation13 + $0xc8] ss:$16 sps:$4 sm:$0xff]  }
0x1223   :  { %v11665_v41 = vpop.f32.mrf.mxu1  ;;  %4846 = vmatpush1.bf16.msra.mxu0 %v12114_v57  ;;  %v12150_v57 = vld [vmem:[#allocation13 + $0x8] ss:$16 sps:$4 sm:$0xff]  }
0x1224   :  { %v4523_v7 = vmul.f32 %v13489_v15, %v13489_v15  ;;  %v12119_v41 = vld [vmem:[#allocation13 + $0xa4] ss:$16 sps:$4 sm:$0xff]  }
0x1225   :  { %v4441_v60 = vpop.f32.mrf.mxu1  ;;  %4806 = vmatprep.subr.bf16.mxu1 %v12119_v41 }
0x1226   :  { %v13497_v32 = vadd.f32 %v4441_v60, %v13399_v50  ;;  %v4530_v22 = vcombine.low %v4522_v9, %v4523_v7  ;;  %v12122_v60 = vld [vmem:[#allocation13 + $0xac] ss:$16 sps:$4 sm:$0xff]   ;;  %v12120_v7 = vld [vmem:[#allocation13 + $0xa8] ss:$16 sps:$4 sm:$0xff]  }
0x1227   :  { %v11670_v28 = vpop.f32.mrf.mxu1  ;;  %4847 = vmatprep.subr.bf16.mxu0 %v12122_v60  ;;  %v12128_v9 = vld [vmem:[#allocation13 + $0x8c] ss:$16 sps:$4 sm:$0xff]  }
0x1228   :  { %v4524_v14 = vmul.f32 %v13497_v32, %v13497_v32  ;;  %v4538_v18 = vrot.slane %v4530_v22, %v13003_v12  ;;  %v12117_v28 = vld [vmem:[#allocation13 + $0xa0] ss:$16 sps:$4 sm:$0xff]   ;;  %4848 = vmatpush1.bf16.msra.mxu0 %v12120_v7  ;;  %v12126_v22 = vld [vmem:[#allocation13 + $0x88] ss:$16 sps:$4 sm:$0xff]  }
0x1229   :  { %v4514_v20 = vpop.f32.mrf.mxu1  ;;  %4807 = vmatpush1.bf16.msra.mxu1 %v12117_v28  ;;  %4849 = vmatprep.subr.bf16.mxu0 %v12128_v9 }
0x122a   :  { %v13502_v38 = vadd.f32 %v4514_v20, %v13402_v25  ;;  %v12125_v20 = vld [vmem:[#allocation13 + $0x84] ss:$16 sps:$4 sm:$0xff]  }
0x122b   :  { %v11675_v35 = vpop.f32.mrf.mxu1  ;;  %4808 = vmatprep.subr.bf16.mxu1 %v12125_v20 }
0x122c   :  { %v4525_v27 = vmul.f32 %v13502_v38, %v13502_v38  ;;  %v12123_v35 = vld [vmem:[#allocation13 + $0x80] ss:$16 sps:$4 sm:$0xff]   ;;  %4850 = vmatpush1.bf16.msra.mxu0 %v12126_v22 }
0x122d   :  { %4809 = vmatpush1.bf16.msra.mxu1 %v12123_v35 }
0x122e   :  { %v4531_v16 = vcombine.low %v4524_v14, %v4525_v27  ;;  %v12131_v14 = vld [vmem:[#allocation13 + $0x64] ss:$16 sps:$4 sm:$0xff]   ;;  %v12134_v27 = vld [vmem:[#allocation13 + $0x6c] ss:$16 sps:$4 sm:$0xff]  }
0x122f   :  { %4810 = vmatprep.subr.bf16.mxu1 %v12131_v14  ;;  %4851 = vmatprep.subr.bf16.mxu0 %v12134_v27 }
0x1230   :  { %v4545_v58 = vrot.slane %v4531_v16, %v13003_v12  ;;  %v12129_v16 = vld [vmem:[#allocation13 + $0x60] ss:$16 sps:$4 sm:$0xff]  }
0x1231   :  { %4811 = vmatpush1.bf16.msra.mxu1 %v12129_v16 }
0x1232   :  { %v4546_v21 = vcombine.low %v4538_v18, %v4545_v58  ;;  %v12132_v18 = vld [vmem:[#allocation13 + $0x68] ss:$16 sps:$4 sm:$0xff]   ;;  %v12137_v58 = vld [vmem:[#allocation13 + $0x44] ss:$16 sps:$4 sm:$0xff]  }
0x1233   :  { %4852 = vmatpush1.bf16.msra.mxu0 %v12132_v18  ;;  %4812 = vmatprep.subr.bf16.mxu1 %v12137_v58 }
0x1234   :  { %v4553_v36 = vrot.slane %v4546_v21, %v13003_v12  ;;  %v12140_v21 = vld [vmem:[#allocation13 + $0x4c] ss:$16 sps:$4 sm:$0xff]  }
0x1235   :  { %4853 = vmatprep.subr.bf16.mxu0 %v12140_v21 }
0x1236   :  { %v4555_v8 = vsel %vm427_vm0, %v4553_v36, 0.0  ;;  %v12135_v36 = vld [vmem:[#allocation13 + $0x40] ss:$16 sps:$4 sm:$0xff]  }
0x1237   :  { %4556 = vadd.xlane.f32.xlu1 %v4555_v8  ;;  %v12138_v8 = vld [vmem:[#allocation13 + $0x48] ss:$16 sps:$4 sm:$0xff]   ;;  %4813 = vmatpush1.bf16.msra.mxu1 %v12135_v36 }
0x1238   :  { %4854 = vmatpush1.bf16.msra.mxu0 %v12138_v8  ;;  %4814 = vmatprep.subr.bf16.mxu1 %v12143_v19 }
0x1239   :  { %4855 = vmatprep.subr.bf16.mxu0 %v12146_v37 }
0x123b   :  { %4815 = vmatpush1.bf16.msra.mxu1 %v12141_v40 }
0x123c   :  { %4856 = vmatpush1.bf16.msra.mxu0 %v12144_v23  ;;  %4816 = vmatprep.subr.bf16.mxu1 %v12149_v24 }
0x123d   :  { %4857 = vmatprep.subr.bf16.mxu0 %v12152_v29 }
0x123f   :  { %4817 = vmatpush1.bf16.msra.mxu1 %v12147_v39 }
0x1240   :  { %4858 = vmatpush1.bf16.msra.mxu0 %v12150_v57 }
0x12c0   :  { %v4557_v41 = vpop.xlane.xlu1 %4556 }
0x12c1   :  { %v4558_v60 = vmul.f32 0.0078125, %v4557_v41 }
0x12c3   :  { %v4559_v28 = vadd.f32 1e-06, %v4558_v60 }
0x12c5   :  { %12531 = vrsqrt.f32 %v4559_v28 }
0x12d2   :  { %v12532_v7 = vpop.eup %12531 }
0x12d3   :  { %v4565_v20 = vrot.slane %v12532_v7, %v13026_v53  ;;  %v4569_v9 = vrot.slane %v12532_v7, %v13029_v54  ;;  %v4573_v35 = vrot.slane %v12532_v7, %v13032_v55  ;;  %v4577_v22 = vrot.slane %v12532_v7, %v13035_v56 }
0x12d5   :  { %v4582_v14 = vmul.f32 %v4565_v20, %v13492_v4  ;;  %v4583_v27 = vmul.f32 %v4569_v9, %v13489_v15  ;;  %v4584_v16 = vmul.f32 %v4573_v35, %v13497_v32  ;;  %v4585_v18 = vmul.f32 %v4577_v22, %v13502_v38  ;;  %v12153_v22 = vld [vmem:[#allocation14 + $0xf8] sm:$0xff]  }
0x12d6   :  { %11258 = vmatprep.subr.bf16.mxu0 %v12153_v22  ;;  %v12177_v22 = vld [vmem:[#allocation14 + $0xc8] sm:$0xff]  }
0x12d7   :  { %v4586_v58 = vmul.f32 %v4582_v14, %v13182_v43  ;;  %v4587_v21 = vmul.f32 %v4583_v27, %v13185_v45  ;;  %v4588_v36 = vmul.f32 %v4584_v16, %v13189_v47  ;;  %v4589_v8 = vmul.f32 %v4585_v18, %v13193_v49  ;;  %v12154_v14 = vld [vmem:[#allocation14 + $0x78] sm:$0xff]   ;;  %v12157_v18 = vld [vmem:[#allocation14 + $0xf0] sm:$0xff]  }
0x12d8   :  { %v12155_v27 = vld [vmem:[#allocation14 + $0xb8] sm:$0xff]   ;;  %11236 = vmatprep.subr.bf16.mxu1 %v12154_v14  ;;  %v12178_v14 = vld [vmem:[#allocation14 + $0x48] sm:$0xff]  }
0x12d9   :  { %v4590_v19 = vpack.c.bf16 %v4586_v58, %v4586_v58  ;;  %v4591_v37 = vpack.c.bf16 %v4587_v21, %v4587_v21  ;;  %v4592_v40 = vpack.c.bf16 %v4588_v36, %v4588_v36  ;;  %v4593_v23 = vpack.c.bf16 %v4589_v8, %v4589_v8  ;;  %v12156_v16 = vld [vmem:[#allocation14 + $0x38] sm:$0xff]   ;;  %v12158_v58 = vld [vmem:[#allocation14 + $0x70] sm:$0xff]   ;;  %v12161_v8 = vld [vmem:[#allocation14 + $0xe8] sm:$0xff]  }
0x12da   :  { %v12159_v21 = vld [vmem:[#allocation14 + $0xb0] sm:$0xff]  }
0x12db   :  { %v4631_v24 = vunpack.c.l.b16 %v4591_v37  ;;  %v4632_v29 = vunpack.c.l.b16 %v4592_v40  ;;  %v4633_v39 = vunpack.c.l.b16 %v4593_v23  ;;  %v4630_v57 = vunpack.c.l.b16 %v4590_v19  ;;  %v12160_v36 = vld [vmem:[#allocation14 + $0x30] sm:$0xff]   ;;  %v12162_v19 = vld [vmem:[#allocation14 + $0x68] sm:$0xff]   ;;  %v12165_v23 = vld [vmem:[#allocation14 + $0xe0] sm:$0xff]  }
0x12dc   :  { %v12163_v37 = vld [vmem:[#allocation14 + $0xa8] sm:$0xff]  }
0x12dd   :  { %v4634_v41 = vrot.slane %v4631_v24, 7  ;;  %v4636_v60 = vrot.slane %v4632_v29, 6  ;;  %v4638_v7 = vrot.slane %v4633_v39, 5  ;;  %v12164_v40 = vld [vmem:[#allocation14 + $0x28] sm:$0xff]   ;;  %v12166_v24 = vld [vmem:[#allocation14 + $0x60] sm:$0xff]  }
0x12de   :  { %v12167_v29 = vld [vmem:[#allocation14 + $0xa0] sm:$0xff]  }
0x12df   :  { %v4635_v28 = vsel %vm521_vm2, %v4634_v41, %v4630_v57  ;;  %v12168_v39 = vld [vmem:[#allocation14 + $0x20] sm:$0xff]   ;;  %v12169_v57 = vld [vmem:[#allocation14 + $0xd8] sm:$0xff]  }
0x12e0   :  { %v4637_v20 = vsel %vm524_vm3, %v4636_v60, %v4635_v28  ;;  %v12170_v41 = vld [vmem:[#allocation14 + $0x58] sm:$0xff]  }
0x12e1   :  { %v4639_v9 = vsel %vm527_vm4, %v4638_v7, %v4637_v20  ;;  %v12171_v60 = vld [vmem:[#allocation14 + $0x98] sm:$0xff]   ;;  %v12173_v7 = vld [vmem:[#allocation14 + $0xd0] sm:$0xff]  }
0x12e2   :  { %v4640_v35 = vpack.c.b16 %v4639_v9, %v4639_v9  ;;  %v12172_v28 = vld [vmem:[#allocation14 + $0x18] sm:$0xff]   ;;  %v12174_v20 = vld [vmem:[#allocation14 + $0x50] sm:$0xff]  }
0x12e3   :  { %v12175_v9 = vld [vmem:[#allocation14 + $0x90] sm:$0xff]  }
0x12e4   :  { %4835 = vmatmul.mubr.bf16.vlgmr.msra.gmra.mxu1 %v4640_v35  ;;  %4876 = vmatmul.mubr.bf16.vlgmr.msra.gmra.mxu0 %v4640_v35  ;;  %v12176_v35 = vld [vmem:[#allocation14 + $0x10] sm:$0xff]  }
0x12e5   :  { %11259 = vmatpush3.bf16.msra.mxu0 %v12155_v27  ;;  %11237 = vmatpush3.bf16.msra.mxu1 %v12156_v16  ;;  %v12179_v27 = vld [vmem:[#allocation14 + $0x88] sm:$0xff]  }
0x12e6   :  { %11260 = vmatprep.subr.bf16.mxu0 %v12157_v18  ;;  %11238 = vmatprep.subr.bf16.mxu1 %v12158_v58  ;;  %v12180_v16 = vld [vmem:[#allocation14 + $0x8] sm:$0xff]   ;;  %v12181_v18 = vld [vmem:[#allocation14 + $0xc0] sm:$0xff]  }
0x12e7   :  { %v12182_v58 = vld [vmem:[#allocation14 + $0x40] sm:$0xff]  }
0x12e9   :  { %11261 = vmatpush3.bf16.msra.mxu0 %v12159_v21  ;;  %11239 = vmatpush3.bf16.msra.mxu1 %v12160_v36  ;;  %v12183_v21 = vld [vmem:[#allocation14 + $0x80] sm:$0xff]  }
0x12ea   :  { %11262 = vmatprep.subr.bf16.mxu0 %v12161_v8  ;;  %11240 = vmatprep.subr.bf16.mxu1 %v12162_v19  ;;  %v12184_v36 = vld [vmem:[#allocation14] sm:$0xff]  }
0x12ed   :  { %11263 = vmatpush3.bf16.msra.mxu0 %v12163_v37  ;;  %11241 = vmatpush3.bf16.msra.mxu1 %v12164_v40 }
0x12ee   :  { %11264 = vmatprep.subr.bf16.mxu0 %v12165_v23  ;;  %11242 = vmatprep.subr.bf16.mxu1 %v12166_v24 }
0x12f1   :  { %11265 = vmatpush3.bf16.msra.mxu0 %v12167_v29  ;;  %11243 = vmatpush3.bf16.msra.mxu1 %v12168_v39 }
0x12f2   :  { %11266 = vmatprep.subr.bf16.mxu0 %v12169_v57  ;;  %11244 = vmatprep.subr.bf16.mxu1 %v12170_v41 }
0x12f5   :  { %11267 = vmatpush3.bf16.msra.mxu0 %v12171_v60  ;;  %11245 = vmatpush3.bf16.msra.mxu1 %v12172_v28 }
0x12f6   :  { %11268 = vmatprep.subr.bf16.mxu0 %v12173_v7  ;;  %11246 = vmatprep.subr.bf16.mxu1 %v12174_v20 }
0x12f9   :  { %11269 = vmatpush3.bf16.msra.mxu0 %v12175_v9  ;;  %11247 = vmatpush3.bf16.msra.mxu1 %v12176_v35 }
0x12fa   :  { %11270 = vmatprep.subr.bf16.mxu0 %v12177_v22  ;;  %11248 = vmatprep.subr.bf16.mxu1 %v12178_v14 }
0x12fd   :  { %11271 = vmatpush3.bf16.msra.mxu0 %v12179_v27  ;;  %11249 = vmatpush3.bf16.msra.mxu1 %v12180_v16 }
0x12fe   :  { %11272 = vmatprep.subr.bf16.mxu0 %v12181_v18  ;;  %11250 = vmatprep.subr.bf16.mxu1 %v12182_v58 }
0x1301   :  { %11273 = vmatpush3.bf16.msra.mxu0 %v12183_v21  ;;  %11251 = vmatpush3.bf16.msra.mxu1 %v12184_v36 }
0x1302   :  { %11696 = vmatprep.subr.mxu0 %v14151_v26  ;;  %11676 = vmatprep.subr.bf16.mxu1 %v14151_v26 }
0x13a4   :  { %v4836_v8 = vpop.f32.mrf.mxu1  ;;  %v4877_v19 = vpop.f32.mrf.mxu0 }
0x13a5   :  { %v4837_v37 = vadd.f32 %v4836_v8, %v13216_v30  ;;  %v4878_v40 = vadd.f32 %v4877_v19, %v13219_v33 }
0x13a6   :  { %v4838_v23 = vpop.f32.mrf.mxu1  ;;  %v4879_v24 = vpop.f32.mrf.mxu0 }
0x13a7   :  { %v4888_v29 = vmul.f32 0.044715, %v4837_v37  ;;  %v4890_v39 = vmul.f32 0.044715, %v4878_v40  ;;  %v4839_v57 = vadd.f32 %v4838_v23, %v13222_v34  ;;  %v4880_v41 = vadd.f32 %v4879_v24, %v13225_v10 }
0x13a8   :  { %v4840_v60 = vpop.f32.mrf.mxu1  ;;  %v4881_v28 = vpop.f32.mrf.mxu0 }
0x13a9   :  { %v4892_v7 = vmul.f32 %v4888_v29, %v4837_v37  ;;  %v4894_v20 = vmul.f32 %v4890_v39, %v4878_v40  ;;  %v4889_v9 = vmul.f32 0.044715, %v4839_v57  ;;  %v4891_v35 = vmul.f32 0.044715, %v4880_v41 }
0x13aa   :  { %v4841_v22 = vpop.f32.mrf.mxu1  ;;  %v4882_v14 = vpop.f32.mrf.mxu0 }
0x13ab   :  { %v4896_v27 = vmul.f32 %v4892_v7, %v4837_v37  ;;  %v4898_v16 = vmul.f32 %v4894_v20, %v4878_v40  ;;  %v4893_v18 = vmul.f32 %v4889_v9, %v4839_v57  ;;  %v4895_v58 = vmul.f32 %v4891_v35, %v4880_v41 }
0x13ac   :  { %v4884_v9 = vmul.f32 0.5, %v4837_v37  ;;  %v4885_v14 = vmul.f32 0.5, %v4839_v57 }
0x13ad   :  { %v4900_v21 = vadd.f32 %v4896_v27, %v4837_v37  ;;  %v4902_v36 = vadd.f32 %v4898_v16, %v4878_v40  ;;  %v4897_v8 = vmul.f32 %v4893_v18, %v4839_v57  ;;  %v4899_v19 = vmul.f32 %v4895_v58, %v4880_v41 }
0x13ae   :  { %v4886_v16 = vmul.f32 0.5, %v4878_v40  ;;  %v4887_v18 = vmul.f32 0.5, %v4880_v41  ;;  %v14172_v37 = vmov 0.0  }
0x13af   :  { %v4904_v31 = vmul.f32 0.7978846, %v4900_v21  ;;  %v4906_v23 = vmul.f32 0.7978846, %v4902_v36  ;;  %v4901_v26 = vadd.f32 %v4897_v8, %v4839_v57  ;;  %v4903_v24 = vadd.f32 %v4899_v19, %v4880_v41 }
0x13b1   :  { %v4905_v60 = vmul.f32 0.7978846, %v4901_v26  ;;  %v4907_v28 = vmul.f32 0.7978846, %v4903_v24  ;;  %12533 = vtanh.f32 %v4904_v31 }
0x13b2   :  { %12535 = vtanh.f32 %v4906_v23 }
0x13b3   :  { %12537 = vtanh.f32 %v4905_v60 }
0x13b4   :  { %12539 = vtanh.f32 %v4907_v28 }
0x13be   :  { %v12534_v29 = vpop.eup %12533 }
0x13bf   :  { %v12536_v39 = vpop.eup %12535  ;;  %v4912_v7 = vadd.f32 1.0, %v12534_v29 }
0x13c0   :  { %v12538_v20 = vpop.eup %12537  ;;  %v4914_v35 = vadd.f32 1.0, %v12536_v39  ;;  %v13542_v39 = vld [vmem:[%s14141_s13] ss:$0 sm:$0xff] }
0x13c1   :  { %v12540_v22 = vpop.eup %12539  ;;  %v4913_v27 = vadd.f32 1.0, %v12538_v20  ;;  %v4916_v21 = vmul.f32 %v4912_v7, %v4884_v9 }
0x13c2   :  { %v4915_v58 = vadd.f32 1.0, %v12540_v22  ;;  %v4918_v26 = vmul.f32 %v4914_v35, %v4886_v16 }
0x13c3   :  { %v4917_v36 = vmul.f32 %v4913_v27, %v4885_v14  ;;  %v4920_v23 = vpack.c.bf16 %v4916_v21, %v4916_v21 }
0x13c4   :  { %v4919_v8 = vmul.f32 %v4915_v58, %v4887_v18  ;;  %v4922_v24 = vpack.c.bf16 %v4918_v26, %v4918_v26 }
0x13c5   :  { %v4921_v31 = vpack.c.bf16 %v4917_v36, %v4917_v36 }
0x13c6   :  { %v4923_v19 = vpack.c.bf16 %v4919_v8, %v4919_v8 }
0x13c7   :  { %5212 = vmatprep.mubr.bf16.mxu1 %v4921_v31 }
0x13c8   :  { %5252 = vmatprep.mubr.bf16.mxu0 %v4923_v19  ;;  %5213 = vmatmul.mubr.bf16.vlgmr.msra.gmra.mxu1 %v4920_v23 }
0x13c9   :  { %5253 = vmatmul.mubr.bf16.vlgmr.msra.gmra.mxu0 %v4922_v24  ;;  %11692 = vmatprep.mubr.msk.bf16.mxu1 %vm12868_vm1, %v14172_v37 }
0x13ca   :  { %11697 = vmatpush3.xpose.msra.mxu0 %v13087_v42  ;;  %11698 = vmatprep.mubr.msk.f32.mxu0 %vm12868_vm1, %v14172_v37 }
0x13cb   :  { %11701 = vmatprep.subr.mxu0 %v14172_v37 }
0x1488   :  { %v11252_v40 = vpop.f32.mrf.mxu1 }
0x1489   :  { %v11274_v57 = vpop.f32.mrf.mxu0 }
0x148a   :  { %v11253_v41 = vpop.f32.mrf.mxu1 }
0x148b   :  { %v11254_v60 = vadd.f32 %v11253_v41, %v11252_v40  ;;  %v11275_v28 = vpop.f32.mrf.mxu0 }
0x148c   :  { %v11255_v29 = vpop.f32.mrf.mxu1  ;;  %v11276_v20 = vadd.f32 %v11275_v28, %v11274_v57 }
0x148d   :  { %v5215_v7 = vadd.f32 %v13542_v39, %v11254_v60  ;;  %v11277_v9 = vpop.f32.mrf.mxu0  ;;  %v12185_v29 = vld [vmem:[#allocation10 + $0x38] sm:$0xff]  }
0x148e   :  { %v11256_v35 = vpop.f32.mrf.mxu1  ;;  %11677 = vmatpush3.bf16.msra.mxu1 %v12185_v29  ;;  %v12188_v9 = vld [vmem:[#allocation10 + $0x20] sm:$0xff]  }
0x148f   :  { %v5255_v22 = vadd.f32 %v11276_v20, %v5215_v7  ;;  %v11278_v14 = vpop.f32.mrf.mxu0  ;;  %v12186_v7 = vld [vmem:[#allocation10 + $0x30] sm:$0xff]   ;;  %11678 = vmatprep.subr.bf16.mxu1 %v14172_v37  ;;  %v12187_v20 = vld [vmem:[#allocation10 + $0x28] sm:$0xff]   ;;  %v12189_v35 = vld [vmem:[#allocation10 + $0x18] sm:$0xff]  }
0x1490   :  { %v12191_v14 = vld [vmem:[#allocation10 + $0x8] sm:$0xff]  }
0x1491   :  { %v5267_v27 = vrot.slane %v5255_v22, %v13003_v12  ;;  %v12190_v22 = vld [vmem:[#allocation10 + $0x10] sm:$0xff]  }
0x1492   :  { %11679 = vmatpush3.bf16.msra.mxu1 %v12186_v7 }
0x1493   :  { %v5268_v16 = vcombine.high %v5267_v27, %v5267_v27  ;;  %v5275_v18 = vrot.slane %v5267_v27, %v13003_v12  ;;  %11680 = vmatprep.subr.bf16.mxu1 %v14172_v37  ;;  %v12192_v27 = vld [vmem:[#allocation10] sm:$0xff]  }
0x1495   :  { %v5282_v58 = vrot.slane %v5268_v16, %v13003_v12  ;;  %v5283_v21 = vcombine.high %v5275_v18, %v5275_v18  ;;  %v13549_v36 = vadd.f32 %v5275_v18, %v13492_v4 }
0x1496   :  { %11681 = vmatpush3.bf16.msra.mxu1 %v12187_v20 }
0x1497   :  { %v5284_v26 = vcombine.high %v5282_v58, %v5282_v58  ;;  %v13552_v8 = vadd.f32 %v5282_v58, %v13489_v15  ;;  %v13555_v31 = vadd.f32 %v5283_v21, %v13497_v32  ;;  %v5293_v23 = vmul.f32 %v13549_v36, %v13549_v36  ;;  %11682 = vmatprep.subr.bf16.mxu1 %v14172_v37 }
0x1499   :  { %14173 = vst [vmem:[#allocation28_spill] sm:$0xff] %v13555_v31  ;;  %v13558_v19 = vadd.f32 %v5284_v26, %v13502_v38  ;;  %v5294_v24 = vmul.f32 %v13552_v8, %v13552_v8  ;;  %v5295_v4 = vmul.f32 %v13555_v31, %v13555_v31 }
0x149a   :  { %11683 = vmatpush3.bf16.msra.mxu1 %v12188_v9 }
0x149b   :  { %14174 = vst [vmem:[#allocation29_spill] sm:$0xff] %v13558_v19  ;;  %v5296_v40 = vmul.f32 %v13558_v19, %v13558_v19  ;;  %v5301_v15 = vcombine.low %v5293_v23, %v5294_v24  ;;  %11684 = vmatprep.subr.bf16.mxu1 %v14172_v37 }
0x149d   :  { %v5302_v57 = vcombine.low %v5295_v4, %v5296_v40  ;;  %v5309_v32 = vrot.slane %v5301_v15, %v13003_v12 }
0x149e   :  { %11685 = vmatpush3.bf16.msra.mxu1 %v12189_v35 }
0x149f   :  { %v5316_v41 = vrot.slane %v5302_v57, %v13003_v12  ;;  %11686 = vmatprep.subr.bf16.mxu1 %v14172_v37 }
0x14a1   :  { %v5317_v38 = vcombine.low %v5309_v32, %v5316_v41 }
0x14a2   :  { %11687 = vmatpush3.bf16.msra.mxu1 %v12190_v22 }
0x14a3   :  { %v5324_v60 = vrot.slane %v5317_v38, %v13003_v12  ;;  %11688 = vmatprep.subr.bf16.mxu1 %v14172_v37 }
0x14a5   :  { %v5326_v28 = vsel %vm427_vm0, %v5324_v60, 0.0 }
0x14a6   :  { %5327 = vadd.xlane.f32.xlu0 %v5326_v28  ;;  %11689 = vmatpush3.bf16.msra.mxu1 %v12191_v14 }
0x14a7   :  { %11690 = vmatprep.subr.bf16.mxu1 %v14172_v37 }
0x14aa   :  { %11691 = vmatpush3.bf16.msra.mxu1 %v12192_v27 }
0x152f   :  { %v5328_v16 = vpop.xlane.xlu0 %5327 }
0x1530   :  { %v5329_v18 = vmul.f32 0.0078125, %v5328_v16 }
0x1532   :  { %v5330_v58 = vadd.f32 1e-06, %v5329_v18 }
0x1534   :  { %12541 = vrsqrt.f32 %v5330_v58 }
0x1541   :  { %v12542_v21 = vpop.eup %12541 }
0x1542   :  { %v5336_v26 = vrot.slane %v12542_v21, %v13026_v53  ;;  %v5340_v23 = vrot.slane %v12542_v21, %v13029_v54  ;;  %v5344_v24 = vrot.slane %v12542_v21, %v13032_v55  ;;  %v5348_v4 = vrot.slane %v12542_v21, %v13035_v56 }
0x1544   :  { %v5353_v40 = vmul.f32 %v5336_v26, %v13549_v36  ;;  %v5354_v15 = vmul.f32 %v5340_v23, %v13552_v8  ;;  %v5355_v57 = vmul.f32 %v5344_v24, %v13555_v31  ;;  %v5356_v32 = vmul.f32 %v5348_v4, %v13558_v19 }
0x1545   :  { %v14175_v4 = vmov 0  }
0x1546   :  { %v5357_v41 = vmul.f32 %v5353_v40, %v13042_v63  ;;  %v5358_v38 = vmul.f32 %v5354_v15, %v13045_v0  ;;  %v5359_v60 = vmul.f32 %v5355_v57, %v13049_v2  ;;  %v5360_v28 = vmul.f32 %v5356_v32, %v13053_v3 }
0x1548   :  { %v5361_v29 = vpack.c.bf16 %v5357_v41, %v5357_v41  ;;  %v5362_v7 = vpack.c.bf16 %v5358_v38, %v5358_v38  ;;  %v5363_v20 = vpack.c.bf16 %v5359_v60, %v5359_v60  ;;  %v5364_v9 = vpack.c.bf16 %v5360_v28, %v5360_v28 }
0x154a   :  { %v5386_v35 = vunpack.c.l.b16 %v5362_v7  ;;  %v5387_v22 = vunpack.c.l.b16 %v5363_v20  ;;  %v5388_v14 = vunpack.c.l.b16 %v5364_v9  ;;  %v5385_v27 = vunpack.c.l.b16 %v5361_v29 }
0x154c   :  { %v5389_v16 = vrot.slane %v5386_v35, 7  ;;  %v5391_v18 = vrot.slane %v5387_v22, 6  ;;  %v5393_v21 = vrot.slane %v5388_v14, 5 }
0x154e   :  { %v5390_v58 = vsel %vm521_vm2, %v5389_v16, %v5385_v27 }
0x154f   :  { %v5392_v26 = vsel %vm524_vm3, %v5391_v18, %v5390_v58 }
0x1550   :  { %v5394_v23 = vsel %vm527_vm4, %v5393_v21, %v5392_v26 }
0x1551   :  { %v5395_v24 = vpack.c.b16 %v5394_v23, %v5394_v23 }
0x1553   :  { %11693 = vmatmul.mubr.bf16.vlgmr.msra.gmra.mxu1 %v5395_v24 }
0x1554   :  { %6446 = vmatprep.mubr.bf16.mxu1 %v14175_v4 }
0x1613   :  { %v5479_v40 = vpop.f32.mrf.mxu1 }
0x1614   :  { %v5480_v15 = vadd.f32 %v13442_v13, %v5479_v40 }
0x1615   :  { %v11694_v57 = vpop.f32.mrf.mxu1 }
0x1616   :  { %v5492_v32 = vrot.slane %v5480_v15, %v13003_v12 }
0x1617   :  { %v5482_v41 = vpop.f32.mrf.mxu1 }
0x1618   :  { %v5493_v38 = vcombine.high %v5492_v32, %v5492_v32  ;;  %v5500_v60 = vrot.slane %v5492_v32, %v13003_v12 }
0x1619   :  { %v11695_v28 = vpop.f32.mrf.mxu1 }
0x161a   :  { %11699 = vmatmul.mubr.f32.vlgmr.msra.gmra.mxu0 %v5500_v60  ;;  %v5507_v29 = vrot.slane %v5493_v38, %v13003_v12  ;;  %v5508_v13 = vcombine.high %v5500_v60, %v5500_v60 }
0x161b   :  { %11702 = vmatpush3.xpose.msra.mxu0 %v13094_v46  ;;  %11703 = vmatprep.mubr.msk.f32.mxu0 %vm12868_vm1, %v14172_v37 }
0x161c   :  { %11706 = vmatprep.subr.mxu0 %v14172_v37  ;;  %v5509_v7 = vcombine.high %v5507_v29, %v5507_v29 }
0x161e   :  { %11704 = vmatmul.mubr.f32.vlgmr.msra.gmra.mxu0 %v5507_v29 }
0x161f   :  { %11707 = vmatpush3.xpose.msra.mxu0 %v13099_v51  ;;  %11708 = vmatprep.mubr.msk.f32.mxu0 %vm12868_vm1, %v14172_v37 }
0x1620   :  { %11711 = vmatprep.subr.mxu0 %v14172_v37 }
0x1622   :  { %11709 = vmatmul.mubr.f32.vlgmr.msra.gmra.mxu0 %v5508_v13 }
0x1623   :  { %11712 = vmatpush3.xpose.msra.mxu0 %v13122_v11  ;;  %11713 = vmatprep.mubr.msk.f32.mxu0 %vm12868_vm1, %v14172_v37 }
0x1624   :  { %11716 = vmatprep.subr.mxu0 %v14172_v37 }
0x1626   :  { %11714 = vmatmul.mubr.f32.vlgmr.msra.gmra.mxu0 %v5509_v7 }
0x1627   :  { %11717 = vmatpush3.msra.mxu0 %v13090_v44  ;;  %11718 = vmatprep.mubr.msk.f32.mxu0 %vm12868_vm1, %v14172_v37 }
0x1628   :  { %11721 = vmatprep.subr.mxu0 %v14172_v37 }
0x16da   :  { %v5580_v20 = vpop.f32.mrf.mxu0 }
0x16db   :  { %v5794_v9 = vsel %vm928_vm5, %v5580_v20, -inf }
0x16dc   :  { %5795 = vmax.xlane.f32.xlu1 %v5794_v9  ;;  %v11700_v35 = vpop.f32.mrf.mxu0 }
0x16de   :  { %v5650_v22 = vpop.f32.mrf.mxu0 }
0x16df   :  { %v5797_v14 = vsel %vm928_vm5, %v5650_v22, -inf }
0x16e0   :  { %5798 = vmax.xlane.f32.xlu0 %v5797_v14  ;;  %v11705_v27 = vpop.f32.mrf.mxu0 }
0x16e2   :  { %v5720_v16 = vpop.f32.mrf.mxu0 }
0x16e3   :  { %v5800_v18 = vsel %vm928_vm5, %v5720_v16, -inf }
0x16e4   :  { %5801 = vmax.xlane.f32.xlu1 %v5800_v18  ;;  %v11710_v58 = vpop.f32.mrf.mxu0 }
0x16e6   :  { %v5790_v21 = vpop.f32.mrf.mxu0 }
0x16e7   :  { %v5803_v26 = vsel %vm928_vm5, %v5790_v21, -inf }
0x16e8   :  { %5804 = vmax.xlane.f32.xlu0 %v5803_v26  ;;  %v11715_v23 = vpop.f32.mrf.mxu0 }
0x1765   :  { %v5796_v24 = vpop.xlane.xlu1 %5795 }
0x1766   :  { %v5806_v40 = vsub.f32 %v5580_v20, %v5796_v24 }
0x1768   :  { %v5810_v15 = vmul.f32 1.442695, %v5806_v40 }
0x1769   :  { %v5799_v57 = vpop.xlane.xlu0 %5798 }
0x176a   :  { %12543 = vpow2.f32 %v5810_v15  ;;  %v5807_v32 = vsub.f32 %v5650_v22, %v5799_v57 }
0x176c   :  { %v5812_v41 = vmul.f32 1.442695, %v5807_v32 }
0x176d   :  { %v5802_v38 = vpop.xlane.xlu1 %5801 }
0x176e   :  { %12545 = vpow2.f32 %v5812_v41  ;;  %v5808_v60 = vsub.f32 %v5720_v16, %v5802_v38 }
0x1770   :  { %v5814_v28 = vmul.f32 1.442695, %v5808_v60 }
0x1771   :  { %v5805_v29 = vpop.xlane.xlu0 %5804 }
0x1772   :  { %12547 = vpow2.f32 %v5814_v28  ;;  %v5809_v13 = vsub.f32 %v5790_v21, %v5805_v29 }
0x1774   :  { %v5816_v7 = vmul.f32 1.442695, %v5809_v13 }
0x1776   :  { %12549 = vpow2.f32 %v5816_v7 }
0x1777   :  { %v12544_v9 = vpop.eup %12543 }
0x1778   :  { %v5818_v35 = vsel %vm928_vm5, %v12544_v9, 0.0 }
0x1779   :  { %5819 = vadd.xlane.f32.xlu1 %v5818_v35 }
0x177b   :  { %v12546_v14 = vpop.eup %12545 }
0x177c   :  { %v5821_v20 = vsel %vm928_vm5, %v12546_v14, 0.0 }
0x177d   :  { %5822 = vadd.xlane.f32.xlu0 %v5821_v20 }
0x177f   :  { %v12548_v27 = vpop.eup %12547 }
0x1780   :  { %v5824_v22 = vsel %vm928_vm5, %v12548_v27, 0.0 }
0x1781   :  { %5825 = vadd.xlane.f32.xlu1 %v5824_v22 }
0x1783   :  { %v12550_v18 = vpop.eup %12549 }
0x1784   :  { %v5827_v16 = vsel %vm928_vm5, %v12550_v18, 0.0 }
0x1785   :  { %5828 = vadd.xlane.f32.xlu0 %v5827_v16 }
0x1802   :  { %v5820_v58 = vpop.xlane.xlu1 %5819 }
0x1803   :  { %12551 = vrcp.f32 %v5820_v58 }
0x1806   :  { %v5823_v21 = vpop.xlane.xlu0 %5822 }
0x1807   :  { %12553 = vrcp.f32 %v5823_v21 }
0x180a   :  { %v5826_v26 = vpop.xlane.xlu1 %5825 }
0x180b   :  { %12555 = vrcp.f32 %v5826_v26 }
0x180e   :  { %v5829_v23 = vpop.xlane.xlu0 %5828 }
0x180f   :  { %12557 = vrcp.f32 %v5829_v23 }
0x1810   :  { %v12552_v24 = vpop.eup %12551 }
0x1811   :  { %v5834_v40 = vmul.f32 %v12552_v24, %v12544_v9 }
0x1813   :  { %11719 = vmatmul.mubr.msk.f32.vlgmr.msra.gmra.mxu0 %vm973_vm6, %v5834_v40 }
0x1814   :  { %v12554_v15 = vpop.eup %12553  ;;  %11722 = vmatpush3.msra.mxu0 %v13097_v48  ;;  %11723 = vmatprep.mubr.msk.f32.mxu0 %vm12868_vm1, %v14172_v37 }
0x1815   :  { %11726 = vmatprep.subr.mxu0 %v14172_v37  ;;  %v5835_v57 = vmul.f32 %v12554_v15, %v12546_v14 }
0x1817   :  { %11724 = vmatmul.mubr.msk.f32.vlgmr.msra.gmra.mxu0 %vm973_vm6, %v5835_v57 }
0x1818   :  { %v12556_v32 = vpop.eup %12555  ;;  %11727 = vmatpush3.msra.mxu0 %v13102_v52  ;;  %11728 = vmatprep.mubr.msk.f32.mxu0 %vm12868_vm1, %v14172_v37 }
0x1819   :  { %11731 = vmatprep.subr.mxu0 %v14172_v37  ;;  %v5836_v41 = vmul.f32 %v12556_v32, %v12548_v27 }
0x181b   :  { %11729 = vmatmul.mubr.msk.f32.vlgmr.msra.gmra.mxu0 %vm973_vm6, %v5836_v41 }
0x181c   :  { %v12558_v38 = vpop.eup %12557  ;;  %11732 = vmatpush3.msra.mxu0 %v13146_v17  ;;  %11733 = vmatprep.mubr.msk.f32.mxu0 %vm12868_vm1, %v14172_v37 }
0x181d   :  { %v5837_v60 = vmul.f32 %v12558_v38, %v12550_v18 }
0x181f   :  { %11734 = vmatmul.mubr.msk.f32.vlgmr.msra.gmra.mxu0 %vm973_vm6, %v5837_v60  ;;  %v12195_v60 = vld [vmem:[#allocation13 + $0xe4] ss:$16 sps:$4 sm:$0xff]  }
0x1820   :  { %6487 = vmatprep.mubr.bf16.mxu0 %v14175_v4  ;;  %6414 = vmatprep.subr.bf16.mxu1 %v12195_v60  ;;  %v12225_v60 = vld [vmem:[#allocation13 + $0x44] ss:$16 sps:$4 sm:$0xff]  }
0x18d3   :  { %v5907_v28 = vpop.f32.mrf.mxu0 }
0x18d4   :  { %v13643_v14 = vadd.f32 %v5907_v28, %v13549_v36  ;;  %v12198_v28 = vld [vmem:[#allocation13 + $0xec] ss:$16 sps:$4 sm:$0xff]  }
0x18d5   :  { %v11720_v29 = vpop.f32.mrf.mxu0  ;;  %6455 = vmatprep.subr.bf16.mxu0 %v12198_v28  ;;  %v12228_v28 = vld [vmem:[#allocation13 + $0x4c] ss:$16 sps:$4 sm:$0xff]  }
0x18d6   :  { %v6134_v16 = vmul.f32 %v13643_v14, %v13643_v14  ;;  %v12193_v29 = vld [vmem:[#allocation13 + $0xe0] ss:$16 sps:$4 sm:$0xff]  }
0x18d7   :  { %v5980_v13 = vpop.f32.mrf.mxu0  ;;  %6415 = vmatpush1.bf16.msra.mxu1 %v12193_v29  ;;  %v12223_v29 = vld [vmem:[#allocation13 + $0x40] ss:$16 sps:$4 sm:$0xff]  }
0x18d8   :  { %v13640_v9 = vadd.f32 %v5980_v13, %v13552_v8  ;;  %v12196_v13 = vld [vmem:[#allocation13 + $0xe8] ss:$16 sps:$4 sm:$0xff]  }
0x18d9   :  { %v11725_v7 = vpop.f32.mrf.mxu0  ;;  %6456 = vmatpush1.bf16.msra.mxu0 %v12196_v13  ;;  %v12226_v13 = vld [vmem:[#allocation13 + $0x48] ss:$16 sps:$4 sm:$0xff]  }
0x18da   :  { %v6135_v27 = vmul.f32 %v13640_v9, %v13640_v9  ;;  %v12201_v7 = vld [vmem:[#allocation13 + $0xc4] ss:$16 sps:$4 sm:$0xff]  }
0x18db   :  { %v6053_v35 = vpop.f32.mrf.mxu0  ;;  %6416 = vmatprep.subr.bf16.mxu1 %v12201_v7  ;;  %v12231_v7 = vld [vmem:[#allocation13 + $0x24] ss:$16 sps:$4 sm:$0xff]  }
0x18dc   :  { %v13648_v22 = vadd.f32 %v6053_v35, %v13555_v31  ;;  %v6142_v26 = vcombine.low %v6134_v16, %v6135_v27  ;;  %v12204_v35 = vld [vmem:[#allocation13 + $0xcc] ss:$16 sps:$4 sm:$0xff]   ;;  %v12202_v27 = vld [vmem:[#allocation13 + $0xc8] ss:$16 sps:$4 sm:$0xff]  }
0x18dd   :  { %v11730_v20 = vpop.f32.mrf.mxu0  ;;  %6457 = vmatprep.subr.bf16.mxu0 %v12204_v35  ;;  %v12210_v16 = vld [vmem:[#allocation13 + $0xac] ss:$16 sps:$4 sm:$0xff]  }
0x18de   :  { %v6136_v23 = vmul.f32 %v13648_v22, %v13648_v22  ;;  %v6150_v15 = vrot.slane %v6142_v26, %v13003_v12  ;;  %v12199_v20 = vld [vmem:[#allocation13 + $0xc0] ss:$16 sps:$4 sm:$0xff]   ;;  %6458 = vmatpush1.bf16.msra.mxu0 %v12202_v27  ;;  %v12208_v26 = vld [vmem:[#allocation13 + $0xa8] ss:$16 sps:$4 sm:$0xff]   ;;  %v12234_v35 = vld [vmem:[#allocation13 + $0x2c] ss:$16 sps:$4 sm:$0xff]  }
0x18df   :  { %v6126_v18 = vpop.f32.mrf.mxu0  ;;  %6417 = vmatpush1.bf16.msra.mxu1 %v12199_v20  ;;  %6459 = vmatprep.subr.bf16.mxu0 %v12210_v16  ;;  %v12229_v20 = vld [vmem:[#allocation13 + $0x20] ss:$16 sps:$4 sm:$0xff]   ;;  %v12232_v27 = vld [vmem:[#allocation13 + $0x28] ss:$16 sps:$4 sm:$0xff]   ;;  %v12240_v16 = vld [vmem:[#allocation13 + $0xc] ss:$16 sps:$4 sm:$0xff]  }
0x18e0   :  { %v13653_v58 = vadd.f32 %v6126_v18, %v13558_v19  ;;  %v12207_v18 = vld [vmem:[#allocation13 + $0xa4] ss:$16 sps:$4 sm:$0xff]  }
0x18e1   :  { %v11735_v21 = vpop.f32.mrf.mxu0  ;;  %6418 = vmatprep.subr.bf16.mxu1 %v12207_v18  ;;  %v12237_v18 = vld [vmem:[#allocation13 + $0x4] ss:$16 sps:$4 sm:$0xff]  }
0x18e2   :  { %v6137_v24 = vmul.f32 %v13653_v58, %v13653_v58  ;;  %v12205_v21 = vld [vmem:[#allocation13 + $0xa0] ss:$16 sps:$4 sm:$0xff]   ;;  %6460 = vmatpush1.bf16.msra.mxu0 %v12208_v26  ;;  %v12238_v26 = vld [vmem:[#allocation13 + $0x8] ss:$16 sps:$4 sm:$0xff]  }
0x18e3   :  { %6419 = vmatpush1.bf16.msra.mxu1 %v12205_v21  ;;  %v12235_v21 = vld [vmem:[#allocation13] ss:$16 sps:$4 sm:$0xff]  }
0x18e4   :  { %v6143_v40 = vcombine.low %v6136_v23, %v6137_v24  ;;  %v12213_v23 = vld [vmem:[#allocation13 + $0x84] ss:$16 sps:$4 sm:$0xff]   ;;  %v12216_v24 = vld [vmem:[#allocation13 + $0x8c] ss:$16 sps:$4 sm:$0xff]  }
0x18e5   :  { %6420 = vmatprep.subr.bf16.mxu1 %v12213_v23  ;;  %6461 = vmatprep.subr.bf16.mxu0 %v12216_v24 }
0x18e6   :  { %v6157_v57 = vrot.slane %v6143_v40, %v13003_v12  ;;  %v12211_v40 = vld [vmem:[#allocation13 + $0x80] ss:$16 sps:$4 sm:$0xff]  }
0x18e7   :  { %6421 = vmatpush1.bf16.msra.mxu1 %v12211_v40 }
0x18e8   :  { %v6158_v32 = vcombine.low %v6150_v15, %v6157_v57  ;;  %v12214_v15 = vld [vmem:[#allocation13 + $0x88] ss:$16 sps:$4 sm:$0xff]   ;;  %v12219_v57 = vld [vmem:[#allocation13 + $0x64] ss:$16 sps:$4 sm:$0xff]  }
0x18e9   :  { %6462 = vmatpush1.bf16.msra.mxu0 %v12214_v15  ;;  %6422 = vmatprep.subr.bf16.mxu1 %v12219_v57 }
0x18ea   :  { %v6165_v41 = vrot.slane %v6158_v32, %v13003_v12  ;;  %v12222_v32 = vld [vmem:[#allocation13 + $0x6c] ss:$16 sps:$4 sm:$0xff]  }
0x18eb   :  { %6463 = vmatprep.subr.bf16.mxu0 %v12222_v32 }
0x18ec   :  { %v6167_v38 = vsel %vm427_vm0, %v6165_v41, 0.0  ;;  %v12217_v41 = vld [vmem:[#allocation13 + $0x60] ss:$16 sps:$4 sm:$0xff]  }
0x18ed   :  { %6168 = vadd.xlane.f32.xlu1 %v6167_v38  ;;  %v12220_v38 = vld [vmem:[#allocation13 + $0x68] ss:$16 sps:$4 sm:$0xff]   ;;  %6423 = vmatpush1.bf16.msra.mxu1 %v12217_v41 }
0x18ee   :  { %6464 = vmatpush1.bf16.msra.mxu0 %v12220_v38  ;;  %6424 = vmatprep.subr.bf16.mxu1 %v12225_v60 }
0x18ef   :  { %6465 = vmatprep.subr.bf16.mxu0 %v12228_v28 }
0x18f1   :  { %6425 = vmatpush1.bf16.msra.mxu1 %v12223_v29 }
0x18f2   :  { %6466 = vmatpush1.bf16.msra.mxu0 %v12226_v13  ;;  %6426 = vmatprep.subr.bf16.mxu1 %v12231_v7 }
0x18f3   :  { %6467 = vmatprep.subr.bf16.mxu0 %v12234_v35 }
0x18f5   :  { %6427 = vmatpush1.bf16.msra.mxu1 %v12229_v20 }
0x18f6   :  { %6468 = vmatpush1.bf16.msra.mxu0 %v12232_v27  ;;  %6428 = vmatprep.subr.bf16.mxu1 %v12237_v18 }
0x18f7   :  { %6469 = vmatprep.subr.bf16.mxu0 %v12240_v16 }
0x18f9   :  { %6429 = vmatpush1.bf16.msra.mxu1 %v12235_v21 }
0x18fa   :  { %6470 = vmatpush1.bf16.msra.mxu0 %v12238_v26 }
0x1976   :  { %v6169_v23 = vpop.xlane.xlu1 %6168 }
0x1977   :  { %v6170_v24 = vmul.f32 0.0078125, %v6169_v23 }
0x1979   :  { %v6171_v40 = vadd.f32 1e-06, %v6170_v24 }
0x197b   :  { %12559 = vrsqrt.f32 %v6171_v40 }
0x1988   :  { %v12560_v15 = vpop.eup %12559 }
0x1989   :  { %v6177_v57 = vrot.slane %v12560_v15, %v13026_v53  ;;  %v6181_v32 = vrot.slane %v12560_v15, %v13029_v54  ;;  %v6185_v41 = vrot.slane %v12560_v15, %v13032_v55  ;;  %v6189_v38 = vrot.slane %v12560_v15, %v13035_v56 }
0x198b   :  { %v6194_v60 = vmul.f32 %v6177_v57, %v13643_v14  ;;  %v6195_v28 = vmul.f32 %v6181_v32, %v13640_v9  ;;  %v6196_v29 = vmul.f32 %v6185_v41, %v13648_v22  ;;  %v6197_v13 = vmul.f32 %v6189_v38, %v13653_v58 }
0x198d   :  { %v6198_v7 = vmul.f32 %v6194_v60, %v13182_v43  ;;  %v6199_v35 = vmul.f32 %v6195_v28, %v13185_v45  ;;  %v6200_v20 = vmul.f32 %v6196_v29, %v13189_v47  ;;  %v6201_v27 = vmul.f32 %v6197_v13, %v13193_v49  ;;  %v12241_v13 = vld [vmem:[#allocation14 + $0xf8] sm:$0xff]  }
0x198e   :  { %11327 = vmatprep.subr.bf16.mxu0 %v12241_v13  ;;  %v12261_v13 = vld [vmem:[#allocation14 + $0xd0] sm:$0xff]  }
0x198f   :  { %v6202_v18 = vpack.c.bf16 %v6198_v7, %v6198_v7  ;;  %v6203_v16 = vpack.c.bf16 %v6199_v35, %v6199_v35  ;;  %v6204_v21 = vpack.c.bf16 %v6200_v20, %v6200_v20  ;;  %v6205_v26 = vpack.c.bf16 %v6201_v27, %v6201_v27  ;;  %v12242_v7 = vld [vmem:[#allocation14 + $0x78] sm:$0xff]   ;;  %v12245_v27 = vld [vmem:[#allocation14 + $0xf0] sm:$0xff]  }
0x1990   :  { %v12243_v35 = vld [vmem:[#allocation14 + $0xb8] sm:$0xff]   ;;  %11305 = vmatprep.subr.bf16.mxu1 %v12242_v7  ;;  %v12262_v7 = vld [vmem:[#allocation14 + $0x50] sm:$0xff]  }
0x1991   :  { %v6243_v23 = vunpack.c.l.b16 %v6203_v16  ;;  %v6244_v24 = vunpack.c.l.b16 %v6204_v21  ;;  %v6245_v40 = vunpack.c.l.b16 %v6205_v26  ;;  %v6242_v15 = vunpack.c.l.b16 %v6202_v18  ;;  %v12244_v20 = vld [vmem:[#allocation14 + $0x38] sm:$0xff]   ;;  %v12246_v18 = vld [vmem:[#allocation14 + $0x70] sm:$0xff]   ;;  %v12249_v26 = vld [vmem:[#allocation14 + $0xe8] sm:$0xff]  }
0x1992   :  { %v12247_v16 = vld [vmem:[#allocation14 + $0xb0] sm:$0xff]  }
0x1993   :  { %v6246_v57 = vrot.slane %v6243_v23, 7  ;;  %v6248_v32 = vrot.slane %v6244_v24, 6  ;;  %v6250_v38 = vrot.slane %v6245_v40, 5  ;;  %v12248_v21 = vld [vmem:[#allocation14 + $0x30] sm:$0xff]   ;;  %v12250_v23 = vld [vmem:[#allocation14 + $0x68] sm:$0xff]  }
0x1994   :  { %v12251_v24 = vld [vmem:[#allocation14 + $0xa8] sm:$0xff]  }
0x1995   :  { %v6247_v41 = vsel %vm521_vm2, %v6246_v57, %v6242_v15  ;;  %v12252_v40 = vld [vmem:[#allocation14 + $0x28] sm:$0xff]   ;;  %v12253_v15 = vld [vmem:[#allocation14 + $0xe0] sm:$0xff]  }
0x1996   :  { %v6249_v60 = vsel %vm524_vm3, %v6248_v32, %v6247_v41  ;;  %v12254_v57 = vld [vmem:[#allocation14 + $0x60] sm:$0xff]  }
0x1997   :  { %v6251_v28 = vsel %vm527_vm4, %v6250_v38, %v6249_v60  ;;  %v12255_v32 = vld [vmem:[#allocation14 + $0xa0] sm:$0xff]   ;;  %v12257_v38 = vld [vmem:[#allocation14 + $0xd8] sm:$0xff]  }
0x1998   :  { %v6252_v29 = vpack.c.b16 %v6251_v28, %v6251_v28  ;;  %v12256_v41 = vld [vmem:[#allocation14 + $0x20] sm:$0xff]   ;;  %v12258_v60 = vld [vmem:[#allocation14 + $0x58] sm:$0xff]  }
0x1999   :  { %v12259_v28 = vld [vmem:[#allocation14 + $0x98] sm:$0xff]  }
0x199a   :  { %6447 = vmatmul.mubr.bf16.vlgmr.msra.gmra.mxu1 %v6252_v29  ;;  %6488 = vmatmul.mubr.bf16.vlgmr.msra.gmra.mxu0 %v6252_v29  ;;  %v12260_v29 = vld [vmem:[#allocation14 + $0x18] sm:$0xff]  }
0x199b   :  { %11328 = vmatpush3.bf16.msra.mxu0 %v12243_v35  ;;  %11306 = vmatpush3.bf16.msra.mxu1 %v12244_v20  ;;  %v12263_v35 = vld [vmem:[#allocation14 + $0x90] sm:$0xff]  }
0x199c   :  { %11329 = vmatprep.subr.bf16.mxu0 %v12245_v27  ;;  %11307 = vmatprep.subr.bf16.mxu1 %v12246_v18  ;;  %v12264_v20 = vld [vmem:[#allocation14 + $0x10] sm:$0xff]   ;;  %v12265_v27 = vld [vmem:[#allocation14 + $0xc8] sm:$0xff]  }
0x199d   :  { %v12266_v18 = vld [vmem:[#allocation14 + $0x48] sm:$0xff]  }
0x199f   :  { %11330 = vmatpush3.bf16.msra.mxu0 %v12247_v16  ;;  %11308 = vmatpush3.bf16.msra.mxu1 %v12248_v21  ;;  %v12267_v16 = vld [vmem:[#allocation14 + $0x88] sm:$0xff]  }
0x19a0   :  { %11331 = vmatprep.subr.bf16.mxu0 %v12249_v26  ;;  %11309 = vmatprep.subr.bf16.mxu1 %v12250_v23  ;;  %v12268_v21 = vld [vmem:[#allocation14 + $0x8] sm:$0xff]   ;;  %v12269_v26 = vld [vmem:[#allocation14 + $0xc0] sm:$0xff]  }
0x19a1   :  { %v12270_v23 = vld [vmem:[#allocation14 + $0x40] sm:$0xff]  }
0x19a3   :  { %11332 = vmatpush3.bf16.msra.mxu0 %v12251_v24  ;;  %11310 = vmatpush3.bf16.msra.mxu1 %v12252_v40  ;;  %v12271_v24 = vld [vmem:[#allocation14 + $0x80] sm:$0xff]  }
0x19a4   :  { %11333 = vmatprep.subr.bf16.mxu0 %v12253_v15  ;;  %11311 = vmatprep.subr.bf16.mxu1 %v12254_v57  ;;  %v12272_v40 = vld [vmem:[#allocation14] sm:$0xff]  }
0x19a7   :  { %11334 = vmatpush3.bf16.msra.mxu0 %v12255_v32  ;;  %11312 = vmatpush3.bf16.msra.mxu1 %v12256_v41 }
0x19a8   :  { %11335 = vmatprep.subr.bf16.mxu0 %v12257_v38  ;;  %11313 = vmatprep.subr.bf16.mxu1 %v12258_v60 }
0x19ab   :  { %11336 = vmatpush3.bf16.msra.mxu0 %v12259_v28  ;;  %11314 = vmatpush3.bf16.msra.mxu1 %v12260_v29 }
0x19ac   :  { %11337 = vmatprep.subr.bf16.mxu0 %v12261_v13  ;;  %11315 = vmatprep.subr.bf16.mxu1 %v12262_v7 }
0x19af   :  { %11338 = vmatpush3.bf16.msra.mxu0 %v12263_v35  ;;  %11316 = vmatpush3.bf16.msra.mxu1 %v12264_v20 }
0x19b0   :  { %11339 = vmatprep.subr.bf16.mxu0 %v12265_v27  ;;  %11317 = vmatprep.subr.bf16.mxu1 %v12266_v18 }
0x19b3   :  { %11340 = vmatpush3.bf16.msra.mxu0 %v12267_v16  ;;  %11318 = vmatpush3.bf16.msra.mxu1 %v12268_v21 }
0x19b4   :  { %11341 = vmatprep.subr.bf16.mxu0 %v12269_v26  ;;  %11319 = vmatprep.subr.bf16.mxu1 %v12270_v23 }
0x19b7   :  { %11342 = vmatpush3.bf16.msra.mxu0 %v12271_v24  ;;  %11320 = vmatpush3.bf16.msra.mxu1 %v12272_v40 }
0x19b8   :  { %11756 = vmatprep.subr.mxu0 %v14172_v37  ;;  %11736 = vmatprep.subr.bf16.mxu1 %v14172_v37 }
0x1a5a   :  { %v6448_v15 = vpop.f32.mrf.mxu1  ;;  %v6489_v57 = vpop.f32.mrf.mxu0 }
0x1a5b   :  { %v6449_v32 = vadd.f32 %v6448_v15, %v13216_v30  ;;  %v6490_v41 = vadd.f32 %v6489_v57, %v13219_v33 }
0x1a5c   :  { %v6450_v38 = vpop.f32.mrf.mxu1  ;;  %v6491_v60 = vpop.f32.mrf.mxu0 }
0x1a5d   :  { %v6500_v28 = vmul.f32 0.044715, %v6449_v32  ;;  %v6502_v29 = vmul.f32 0.044715, %v6490_v41  ;;  %v6451_v13 = vadd.f32 %v6450_v38, %v13222_v34  ;;  %v6492_v7 = vadd.f32 %v6491_v60, %v13225_v10 }
0x1a5e   :  { %v6452_v35 = vpop.f32.mrf.mxu1  ;;  %v6493_v20 = vpop.f32.mrf.mxu0 }
0x1a5f   :  { %v6504_v27 = vmul.f32 %v6500_v28, %v6449_v32  ;;  %v6506_v18 = vmul.f32 %v6502_v29, %v6490_v41  ;;  %v6501_v16 = vmul.f32 0.044715, %v6451_v13  ;;  %v6503_v21 = vmul.f32 0.044715, %v6492_v7 }
0x1a60   :  { %v6453_v26 = vpop.f32.mrf.mxu1  ;;  %v6494_v23 = vpop.f32.mrf.mxu0 }
0x1a61   :  { %v6508_v24 = vmul.f32 %v6504_v27, %v6449_v32  ;;  %v6510_v40 = vmul.f32 %v6506_v18, %v6490_v41  ;;  %v6505_v15 = vmul.f32 %v6501_v16, %v6451_v13  ;;  %v6507_v57 = vmul.f32 %v6503_v21, %v6492_v7 }
0x1a62   :  { %v6496_v16 = vmul.f32 0.5, %v6449_v32  ;;  %v6497_v23 = vmul.f32 0.5, %v6451_v13 }
0x1a63   :  { %v6512_v1 = vadd.f32 %v6508_v24, %v6449_v32  ;;  %v6514_v62 = vadd.f32 %v6510_v40, %v6490_v41  ;;  %v6509_v19 = vmul.f32 %v6505_v15, %v6451_v13  ;;  %v6511_v61 = vmul.f32 %v6507_v57, %v6492_v7 }
0x1a64   :  { %v6498_v40 = vmul.f32 0.5, %v6490_v41 }
0x1a65   :  { %v6516_v59 = vmul.f32 0.7978846, %v6512_v1  ;;  %v6518_v38 = vmul.f32 0.7978846, %v6514_v62  ;;  %v6513_v31 = vadd.f32 %v6509_v19, %v6451_v13  ;;  %v6515_v60 = vadd.f32 %v6511_v61, %v6492_v7 }
0x1a66   :  { %v6499_v1 = vmul.f32 0.5, %v6492_v7 }
0x1a67   :  { %v6517_v35 = vmul.f32 0.7978846, %v6513_v31  ;;  %v6519_v20 = vmul.f32 0.7978846, %v6515_v60  ;;  %12561 = vtanh.f32 %v6516_v59 }
0x1a68   :  { %12563 = vtanh.f32 %v6518_v38 }
0x1a69   :  { %12565 = vtanh.f32 %v6517_v35 }
0x1a6a   :  { %12567 = vtanh.f32 %v6519_v20 }
0x1a74   :  { %v12562_v28 = vpop.eup %12561 }
0x1a75   :  { %v12564_v29 = vpop.eup %12563  ;;  %v6524_v27 = vadd.f32 1.0, %v12562_v28 }
0x1a76   :  { %v12566_v18 = vpop.eup %12565  ;;  %v6526_v21 = vadd.f32 1.0, %v12564_v29 }
0x1a77   :  { %v12568_v26 = vpop.eup %12567  ;;  %v6525_v24 = vadd.f32 1.0, %v12566_v18  ;;  %v6528_v19 = vmul.f32 %v6524_v27, %v6496_v16 }
0x1a78   :  { %v6527_v62 = vadd.f32 1.0, %v12568_v26  ;;  %v6530_v31 = vmul.f32 %v6526_v21, %v6498_v40 }
0x1a79   :  { %v6529_v61 = vmul.f32 %v6525_v24, %v6497_v23  ;;  %v6532_v38 = vpack.c.bf16 %v6528_v19, %v6528_v19 }
0x1a7a   :  { %v6531_v15 = vmul.f32 %v6527_v62, %v6499_v1  ;;  %v6534_v60 = vpack.c.bf16 %v6530_v31, %v6530_v31 }
0x1a7b   :  { %v6533_v59 = vpack.c.bf16 %v6529_v61, %v6529_v61 }
0x1a7c   :  { %v6535_v57 = vpack.c.bf16 %v6531_v15, %v6531_v15 }
0x1a7d   :  { %6824 = vmatprep.mubr.bf16.mxu1 %v6533_v59 }
0x1a7e   :  { %6864 = vmatprep.mubr.bf16.mxu0 %v6535_v57  ;;  %6825 = vmatmul.mubr.bf16.vlgmr.msra.gmra.mxu1 %v6532_v38 }
0x1a7f   :  { %6865 = vmatmul.mubr.bf16.vlgmr.msra.gmra.mxu0 %v6534_v60  ;;  %11752 = vmatprep.mubr.msk.bf16.mxu1 %vm12868_vm1, %v14172_v37 }
0x1a80   :  { %11757 = vmatpush3.xpose.msra.mxu0 %v13087_v42  ;;  %11758 = vmatprep.mubr.msk.f32.mxu0 %vm12868_vm1, %v14172_v37 }
0x1a81   :  { %11761 = vmatprep.subr.mxu0 %v14172_v37 }
0x1b3e   :  { %v11321_v32 = vpop.f32.mrf.mxu1 }
0x1b3f   :  { %v11343_v41 = vpop.f32.mrf.mxu0 }
0x1b40   :  { %v11322_v13 = vpop.f32.mrf.mxu1 }
0x1b41   :  { %v11323_v7 = vadd.f32 %v11322_v13, %v11321_v32  ;;  %v11344_v35 = vpop.f32.mrf.mxu0  ;;  %v12273_v13 = vld [vmem:[#allocation10 + $0x38] sm:$0xff]  }
0x1b42   :  { %v11324_v20 = vpop.f32.mrf.mxu1  ;;  %v11345_v29 = vadd.f32 %v11344_v35, %v11343_v41  ;;  %11737 = vmatpush3.bf16.msra.mxu1 %v12273_v13  ;;  %v12275_v35 = vld [vmem:[#allocation10 + $0x28] sm:$0xff]  }
0x1b43   :  { %v6827_v28 = vadd.f32 %v13542_v39, %v11323_v7  ;;  %v11346_v27 = vpop.f32.mrf.mxu0  ;;  %v12274_v7 = vld [vmem:[#allocation10 + $0x30] sm:$0xff]   ;;  %11738 = vmatprep.subr.bf16.mxu1 %v14172_v37  ;;  %v12276_v20 = vld [vmem:[#allocation10 + $0x20] sm:$0xff]  }
0x1b44   :  { %v11325_v18 = vpop.f32.mrf.mxu1  ;;  %v12279_v27 = vld [vmem:[#allocation10 + $0x8] sm:$0xff]  }
0x1b45   :  { %v6867_v16 = vadd.f32 %v11345_v29, %v6827_v28  ;;  %v11347_v21 = vpop.f32.mrf.mxu0  ;;  %v12277_v28 = vld [vmem:[#allocation10 + $0x18] sm:$0xff]   ;;  %v12278_v29 = vld [vmem:[#allocation10 + $0x10] sm:$0xff]   ;;  %v12280_v18 = vld [vmem:[#allocation10] sm:$0xff]  }
0x1b46   :  { %11739 = vmatpush3.bf16.msra.mxu1 %v12274_v7 }
0x1b47   :  { %v6879_v26 = vrot.slane %v6867_v16, %v13003_v12  ;;  %11740 = vmatprep.subr.bf16.mxu1 %v14172_v37 }
0x1b49   :  { %v6880_v23 = vcombine.high %v6879_v26, %v6879_v26  ;;  %v6887_v24 = vrot.slane %v6879_v26, %v13003_v12 }
0x1b4a   :  { %11741 = vmatpush3.bf16.msra.mxu1 %v12275_v35 }
0x1b4b   :  { %v6894_v40 = vrot.slane %v6880_v23, %v13003_v12  ;;  %v6895_v1 = vcombine.high %v6887_v24, %v6887_v24  ;;  %v13695_v62 = vadd.f32 %v6887_v24, %v13643_v14  ;;  %11742 = vmatprep.subr.bf16.mxu1 %v14172_v37 }
0x1b4d   :  { %14176 = vst [vmem:[#allocation30_spill] sm:$0xff] %v13695_v62  ;;  %v6896_v19 = vcombine.high %v6894_v40, %v6894_v40  ;;  %v13698_v61 = vadd.f32 %v6894_v40, %v13640_v9  ;;  %v13701_v39 = vadd.f32 %v6895_v1, %v13648_v22  ;;  %v6905_v15 = vmul.f32 %v13695_v62, %v13695_v62 }
0x1b4e   :  { %11743 = vmatpush3.bf16.msra.mxu1 %v12276_v20 }
0x1b4f   :  { %14177 = vst [vmem:[#allocation31_spill] sm:$0xff] %v13698_v61  ;;  %14178 = vst [vmem:[#allocation32_spill] sm:$0xff] %v13701_v39  ;;  %v13704_v31 = vadd.f32 %v6896_v19, %v13653_v58  ;;  %v6906_v59 = vmul.f32 %v13698_v61, %v13698_v61  ;;  %v6907_v14 = vmul.f32 %v13701_v39, %v13701_v39  ;;  %11744 = vmatprep.subr.bf16.mxu1 %v14172_v37 }
0x1b51   :  { %14179 = vst [vmem:[#allocation33_spill] sm:$0xff] %v13704_v31  ;;  %v6908_v57 = vmul.f32 %v13704_v31, %v13704_v31  ;;  %v6913_v9 = vcombine.low %v6905_v15, %v6906_v59 }
0x1b52   :  { %11745 = vmatpush3.bf16.msra.mxu1 %v12277_v28 }
0x1b53   :  { %v6914_v38 = vcombine.low %v6907_v14, %v6908_v57  ;;  %v6921_v22 = vrot.slane %v6913_v9, %v13003_v12  ;;  %11746 = vmatprep.subr.bf16.mxu1 %v14172_v37 }
0x1b55   :  { %v6928_v60 = vrot.slane %v6914_v38, %v13003_v12 }
0x1b56   :  { %11747 = vmatpush3.bf16.msra.mxu1 %v12278_v29 }
0x1b57   :  { %v6929_v58 = vcombine.low %v6921_v22, %v6928_v60  ;;  %11748 = vmatprep.subr.bf16.mxu1 %v14172_v37 }
0x1b59   :  { %v6936_v32 = vrot.slane %v6929_v58, %v13003_v12 }
0x1b5a   :  { %11749 = vmatpush3.bf16.msra.mxu1 %v12279_v27 }
0x1b5b   :  { %v6938_v41 = vsel %vm427_vm0, %v6936_v32, 0.0  ;;  %11750 = vmatprep.subr.bf16.mxu1 %v14172_v37 }
0x1b5c   :  { %6939 = vadd.xlane.f32.xlu0 %v6938_v41 }
0x1b5e   :  { %11751 = vmatpush3.bf16.msra.mxu1 %v12280_v18 }
0x1b5f   :  { %11791 = vmatprep.subr.mxu1 %v14172_v37 }
0x1be5   :  { %v6940_v16 = vpop.xlane.xlu0 %6939 }
0x1be6   :  { %v6941_v21 = vmul.f32 0.0078125, %v6940_v16 }
0x1be8   :  { %v6942_v26 = vadd.f32 1e-06, %v6941_v21 }
0x1bea   :  { %12569 = vrsqrt.f32 %v6942_v26 }
0x1bf7   :  { %v12570_v23 = vpop.eup %12569 }
0x1bf8   :  { %v6948_v24 = vrot.slane %v12570_v23, %v13026_v53  ;;  %v6952_v40 = vrot.slane %v12570_v23, %v13029_v54  ;;  %v6956_v1 = vrot.slane %v12570_v23, %v13032_v55  ;;  %v6960_v19 = vrot.slane %v12570_v23, %v13035_v56 }
0x1bfa   :  { %v6965_v15 = vmul.f32 %v6948_v24, %v13695_v62  ;;  %v6966_v59 = vmul.f32 %v6952_v40, %v13698_v61  ;;  %v6967_v14 = vmul.f32 %v6956_v1, %v13701_v39  ;;  %v6968_v57 = vmul.f32 %v6960_v19, %v13704_v31  ;;  %v13747_v40 = vld [vmem:[%s14135_s7] ss:$0 sm:$0xff] }
0x1bfc   :  { %v6969_v9 = vmul.f32 %v6965_v15, %v13042_v63  ;;  %v6970_v38 = vmul.f32 %v6966_v59, %v13045_v0  ;;  %v6971_v22 = vmul.f32 %v6967_v14, %v13049_v2  ;;  %v6972_v60 = vmul.f32 %v6968_v57, %v13053_v3 }
0x1bfe   :  { %v6973_v58 = vpack.c.bf16 %v6969_v9, %v6969_v9  ;;  %v6974_v32 = vpack.c.bf16 %v6970_v38, %v6970_v38  ;;  %v6975_v41 = vpack.c.bf16 %v6971_v22, %v6971_v22  ;;  %v6976_v13 = vpack.c.bf16 %v6972_v60, %v6972_v60 }
0x1c00   :  { %v6998_v7 = vunpack.c.l.b16 %v6974_v32  ;;  %v6999_v35 = vunpack.c.l.b16 %v6975_v41  ;;  %v7000_v20 = vunpack.c.l.b16 %v6976_v13  ;;  %v6997_v28 = vunpack.c.l.b16 %v6973_v58 }
0x1c02   :  { %v7001_v29 = vrot.slane %v6998_v7, 7  ;;  %v7003_v27 = vrot.slane %v6999_v35, 6  ;;  %v7005_v16 = vrot.slane %v7000_v20, 5 }
0x1c04   :  { %v7002_v18 = vsel %vm521_vm2, %v7001_v29, %v6997_v28 }
0x1c05   :  { %v7004_v21 = vsel %vm524_vm3, %v7003_v27, %v7002_v18 }
0x1c06   :  { %v7006_v26 = vsel %vm527_vm4, %v7005_v16, %v7004_v21 }
0x1c07   :  { %v7007_v23 = vpack.c.b16 %v7006_v26, %v7006_v26 }
0x1c09   :  { %11753 = vmatmul.mubr.bf16.vlgmr.msra.gmra.mxu1 %v7007_v23 }
0x1c0a   :  { %11792 = vmatpush3.msra.mxu1 %v13146_v17  ;;  %11793 = vmatprep.mubr.msk.f32.mxu1 %vm12868_vm1, %v14172_v37 }
0x1cc9   :  { %v7091_v24 = vpop.f32.mrf.mxu1 }
0x1cca   :  { %v7092_v1 = vadd.f32 %v13747_v40, %v7091_v24 }
0x1ccb   :  { %v11754_v19 = vpop.f32.mrf.mxu1 }
0x1ccc   :  { %v7104_v15 = vrot.slane %v7092_v1, %v13003_v12 }
0x1ccd   :  { %v7094_v59 = vpop.f32.mrf.mxu1 }
0x1cce   :  { %v7105_v14 = vcombine.high %v7104_v15, %v7104_v15  ;;  %v7112_v57 = vrot.slane %v7104_v15, %v13003_v12 }
0x1ccf   :  { %v11755_v9 = vpop.f32.mrf.mxu1 }
0x1cd0   :  { %11759 = vmatmul.mubr.f32.vlgmr.msra.gmra.mxu0 %v7112_v57  ;;  %v7119_v38 = vrot.slane %v7105_v14, %v13003_v12  ;;  %v7120_v22 = vcombine.high %v7112_v57, %v7112_v57 }
0x1cd1   :  { %11762 = vmatpush3.xpose.msra.mxu0 %v13094_v46  ;;  %11763 = vmatprep.mubr.msk.f32.mxu0 %vm12868_vm1, %v14172_v37 }
0x1cd2   :  { %11766 = vmatprep.subr.mxu0 %v14172_v37  ;;  %v7121_v60 = vcombine.high %v7119_v38, %v7119_v38 }
0x1cd4   :  { %11764 = vmatmul.mubr.f32.vlgmr.msra.gmra.mxu0 %v7119_v38 }
0x1cd5   :  { %11767 = vmatpush3.xpose.msra.mxu0 %v13099_v51  ;;  %11768 = vmatprep.mubr.msk.f32.mxu0 %vm12868_vm1, %v14172_v37 }
0x1cd6   :  { %11771 = vmatprep.subr.mxu0 %v14172_v37 }
0x1cd8   :  { %11769 = vmatmul.mubr.f32.vlgmr.msra.gmra.mxu0 %v7120_v22 }
0x1cd9   :  { %11772 = vmatpush3.xpose.msra.mxu0 %v13122_v11  ;;  %11773 = vmatprep.mubr.msk.f32.mxu0 %vm12868_vm1, %v14172_v37 }
0x1cda   :  { %11776 = vmatprep.subr.mxu0 %v14172_v37 }
0x1cdc   :  { %11774 = vmatmul.mubr.f32.vlgmr.msra.gmra.mxu0 %v7121_v60 }
0x1cdd   :  { %11777 = vmatpush3.msra.mxu0 %v13090_v44  ;;  %11778 = vmatprep.mubr.msk.f32.mxu0 %vm12868_vm1, %v14172_v37 }
0x1cde   :  { %11781 = vmatprep.subr.mxu0 %v14172_v37 }
0x1d90   :  { %v7192_v58 = vpop.f32.mrf.mxu0 }
0x1d91   :  { %v7406_v32 = vsel %vm928_vm5, %v7192_v58, -inf }
0x1d92   :  { %7407 = vmax.xlane.f32.xlu1 %v7406_v32  ;;  %v11760_v41 = vpop.f32.mrf.mxu0 }
0x1d94   :  { %v7262_v13 = vpop.f32.mrf.mxu0 }
0x1d95   :  { %v7409_v7 = vsel %vm928_vm5, %v7262_v13, -inf }
0x1d96   :  { %7410 = vmax.xlane.f32.xlu0 %v7409_v7  ;;  %v11765_v35 = vpop.f32.mrf.mxu0 }
0x1d98   :  { %v7332_v20 = vpop.f32.mrf.mxu0 }
0x1d99   :  { %v7412_v28 = vsel %vm928_vm5, %v7332_v20, -inf }
0x1d9a   :  { %7413 = vmax.xlane.f32.xlu1 %v7412_v28  ;;  %v11770_v29 = vpop.f32.mrf.mxu0 }
0x1d9c   :  { %v7402_v27 = vpop.f32.mrf.mxu0 }
0x1d9d   :  { %v7415_v18 = vsel %vm928_vm5, %v7402_v27, -inf }
0x1d9e   :  { %7416 = vmax.xlane.f32.xlu0 %v7415_v18  ;;  %v11775_v16 = vpop.f32.mrf.mxu0 }
0x1e1b   :  { %v7408_v21 = vpop.xlane.xlu1 %7407 }
0x1e1c   :  { %v7418_v26 = vsub.f32 %v7192_v58, %v7408_v21 }
0x1e1e   :  { %v7422_v23 = vmul.f32 1.442695, %v7418_v26 }
0x1e1f   :  { %v7411_v24 = vpop.xlane.xlu0 %7410 }
0x1e20   :  { %12571 = vpow2.f32 %v7422_v23  ;;  %v7419_v1 = vsub.f32 %v7262_v13, %v7411_v24 }
0x1e22   :  { %v7424_v19 = vmul.f32 1.442695, %v7419_v1 }
0x1e23   :  { %v7414_v15 = vpop.xlane.xlu1 %7413 }
0x1e24   :  { %12573 = vpow2.f32 %v7424_v19  ;;  %v7420_v59 = vsub.f32 %v7332_v20, %v7414_v15 }
0x1e26   :  { %v7426_v14 = vmul.f32 1.442695, %v7420_v59 }
0x1e27   :  { %v7417_v57 = vpop.xlane.xlu0 %7416 }
0x1e28   :  { %12575 = vpow2.f32 %v7426_v14  ;;  %v7421_v9 = vsub.f32 %v7402_v27, %v7417_v57 }
0x1e2a   :  { %v7428_v38 = vmul.f32 1.442695, %v7421_v9 }
0x1e2c   :  { %12577 = vpow2.f32 %v7428_v38 }
0x1e2d   :  { %v12572_v22 = vpop.eup %12571 }
0x1e2e   :  { %v7430_v60 = vsel %vm928_vm5, %v12572_v22, 0.0 }
0x1e2f   :  { %7431 = vadd.xlane.f32.xlu1 %v7430_v60 }
0x1e31   :  { %v12574_v32 = vpop.eup %12573 }
0x1e32   :  { %v7433_v58 = vsel %vm928_vm5, %v12574_v32, 0.0 }
0x1e33   :  { %7434 = vadd.xlane.f32.xlu0 %v7433_v58 }
0x1e35   :  { %v12576_v41 = vpop.eup %12575 }
0x1e36   :  { %v7436_v13 = vsel %vm928_vm5, %v12576_v41, 0.0 }
0x1e37   :  { %7437 = vadd.xlane.f32.xlu1 %v7436_v13 }
0x1e39   :  { %v12578_v7 = vpop.eup %12577 }
0x1e3a   :  { %v7439_v35 = vsel %vm928_vm5, %v12578_v7, 0.0 }
0x1e3b   :  { %7440 = vadd.xlane.f32.xlu0 %v7439_v35 }
0x1eb8   :  { %v7432_v20 = vpop.xlane.xlu1 %7431 }
0x1eb9   :  { %12579 = vrcp.f32 %v7432_v20 }
0x1ebc   :  { %v7435_v28 = vpop.xlane.xlu0 %7434 }
0x1ebd   :  { %12581 = vrcp.f32 %v7435_v28 }
0x1ec0   :  { %v7438_v29 = vpop.xlane.xlu1 %7437 }
0x1ec1   :  { %12583 = vrcp.f32 %v7438_v29 }
0x1ec4   :  { %v7441_v27 = vpop.xlane.xlu0 %7440 }
0x1ec5   :  { %12585 = vrcp.f32 %v7441_v27 }
0x1ec6   :  { %v12580_v18 = vpop.eup %12579 }
0x1ec7   :  { %v7446_v16 = vmul.f32 %v12580_v18, %v12572_v22 }
0x1ec9   :  { %11779 = vmatmul.mubr.msk.f32.vlgmr.msra.gmra.mxu0 %vm973_vm6, %v7446_v16 }
0x1eca   :  { %v12582_v21 = vpop.eup %12581  ;;  %11782 = vmatpush3.msra.mxu0 %v13097_v48  ;;  %11783 = vmatprep.mubr.msk.f32.mxu0 %vm12868_vm1, %v14172_v37 }
0x1ecb   :  { %11786 = vmatprep.subr.mxu0 %v14172_v37  ;;  %v7447_v26 = vmul.f32 %v12582_v21, %v12574_v32 }
0x1ecd   :  { %11784 = vmatmul.mubr.msk.f32.vlgmr.msra.gmra.mxu0 %vm973_vm6, %v7447_v26 }
0x1ece   :  { %v12584_v23 = vpop.eup %12583  ;;  %11787 = vmatpush3.msra.mxu0 %v13102_v52  ;;  %11788 = vmatprep.mubr.msk.f32.mxu0 %vm12868_vm1, %v14172_v37 }
0x1ecf   :  { %v7448_v24 = vmul.f32 %v12584_v23, %v12576_v41 }
0x1ed1   :  { %11789 = vmatmul.mubr.msk.f32.vlgmr.msra.gmra.mxu0 %vm973_vm6, %v7448_v24  ;;  %v12283_v24 = vld [vmem:[#allocation13 + $0xe4] ss:$16 sps:$4 sm:$0xff]  }
0x1ed2   :  { %v12586_v1 = vpop.eup %12585  ;;  %8058 = vmatprep.mubr.bf16.mxu0 %v14175_v4  ;;  %8026 = vmatprep.subr.bf16.mxu0 %v12283_v24  ;;  %v12311_v24 = vld [vmem:[#allocation13 + $0x40] ss:$16 sps:$4 sm:$0xff]  }
0x1ed3   :  { %v7449_v19 = vmul.f32 %v12586_v1, %v12578_v7  ;;  %v12286_v1 = vld [vmem:[#allocation13 + $0xec] ss:$16 sps:$4 sm:$0xff]  }
0x1ed4   :  { %8067 = vmatprep.subr.bf16.mxu1 %v12286_v1  ;;  %v12314_v1 = vld [vmem:[#allocation13 + $0x48] ss:$16 sps:$4 sm:$0xff]  }
0x1ed5   :  { %11794 = vmatmul.mubr.msk.f32.vlgmr.msra.gmra.mxu1 %vm973_vm6, %v7449_v19  ;;  %v12281_v19 = vld [vmem:[#allocation13 + $0xe0] ss:$16 sps:$4 sm:$0xff]  }
0x1ed6   :  { %8099 = vmatprep.mubr.bf16.mxu1 %v14175_v4  ;;  %8027 = vmatpush1.bf16.msra.mxu0 %v12281_v19  ;;  %v12319_v19 = vld [vmem:[#allocation13 + $0x24] ss:$16 sps:$4 sm:$0xff]  }
0x1f89   :  { %v7519_v15 = vpop.f32.mrf.mxu0 }
0x1f8a   :  { %v13794_v22 = vadd.f32 %v7519_v15, %v13695_v62  ;;  %v12284_v15 = vld [vmem:[#allocation13 + $0xe8] ss:$16 sps:$4 sm:$0xff]  }
0x1f8b   :  { %v11780_v59 = vpop.f32.mrf.mxu0  ;;  %8068 = vmatpush1.bf16.msra.mxu1 %v12284_v15  ;;  %v12322_v15 = vld [vmem:[#allocation13 + $0x2c] ss:$16 sps:$4 sm:$0xff]  }
0x1f8c   :  { %v7746_v13 = vmul.f32 %v13794_v22, %v13794_v22  ;;  %v12289_v59 = vld [vmem:[#allocation13 + $0xc4] ss:$16 sps:$4 sm:$0xff]  }
0x1f8d   :  { %v7592_v14 = vpop.f32.mrf.mxu0  ;;  %8028 = vmatprep.subr.bf16.mxu0 %v12289_v59  ;;  %v12317_v59 = vld [vmem:[#allocation13 + $0x20] ss:$16 sps:$4 sm:$0xff]  }
0x1f8e   :  { %v13791_v9 = vadd.f32 %v7592_v14, %v13698_v61  ;;  %v12292_v14 = vld [vmem:[#allocation13 + $0xcc] ss:$16 sps:$4 sm:$0xff]  }
0x1f8f   :  { %v11785_v57 = vpop.f32.mrf.mxu0  ;;  %8069 = vmatprep.subr.bf16.mxu1 %v12292_v14  ;;  %v12320_v14 = vld [vmem:[#allocation13 + $0x28] ss:$16 sps:$4 sm:$0xff]  }
0x1f90   :  { %v7747_v32 = vmul.f32 %v13791_v9, %v13791_v9  ;;  %v12287_v57 = vld [vmem:[#allocation13 + $0xc0] ss:$16 sps:$4 sm:$0xff]  }
0x1f91   :  { %v7665_v38 = vpop.f32.mrf.mxu0  ;;  %8029 = vmatpush1.bf16.msra.mxu0 %v12287_v57  ;;  %v12325_v57 = vld [vmem:[#allocation13 + $0x4] ss:$16 sps:$4 sm:$0xff]  }
0x1f92   :  { %v13799_v58 = vadd.f32 %v7665_v38, %v13701_v39  ;;  %v7754_v20 = vcombine.low %v7746_v13, %v7747_v32  ;;  %v12290_v38 = vld [vmem:[#allocation13 + $0xc8] ss:$16 sps:$4 sm:$0xff]   ;;  %v12298_v32 = vld [vmem:[#allocation13 + $0xac] ss:$16 sps:$4 sm:$0xff]  }
0x1f93   :  { %v11790_v60 = vpop.f32.mrf.mxu0  ;;  %8070 = vmatpush1.bf16.msra.mxu1 %v12290_v38  ;;  %v12296_v13 = vld [vmem:[#allocation13 + $0xa8] ss:$16 sps:$4 sm:$0xff]   ;;  %v12328_v38 = vld [vmem:[#allocation13 + $0xc] ss:$16 sps:$4 sm:$0xff]  }
0x1f94   :  { %v7748_v28 = vmul.f32 %v13799_v58, %v13799_v58  ;;  %v7762_v18 = vrot.slane %v7754_v20, %v13003_v12  ;;  %v12295_v60 = vld [vmem:[#allocation13 + $0xa4] ss:$16 sps:$4 sm:$0xff]   ;;  %8071 = vmatprep.subr.bf16.mxu1 %v12298_v32  ;;  %v12304_v20 = vld [vmem:[#allocation13 + $0x8c] ss:$16 sps:$4 sm:$0xff]   ;;  %v12326_v32 = vld [vmem:[#allocation13 + $0x8] ss:$16 sps:$4 sm:$0xff]  }
0x1f95   :  { %v7738_v41 = vpop.f32.mrf.mxu1  ;;  %8030 = vmatprep.subr.bf16.mxu0 %v12295_v60  ;;  %v12323_v60 = vld [vmem:[#allocation13] ss:$16 sps:$4 sm:$0xff]  }
0x1f96   :  { %v13804_v7 = vadd.f32 %v7738_v41, %v13704_v31  ;;  %v12293_v41 = vld [vmem:[#allocation13 + $0xa0] ss:$16 sps:$4 sm:$0xff]  }
0x1f97   :  { %v11795_v35 = vpop.f32.mrf.mxu1  ;;  %8031 = vmatpush1.bf16.msra.mxu0 %v12293_v41  ;;  %8072 = vmatpush1.bf16.msra.mxu1 %v12296_v13 }
0x1f98   :  { %v7749_v29 = vmul.f32 %v13804_v7, %v13804_v7  ;;  %v12301_v35 = vld [vmem:[#allocation13 + $0x84] ss:$16 sps:$4 sm:$0xff]   ;;  %8073 = vmatprep.subr.bf16.mxu1 %v12304_v20 }
0x1f99   :  { %8032 = vmatprep.subr.bf16.mxu0 %v12301_v35 }
0x1f9a   :  { %v7755_v27 = vcombine.low %v7748_v28, %v7749_v29  ;;  %v12299_v28 = vld [vmem:[#allocation13 + $0x80] ss:$16 sps:$4 sm:$0xff]   ;;  %v12302_v29 = vld [vmem:[#allocation13 + $0x88] ss:$16 sps:$4 sm:$0xff]  }
0x1f9b   :  { %8033 = vmatpush1.bf16.msra.mxu0 %v12299_v28  ;;  %8074 = vmatpush1.bf16.msra.mxu1 %v12302_v29 }
0x1f9c   :  { %v7769_v16 = vrot.slane %v7755_v27, %v13003_v12  ;;  %v12307_v27 = vld [vmem:[#allocation13 + $0x64] ss:$16 sps:$4 sm:$0xff]  }
0x1f9d   :  { %8034 = vmatprep.subr.bf16.mxu0 %v12307_v27 }
0x1f9e   :  { %v7770_v21 = vcombine.low %v7762_v18, %v7769_v16  ;;  %v12310_v18 = vld [vmem:[#allocation13 + $0x6c] ss:$16 sps:$4 sm:$0xff]   ;;  %v12305_v16 = vld [vmem:[#allocation13 + $0x60] ss:$16 sps:$4 sm:$0xff]  }
0x1f9f   :  { %8075 = vmatprep.subr.bf16.mxu1 %v12310_v18  ;;  %8035 = vmatpush1.bf16.msra.mxu0 %v12305_v16 }
0x1fa0   :  { %v7777_v26 = vrot.slane %v7770_v21, %v13003_v12  ;;  %v12308_v21 = vld [vmem:[#allocation13 + $0x68] ss:$16 sps:$4 sm:$0xff]  }
0x1fa1   :  { %8076 = vmatpush1.bf16.msra.mxu1 %v12308_v21 }
0x1fa2   :  { %v7779_v23 = vsel %vm427_vm0, %v7777_v26, 0.0  ;;  %v12313_v26 = vld [vmem:[#allocation13 + $0x44] ss:$16 sps:$4 sm:$0xff]  }
0x1fa3   :  { %7780 = vadd.xlane.f32.xlu1 %v7779_v23  ;;  %v12316_v23 = vld [vmem:[#allocation13 + $0x4c] ss:$16 sps:$4 sm:$0xff]   ;;  %8036 = vmatprep.subr.bf16.mxu0 %v12313_v26 }
0x1fa4   :  { %8077 = vmatprep.subr.bf16.mxu1 %v12316_v23  ;;  %8037 = vmatpush1.bf16.msra.mxu0 %v12311_v24 }
0x1fa5   :  { %8078 = vmatpush1.bf16.msra.mxu1 %v12314_v1  ;;  %8038 = vmatprep.subr.bf16.mxu0 %v12319_v19 }
0x1fa6   :  { %8079 = vmatprep.subr.bf16.mxu1 %v12322_v15 }
0x1fa8   :  { %8039 = vmatpush1.bf16.msra.mxu0 %v12317_v59 }
0x1fa9   :  { %8080 = vmatpush1.bf16.msra.mxu1 %v12320_v14  ;;  %8040 = vmatprep.subr.bf16.mxu0 %v12325_v57 }
0x1faa   :  { %8081 = vmatprep.subr.bf16.mxu1 %v12328_v38 }
0x1fac   :  { %8041 = vmatpush1.bf16.msra.mxu0 %v12323_v60 }
0x1fad   :  { %8082 = vmatpush1.bf16.msra.mxu1 %v12326_v32 }
0x202c   :  { %v7781_v41 = vpop.xlane.xlu1 %7780 }
0x202d   :  { %v7782_v13 = vmul.f32 0.0078125, %v7781_v41 }
0x202f   :  { %v7783_v35 = vadd.f32 1e-06, %v7782_v13 }
0x2031   :  { %12587 = vrsqrt.f32 %v7783_v35 }
0x203e   :  { %v12588_v20 = vpop.eup %12587 }
0x203f   :  { %v7789_v28 = vrot.slane %v12588_v20, %v13026_v53  ;;  %v7793_v29 = vrot.slane %v12588_v20, %v13029_v54  ;;  %v7797_v27 = vrot.slane %v12588_v20, %v13032_v55  ;;  %v7801_v18 = vrot.slane %v12588_v20, %v13035_v56 }
0x2041   :  { %v7806_v16 = vmul.f32 %v7789_v28, %v13794_v22  ;;  %v7807_v21 = vmul.f32 %v7793_v29, %v13791_v9  ;;  %v7808_v26 = vmul.f32 %v7797_v27, %v13799_v58  ;;  %v7809_v23 = vmul.f32 %v7801_v18, %v13804_v7 }
0x2043   :  { %v7810_v24 = vmul.f32 %v7806_v16, %v13182_v43  ;;  %v7811_v1 = vmul.f32 %v7807_v21, %v13185_v45  ;;  %v7812_v19 = vmul.f32 %v7808_v26, %v13189_v47  ;;  %v7813_v15 = vmul.f32 %v7809_v23, %v13193_v49  ;;  %v12329_v21 = vld [vmem:[#allocation14 + $0xf8] sm:$0xff]  }
0x2044   :  { %v12330_v26 = vld [vmem:[#allocation14 + $0x78] sm:$0xff]   ;;  %11396 = vmatprep.subr.bf16.mxu1 %v12329_v21  ;;  %v12351_v21 = vld [vmem:[#allocation14 + $0x90] sm:$0xff]  }
0x2045   :  { %v7814_v59 = vpack.c.bf16 %v7810_v24, %v7810_v24  ;;  %v7815_v14 = vpack.c.bf16 %v7811_v1, %v7811_v1  ;;  %v7816_v57 = vpack.c.bf16 %v7812_v19, %v7812_v19  ;;  %v7817_v38 = vpack.c.bf16 %v7813_v15, %v7813_v15  ;;  %v12331_v23 = vld [vmem:[#allocation14 + $0xb8] sm:$0xff]   ;;  %11374 = vmatprep.subr.bf16.mxu0 %v12330_v26  ;;  %v12333_v1 = vld [vmem:[#allocation14 + $0xf0] sm:$0xff]  }
0x2046   :  { %v12332_v24 = vld [vmem:[#allocation14 + $0x38] sm:$0xff]   ;;  %v12334_v19 = vld [vmem:[#allocation14 + $0x70] sm:$0xff]  }
0x2047   :  { %v7855_v60 = vunpack.c.l.b16 %v7815_v14  ;;  %v7856_v32 = vunpack.c.l.b16 %v7816_v57  ;;  %v7857_v41 = vunpack.c.l.b16 %v7817_v38  ;;  %v7854_v13 = vunpack.c.l.b16 %v7814_v59  ;;  %v12335_v15 = vld [vmem:[#allocation14 + $0xb0] sm:$0xff]   ;;  %v12337_v14 = vld [vmem:[#allocation14 + $0xe8] sm:$0xff]  }
0x2048   :  { %v12336_v59 = vld [vmem:[#allocation14 + $0x30] sm:$0xff]   ;;  %v12338_v57 = vld [vmem:[#allocation14 + $0x68] sm:$0xff]  }
0x2049   :  { %v7858_v35 = vrot.slane %v7855_v60, 7  ;;  %v7860_v20 = vrot.slane %v7856_v32, 6  ;;  %v7862_v29 = vrot.slane %v7857_v41, 5  ;;  %v12339_v38 = vld [vmem:[#allocation14 + $0xa8] sm:$0xff]   ;;  %v12341_v32 = vld [vmem:[#allocation14 + $0xe0] sm:$0xff]   ;;  %v12352_v26 = vld [vmem:[#allocation14 + $0x10] sm:$0xff]  }
0x204a   :  { %v12340_v60 = vld [vmem:[#allocation14 + $0x28] sm:$0xff]   ;;  %v12342_v41 = vld [vmem:[#allocation14 + $0x60] sm:$0xff]  }
0x204b   :  { %v7859_v28 = vsel %vm521_vm2, %v7858_v35, %v7854_v13  ;;  %v12343_v13 = vld [vmem:[#allocation14 + $0xa0] sm:$0xff]  }
0x204c   :  { %v7861_v27 = vsel %vm524_vm3, %v7860_v20, %v7859_v28  ;;  %v12344_v35 = vld [vmem:[#allocation14 + $0x20] sm:$0xff]   ;;  %v12345_v20 = vld [vmem:[#allocation14 + $0xd8] sm:$0xff]  }
0x204d   :  { %v7863_v18 = vsel %vm527_vm4, %v7862_v29, %v7861_v27  ;;  %v12346_v28 = vld [vmem:[#allocation14 + $0x58] sm:$0xff]  }
0x204e   :  { %v7864_v16 = vpack.c.b16 %v7863_v18, %v7863_v18  ;;  %v12347_v29 = vld [vmem:[#allocation14 + $0x98] sm:$0xff]   ;;  %v12349_v18 = vld [vmem:[#allocation14 + $0xd0] sm:$0xff]  }
0x204f   :  { %v12348_v27 = vld [vmem:[#allocation14 + $0x18] sm:$0xff]  }
0x2050   :  { %8059 = vmatmul.mubr.bf16.vlgmr.msra.gmra.mxu0 %v7864_v16  ;;  %8100 = vmatmul.mubr.bf16.vlgmr.msra.gmra.mxu1 %v7864_v16  ;;  %v12350_v16 = vld [vmem:[#allocation14 + $0x50] sm:$0xff]  }
0x2051   :  { %11397 = vmatpush3.bf16.msra.mxu1 %v12331_v23  ;;  %11375 = vmatpush3.bf16.msra.mxu0 %v12332_v24  ;;  %v12353_v23 = vld [vmem:[#allocation14 + $0xc8] sm:$0xff]  }
0x2052   :  { %11398 = vmatprep.subr.bf16.mxu1 %v12333_v1  ;;  %11376 = vmatprep.subr.bf16.mxu0 %v12334_v19  ;;  %v12354_v24 = vld [vmem:[#allocation14 + $0x48] sm:$0xff]  }
0x2053   :  { %v12355_v1 = vld [vmem:[#allocation14 + $0x88] sm:$0xff]  }
0x2054   :  { %v12356_v19 = vld [vmem:[#allocation14 + $0x8] sm:$0xff]  }
0x2055   :  { %11399 = vmatpush3.bf16.msra.mxu1 %v12335_v15  ;;  %11377 = vmatpush3.bf16.msra.mxu0 %v12336_v59  ;;  %v12357_v15 = vld [vmem:[#allocation14 + $0xc0] sm:$0xff]  }
0x2056   :  { %11400 = vmatprep.subr.bf16.mxu1 %v12337_v14  ;;  %11378 = vmatprep.subr.bf16.mxu0 %v12338_v57  ;;  %v12358_v59 = vld [vmem:[#allocation14 + $0x40] sm:$0xff]  }
0x2057   :  { %v12359_v14 = vld [vmem:[#allocation14 + $0x80] sm:$0xff]  }
0x2058   :  { %v12360_v57 = vld [vmem:[#allocation14] sm:$0xff]  }
0x2059   :  { %11401 = vmatpush3.bf16.msra.mxu1 %v12339_v38  ;;  %11379 = vmatpush3.bf16.msra.mxu0 %v12340_v60 }
0x205a   :  { %11402 = vmatprep.subr.bf16.mxu1 %v12341_v32  ;;  %11380 = vmatprep.subr.bf16.mxu0 %v12342_v41 }
0x205d   :  { %11403 = vmatpush3.bf16.msra.mxu1 %v12343_v13  ;;  %11381 = vmatpush3.bf16.msra.mxu0 %v12344_v35 }
0x205e   :  { %11404 = vmatprep.subr.bf16.mxu1 %v12345_v20  ;;  %11382 = vmatprep.subr.bf16.mxu0 %v12346_v28 }
0x2061   :  { %11405 = vmatpush3.bf16.msra.mxu1 %v12347_v29  ;;  %11383 = vmatpush3.bf16.msra.mxu0 %v12348_v27 }
0x2062   :  { %11406 = vmatprep.subr.bf16.mxu1 %v12349_v18  ;;  %11384 = vmatprep.subr.bf16.mxu0 %v12350_v16 }
0x2065   :  { %11407 = vmatpush3.bf16.msra.mxu1 %v12351_v21  ;;  %11385 = vmatpush3.bf16.msra.mxu0 %v12352_v26 }
0x2066   :  { %11408 = vmatprep.subr.bf16.mxu1 %v12353_v23  ;;  %11386 = vmatprep.subr.bf16.mxu0 %v12354_v24 }
0x2069   :  { %11409 = vmatpush3.bf16.msra.mxu1 %v12355_v1  ;;  %11387 = vmatpush3.bf16.msra.mxu0 %v12356_v19 }
0x206a   :  { %11410 = vmatprep.subr.bf16.mxu1 %v12357_v15  ;;  %11388 = vmatprep.subr.bf16.mxu0 %v12358_v59 }
0x206d   :  { %11411 = vmatpush3.bf16.msra.mxu1 %v12359_v14  ;;  %11389 = vmatpush3.bf16.msra.mxu0 %v12360_v57 }
0x206e   :  { %11816 = vmatprep.subr.mxu1 %v14172_v37  ;;  %11796 = vmatprep.subr.bf16.mxu0 %v14172_v37 }
0x2110   :  { %v8060_v38 = vpop.f32.mrf.mxu0  ;;  %v8101_v60 = vpop.f32.mrf.mxu1 }
0x2111   :  { %v8061_v32 = vadd.f32 %v8060_v38, %v13216_v30  ;;  %v8102_v41 = vadd.f32 %v8101_v60, %v13219_v33 }
0x2112   :  { %v8062_v13 = vpop.f32.mrf.mxu0  ;;  %v8103_v35 = vpop.f32.mrf.mxu1 }
0x2113   :  { %v8112_v20 = vmul.f32 0.044715, %v8061_v32  ;;  %v8114_v28 = vmul.f32 0.044715, %v8102_v41  ;;  %v8063_v29 = vadd.f32 %v8062_v13, %v13222_v34  ;;  %v8104_v27 = vadd.f32 %v8103_v35, %v13225_v10 }
0x2114   :  { %v8064_v18 = vpop.f32.mrf.mxu0  ;;  %v8105_v16 = vpop.f32.mrf.mxu1 }
0x2115   :  { %v8116_v21 = vmul.f32 %v8112_v20, %v8061_v32  ;;  %v8118_v26 = vmul.f32 %v8114_v28, %v8102_v41  ;;  %v8113_v23 = vmul.f32 0.044715, %v8063_v29  ;;  %v8115_v24 = vmul.f32 0.044715, %v8104_v27 }
0x2116   :  { %v8065_v1 = vpop.f32.mrf.mxu0  ;;  %v8106_v19 = vpop.f32.mrf.mxu1 }
0x2117   :  { %v8120_v15 = vmul.f32 %v8116_v21, %v8061_v32  ;;  %v8122_v59 = vmul.f32 %v8118_v26, %v8102_v41  ;;  %v8117_v14 = vmul.f32 %v8113_v23, %v8063_v29  ;;  %v8119_v57 = vmul.f32 %v8115_v24, %v8104_v27 }
0x2118   :  { %v8108_v23 = vmul.f32 0.5, %v8061_v32  ;;  %v8109_v19 = vmul.f32 0.5, %v8063_v29 }
0x2119   :  { %v8124_v38 = vadd.f32 %v8120_v15, %v8061_v32  ;;  %v8126_v60 = vadd.f32 %v8122_v59, %v8102_v41  ;;  %v8121_v31 = vmul.f32 %v8117_v14, %v8063_v29  ;;  %v8123_v39 = vmul.f32 %v8119_v57, %v8104_v27 }
0x211a   :  { %v8110_v59 = vmul.f32 0.5, %v8102_v41  ;;  %v8111_v14 = vmul.f32 0.5, %v8104_v27 }
0x211b   :  { %v8128_v61 = vmul.f32 0.7978846, %v8124_v38  ;;  %v8130_v13 = vmul.f32 0.7978846, %v8126_v60  ;;  %v8125_v62 = vadd.f32 %v8121_v31, %v8063_v29  ;;  %v8127_v35 = vadd.f32 %v8123_v39, %v8104_v27 }
0x211d   :  { %v8129_v18 = vmul.f32 0.7978846, %v8125_v62  ;;  %v8131_v16 = vmul.f32 0.7978846, %v8127_v35  ;;  %12589 = vtanh.f32 %v8128_v61 }
0x211e   :  { %12591 = vtanh.f32 %v8130_v13 }
0x211f   :  { %12593 = vtanh.f32 %v8129_v18 }
0x2120   :  { %12595 = vtanh.f32 %v8131_v16 }
0x212a   :  { %v12590_v20 = vpop.eup %12589 }
0x212b   :  { %v12592_v28 = vpop.eup %12591  ;;  %v8136_v21 = vadd.f32 1.0, %v12590_v20  ;;  %v13844_v20 = vld [vmem:[%s14141_s13] ss:$0 sm:$0xff] }
0x212c   :  { %v12594_v26 = vpop.eup %12593  ;;  %v8138_v24 = vadd.f32 1.0, %v12592_v28 }
0x212d   :  { %v12596_v1 = vpop.eup %12595  ;;  %v8137_v15 = vadd.f32 1.0, %v12594_v26  ;;  %v8140_v31 = vmul.f32 %v8136_v21, %v8108_v23 }
0x212e   :  { %v8139_v57 = vadd.f32 1.0, %v12596_v1  ;;  %v8142_v62 = vmul.f32 %v8138_v24, %v8110_v59 }
0x212f   :  { %v8141_v39 = vmul.f32 %v8137_v15, %v8109_v19  ;;  %v8144_v13 = vpack.c.bf16 %v8140_v31, %v8140_v31 }
0x2130   :  { %v8143_v38 = vmul.f32 %v8139_v57, %v8111_v14  ;;  %v8146_v35 = vpack.c.bf16 %v8142_v62, %v8142_v62 }
0x2131   :  { %v8145_v61 = vpack.c.bf16 %v8141_v39, %v8141_v39 }
0x2132   :  { %v8147_v60 = vpack.c.bf16 %v8143_v38, %v8143_v38 }
0x2133   :  { %8436 = vmatprep.mubr.bf16.mxu0 %v8145_v61 }
0x2134   :  { %8476 = vmatprep.mubr.bf16.mxu1 %v8147_v60  ;;  %8437 = vmatmul.mubr.bf16.vlgmr.msra.gmra.mxu0 %v8144_v13 }
0x2135   :  { %8477 = vmatmul.mubr.bf16.vlgmr.msra.gmra.mxu1 %v8146_v35  ;;  %11812 = vmatprep.mubr.msk.bf16.mxu0 %vm12868_vm1, %v14172_v37 }
0x2136   :  { %11817 = vmatpush3.xpose.msra.mxu1 %v13087_v42  ;;  %11818 = vmatprep.mubr.msk.f32.mxu1 %vm12868_vm1, %v14172_v37 }
0x2137   :  { %11821 = vmatprep.subr.mxu1 %v14172_v37 }
0x21f4   :  { %v11390_v32 = vpop.f32.mrf.mxu0 }
0x21f5   :  { %v11412_v41 = vpop.f32.mrf.mxu1 }
0x21f6   :  { %v11391_v29 = vpop.f32.mrf.mxu0 }
0x21f7   :  { %v11392_v27 = vadd.f32 %v11391_v29, %v11390_v32  ;;  %v11413_v18 = vpop.f32.mrf.mxu1 }
0x21f8   :  { %v11393_v16 = vpop.f32.mrf.mxu0  ;;  %v11414_v21 = vadd.f32 %v11413_v18, %v11412_v41  ;;  %v12362_v18 = vld [vmem:[#allocation10 + $0x30] sm:$0xff]  }
0x21f9   :  { %v8439_v28 = vadd.f32 %v13844_v20, %v11392_v27  ;;  %v11415_v42 = vpop.f32.mrf.mxu1  ;;  %v12361_v27 = vld [vmem:[#allocation10 + $0x38] sm:$0xff]   ;;  %v12363_v16 = vld [vmem:[#allocation10 + $0x28] sm:$0xff]  }
0x21fa   :  { %v11394_v26 = vpop.f32.mrf.mxu0  ;;  %11797 = vmatpush3.bf16.msra.mxu0 %v12361_v27  ;;  %v12366_v42 = vld [vmem:[#allocation10 + $0x10] sm:$0xff]  }
0x21fb   :  { %v8479_v23 = vadd.f32 %v11414_v21, %v8439_v28  ;;  %v11416_v24 = vpop.f32.mrf.mxu1  ;;  %11798 = vmatprep.subr.bf16.mxu0 %v14172_v37  ;;  %v12364_v28 = vld [vmem:[#allocation10 + $0x20] sm:$0xff]   ;;  %v12365_v21 = vld [vmem:[#allocation10 + $0x18] sm:$0xff]   ;;  %v12367_v26 = vld [vmem:[#allocation10 + $0x8] sm:$0xff]  }
0x21fd   :  { %v8491_v1 = vrot.slane %v8479_v23, %v13003_v12  ;;  %v12368_v23 = vld [vmem:[#allocation10] sm:$0xff]  }
0x21fe   :  { %11799 = vmatpush3.bf16.msra.mxu0 %v12362_v18 }
0x21ff   :  { %v8492_v19 = vcombine.high %v8491_v1, %v8491_v1  ;;  %v8499_v15 = vrot.slane %v8491_v1, %v13003_v12  ;;  %11800 = vmatprep.subr.bf16.mxu0 %v14172_v37 }
0x2201   :  { %v8506_v59 = vrot.slane %v8492_v19, %v13003_v12  ;;  %v8507_v14 = vcombine.high %v8499_v15, %v8499_v15  ;;  %v13851_v57 = vadd.f32 %v8499_v15, %v13794_v22 }
0x2202   :  { %11801 = vmatpush3.bf16.msra.mxu0 %v12363_v16 }
0x2203   :  { %v8508_v31 = vcombine.high %v8506_v59, %v8506_v59  ;;  %v13854_v39 = vadd.f32 %v8506_v59, %v13791_v9  ;;  %v13857_v62 = vadd.f32 %v8507_v14, %v13799_v58  ;;  %v8517_v61 = vmul.f32 %v13851_v57, %v13851_v57  ;;  %11802 = vmatprep.subr.bf16.mxu0 %v14172_v37 }
0x2205   :  { %v13860_v38 = vadd.f32 %v8508_v31, %v13804_v7  ;;  %v8518_v60 = vmul.f32 %v13854_v39, %v13854_v39  ;;  %v8519_v22 = vmul.f32 %v13857_v62, %v13857_v62 }
0x2206   :  { %11803 = vmatpush3.bf16.msra.mxu0 %v12364_v28 }
0x2207   :  { %v8520_v13 = vmul.f32 %v13860_v38, %v13860_v38  ;;  %v8525_v9 = vcombine.low %v8517_v61, %v8518_v60  ;;  %11804 = vmatprep.subr.bf16.mxu0 %v14172_v37 }
0x2209   :  { %v8526_v35 = vcombine.low %v8519_v22, %v8520_v13  ;;  %v8533_v58 = vrot.slane %v8525_v9, %v13003_v12 }
0x220a   :  { %11805 = vmatpush3.bf16.msra.mxu0 %v12365_v21 }
0x220b   :  { %v8540_v32 = vrot.slane %v8526_v35, %v13003_v12  ;;  %11806 = vmatprep.subr.bf16.mxu0 %v14172_v37 }
0x220d   :  { %v8541_v7 = vcombine.low %v8533_v58, %v8540_v32 }
0x220e   :  { %11807 = vmatpush3.bf16.msra.mxu0 %v12366_v42 }
0x220f   :  { %v8548_v41 = vrot.slane %v8541_v7, %v13003_v12  ;;  %11808 = vmatprep.subr.bf16.mxu0 %v14172_v37 }
0x2211   :  { %v8550_v29 = vsel %vm427_vm0, %v8548_v41, 0.0 }
0x2212   :  { %8551 = vadd.xlane.f32.xlu0 %v8550_v29  ;;  %11809 = vmatpush3.bf16.msra.mxu0 %v12367_v26 }
0x2213   :  { %11810 = vmatprep.subr.bf16.mxu0 %v14172_v37 }
0x2216   :  { %11811 = vmatpush3.bf16.msra.mxu0 %v12368_v23 }
0x229b   :  { %v8552_v24 = vpop.xlane.xlu0 %8551 }
0x229c   :  { %v8553_v1 = vmul.f32 0.0078125, %v8552_v24 }
0x229e   :  { %v8554_v19 = vadd.f32 1e-06, %v8553_v1 }
0x22a0   :  { %12597 = vrsqrt.f32 %v8554_v19 }
0x22ad   :  { %v12598_v15 = vpop.eup %12597 }
0x22ae   :  { %v8560_v59 = vrot.slane %v12598_v15, %v13026_v53  ;;  %v8564_v14 = vrot.slane %v12598_v15, %v13029_v54  ;;  %v8568_v31 = vrot.slane %v12598_v15, %v13032_v55  ;;  %v8572_v61 = vrot.slane %v12598_v15, %v13035_v56 }
0x22b0   :  { %v8577_v60 = vmul.f32 %v8560_v59, %v13851_v57  ;;  %v8578_v22 = vmul.f32 %v8564_v14, %v13854_v39  ;;  %v8579_v13 = vmul.f32 %v8568_v31, %v13857_v62  ;;  %v8580_v9 = vmul.f32 %v8572_v61, %v13860_v38 }
0x22b2   :  { %v8581_v35 = vmul.f32 %v8577_v60, %v13042_v63  ;;  %v8582_v58 = vmul.f32 %v8578_v22, %v13045_v0  ;;  %v8583_v32 = vmul.f32 %v8579_v13, %v13049_v2  ;;  %v8584_v7 = vmul.f32 %v8580_v9, %v13053_v3 }
0x22b4   :  { %v8585_v41 = vpack.c.bf16 %v8581_v35, %v8581_v35  ;;  %v8586_v29 = vpack.c.bf16 %v8582_v58, %v8582_v58  ;;  %v8587_v27 = vpack.c.bf16 %v8583_v32, %v8583_v32  ;;  %v8588_v18 = vpack.c.bf16 %v8584_v7, %v8584_v7 }
0x22b6   :  { %v8610_v16 = vunpack.c.l.b16 %v8586_v29  ;;  %v8611_v28 = vunpack.c.l.b16 %v8587_v27  ;;  %v8612_v21 = vunpack.c.l.b16 %v8588_v18  ;;  %v8609_v42 = vunpack.c.l.b16 %v8585_v41 }
0x22b8   :  { %v8613_v26 = vrot.slane %v8610_v16, 7  ;;  %v8615_v23 = vrot.slane %v8611_v28, 6  ;;  %v8617_v1 = vrot.slane %v8612_v21, 5 }
0x22ba   :  { %v8614_v24 = vsel %vm521_vm2, %v8613_v26, %v8609_v42 }
0x22bb   :  { %v8616_v63 = vsel %vm524_vm3, %v8615_v23, %v8614_v24 }
0x22bc   :  { %v8618_v0 = vsel %vm527_vm4, %v8617_v1, %v8616_v63 }
0x22bd   :  { %v8619_v2 = vpack.c.b16 %v8618_v0, %v8618_v0 }
0x22bf   :  { %11813 = vmatmul.mubr.bf16.vlgmr.msra.gmra.mxu0 %v8619_v2 }
0x22c0   :  { %9670 = vmatprep.mubr.bf16.mxu0 %v14175_v4 }
0x237f   :  { %v8703_v3 = vpop.f32.mrf.mxu0 }
0x2380   :  { %v8704_v19 = vadd.f32 %v13747_v40, %v8703_v3 }
0x2381   :  { %v11814_v15 = vpop.f32.mrf.mxu0 }
0x2382   :  { %v8716_v59 = vrot.slane %v8704_v19, %v13003_v12 }
0x2383   :  { %v8706_v14 = vpop.f32.mrf.mxu0 }
0x2384   :  { %v8717_v31 = vcombine.high %v8716_v59, %v8716_v59  ;;  %v8724_v61 = vrot.slane %v8716_v59, %v13003_v12 }
0x2385   :  { %v11815_v60 = vpop.f32.mrf.mxu0 }
0x2386   :  { %11819 = vmatmul.mubr.f32.vlgmr.msra.gmra.mxu1 %v8724_v61  ;;  %v8731_v22 = vrot.slane %v8717_v31, %v13003_v12  ;;  %v8732_v40 = vcombine.high %v8724_v61, %v8724_v61 }
0x2387   :  { %11822 = vmatpush3.xpose.msra.mxu1 %v13094_v46  ;;  %11823 = vmatprep.mubr.msk.f32.mxu1 %vm12868_vm1, %v14172_v37 }
0x2388   :  { %11826 = vmatprep.subr.mxu1 %v14172_v37  ;;  %v8733_v46 = vcombine.high %v8731_v22, %v8731_v22 }
0x238a   :  { %11824 = vmatmul.mubr.f32.vlgmr.msra.gmra.mxu1 %v8731_v22 }
0x238b   :  { %11827 = vmatpush3.xpose.msra.mxu1 %v13099_v51  ;;  %11828 = vmatprep.mubr.msk.f32.mxu1 %vm12868_vm1, %v14172_v37 }
0x238c   :  { %11831 = vmatprep.subr.mxu1 %v14172_v37 }
0x238e   :  { %11829 = vmatmul.mubr.f32.vlgmr.msra.gmra.mxu1 %v8732_v40 }
0x238f   :  { %11832 = vmatpush3.xpose.msra.mxu1 %v13122_v11  ;;  %11833 = vmatprep.mubr.msk.f32.mxu1 %vm12868_vm1, %v14172_v37 }
0x2390   :  { %11836 = vmatprep.subr.mxu1 %v14172_v37 }
0x2392   :  { %11834 = vmatmul.mubr.f32.vlgmr.msra.gmra.mxu1 %v8733_v46 }
0x2393   :  { %11837 = vmatpush3.msra.mxu1 %v13090_v44  ;;  %11838 = vmatprep.mubr.msk.f32.mxu1 %vm12868_vm1, %v14172_v37 }
0x2394   :  { %11841 = vmatprep.subr.mxu1 %v14172_v37 }
0x2446   :  { %v8804_v51 = vpop.f32.mrf.mxu1 }
0x2447   :  { %v9018_v13 = vsel %vm928_vm5, %v8804_v51, -inf }
0x2448   :  { %9019 = vmax.xlane.f32.xlu1 %v9018_v13  ;;  %v11820_v9 = vpop.f32.mrf.mxu1 }
0x244a   :  { %v8874_v11 = vpop.f32.mrf.mxu1 }
0x244b   :  { %v9021_v35 = vsel %vm928_vm5, %v8874_v11, -inf }
0x244c   :  { %9022 = vmax.xlane.f32.xlu0 %v9021_v35  ;;  %v11825_v58 = vpop.f32.mrf.mxu1 }
0x244e   :  { %v8944_v32 = vpop.f32.mrf.mxu1 }
0x244f   :  { %v9024_v7 = vsel %vm928_vm5, %v8944_v32, -inf }
0x2450   :  { %9025 = vmax.xlane.f32.xlu1 %v9024_v7  ;;  %v11830_v44 = vpop.f32.mrf.mxu1 }
0x2452   :  { %v9014_v41 = vpop.f32.mrf.mxu1 }
0x2453   :  { %v9027_v29 = vsel %vm928_vm5, %v9014_v41, -inf }
0x2454   :  { %9028 = vmax.xlane.f32.xlu0 %v9027_v29  ;;  %v11835_v27 = vpop.f32.mrf.mxu1 }
0x24d1   :  { %v9020_v18 = vpop.xlane.xlu1 %9019 }
0x24d2   :  { %v9030_v16 = vsub.f32 %v8804_v51, %v9020_v18 }
0x24d4   :  { %v9034_v28 = vmul.f32 1.442695, %v9030_v16 }
0x24d5   :  { %v9023_v21 = vpop.xlane.xlu0 %9022 }
0x24d6   :  { %12599 = vpow2.f32 %v9034_v28  ;;  %v9031_v42 = vsub.f32 %v8874_v11, %v9023_v21 }
0x24d8   :  { %v9036_v26 = vmul.f32 1.442695, %v9031_v42 }
0x24d9   :  { %v9026_v23 = vpop.xlane.xlu1 %9025 }
0x24da   :  { %12601 = vpow2.f32 %v9036_v26  ;;  %v9032_v24 = vsub.f32 %v8944_v32, %v9026_v23 }
0x24dc   :  { %v9038_v1 = vmul.f32 1.442695, %v9032_v24 }
0x24dd   :  { %v9029_v63 = vpop.xlane.xlu0 %9028 }
0x24de   :  { %12603 = vpow2.f32 %v9038_v1  ;;  %v9033_v0 = vsub.f32 %v9014_v41, %v9029_v63 }
0x24e0   :  { %v9040_v2 = vmul.f32 1.442695, %v9033_v0 }
0x24e2   :  { %12605 = vpow2.f32 %v9040_v2 }
0x24e3   :  { %v12600_v3 = vpop.eup %12599 }
0x24e4   :  { %v9042_v19 = vsel %vm928_vm5, %v12600_v3, 0.0 }
0x24e5   :  { %9043 = vadd.xlane.f32.xlu1 %v9042_v19 }
0x24e7   :  { %v12602_v15 = vpop.eup %12601 }
0x24e8   :  { %v9045_v59 = vsel %vm928_vm5, %v12602_v15, 0.0 }
0x24e9   :  { %9046 = vadd.xlane.f32.xlu0 %v9045_v59 }
0x24eb   :  { %v12604_v14 = vpop.eup %12603 }
0x24ec   :  { %v9048_v31 = vsel %vm928_vm5, %v12604_v14, 0.0 }
0x24ed   :  { %9049 = vadd.xlane.f32.xlu1 %v9048_v31  ;;  %v12374_v31 = vld [vmem:[#allocation13 + $0xec] ss:$16 sps:$4 sm:$0xff]  }
0x24ef   :  { %v12606_v61 = vpop.eup %12605 }
0x24f0   :  { %v9051_v60 = vsel %vm928_vm5, %v12606_v61, 0.0 }
0x24f1   :  { %9052 = vadd.xlane.f32.xlu0 %v9051_v60  ;;  %v12372_v60 = vld [vmem:[#allocation13 + $0xe8] ss:$16 sps:$4 sm:$0xff]  }
0x256e   :  { %v9044_v22 = vpop.xlane.xlu1 %9043 }
0x256f   :  { %12607 = vrcp.f32 %v9044_v22  ;;  %v12377_v22 = vld [vmem:[#allocation13 + $0xc4] ss:$16 sps:$4 sm:$0xff]  }
0x2572   :  { %v9047_v40 = vpop.xlane.xlu0 %9046 }
0x2573   :  { %12609 = vrcp.f32 %v9047_v40  ;;  %v12380_v40 = vld [vmem:[#allocation13 + $0xcc] ss:$16 sps:$4 sm:$0xff]  }
0x2576   :  { %v9050_v46 = vpop.xlane.xlu1 %9049 }
0x2577   :  { %12611 = vrcp.f32 %v9050_v46  ;;  %v12375_v46 = vld [vmem:[#allocation13 + $0xc0] ss:$16 sps:$4 sm:$0xff]  }
0x257a   :  { %v9053_v51 = vpop.xlane.xlu0 %9052 }
0x257b   :  { %12613 = vrcp.f32 %v9053_v51  ;;  %v12378_v51 = vld [vmem:[#allocation13 + $0xc8] ss:$16 sps:$4 sm:$0xff]  }
0x257c   :  { %v12608_v13 = vpop.eup %12607 }
0x257d   :  { %v9058_v9 = vmul.f32 %v12608_v13, %v12600_v3  ;;  %v12383_v13 = vld [vmem:[#allocation13 + $0xa4] ss:$16 sps:$4 sm:$0xff]  }
0x257f   :  { %11839 = vmatmul.mubr.msk.f32.vlgmr.msra.gmra.mxu1 %vm973_vm6, %v9058_v9  ;;  %v12386_v9 = vld [vmem:[#allocation13 + $0xac] ss:$16 sps:$4 sm:$0xff]  }
0x2580   :  { %v12610_v11 = vpop.eup %12609  ;;  %11842 = vmatpush3.msra.mxu1 %v13097_v48  ;;  %11843 = vmatprep.mubr.msk.f32.mxu1 %vm12868_vm1, %v14172_v37 }
0x2581   :  { %11846 = vmatprep.subr.mxu1 %v14172_v37  ;;  %v9059_v35 = vmul.f32 %v12610_v11, %v12602_v15  ;;  %v12381_v11 = vld [vmem:[#allocation13 + $0xa0] ss:$16 sps:$4 sm:$0xff]  }
0x2583   :  { %11844 = vmatmul.mubr.msk.f32.vlgmr.msra.gmra.mxu1 %vm973_vm6, %v9059_v35  ;;  %v12384_v35 = vld [vmem:[#allocation13 + $0xa8] ss:$16 sps:$4 sm:$0xff]  }
0x2584   :  { %v12612_v58 = vpop.eup %12611  ;;  %11847 = vmatpush3.msra.mxu1 %v13102_v52  ;;  %11848 = vmatprep.mubr.msk.f32.mxu1 %vm12868_vm1, %v14172_v37 }
0x2585   :  { %v9060_v32 = vmul.f32 %v12612_v58, %v12604_v14  ;;  %11851 = vmatprep.subr.mxu1 %v14172_v37  ;;  %v12371_v14 = vld [vmem:[#allocation13 + $0xe4] ss:$16 sps:$4 sm:$0xff]  }
0x2586   :  { %9638 = vmatprep.subr.bf16.mxu0 %v12371_v14  ;;  %v12389_v58 = vld [vmem:[#allocation13 + $0x84] ss:$16 sps:$4 sm:$0xff]  }
0x2587   :  { %11849 = vmatmul.mubr.msk.f32.vlgmr.msra.gmra.mxu1 %vm973_vm6, %v9060_v32  ;;  %v12392_v32 = vld [vmem:[#allocation13 + $0x8c] ss:$16 sps:$4 sm:$0xff]  }
0x2588   :  { %v12614_v48 = vpop.eup %12613  ;;  %11852 = vmatpush3.msra.mxu1 %v13146_v17  ;;  %11853 = vmatprep.mubr.msk.f32.mxu1 %vm12868_vm1, %v14172_v37 }
0x2589   :  { %v9061_v7 = vmul.f32 %v12614_v48, %v12606_v61  ;;  %v12369_v61 = vld [vmem:[#allocation13 + $0xe0] ss:$16 sps:$4 sm:$0xff]   ;;  %9679 = vmatprep.subr.bf16.mxu1 %v12374_v31 }
0x258a   :  { %9639 = vmatpush1.bf16.msra.mxu0 %v12369_v61  ;;  %v12387_v48 = vld [vmem:[#allocation13 + $0x80] ss:$16 sps:$4 sm:$0xff]  }
0x258b   :  { %11854 = vmatmul.mubr.msk.f32.vlgmr.msra.gmra.mxu1 %vm973_vm6, %v9061_v7  ;;  %9640 = vmatprep.subr.bf16.mxu0 %v12377_v22  ;;  %v12390_v7 = vld [vmem:[#allocation13 + $0x88] ss:$16 sps:$4 sm:$0xff]  }
0x258c   :  { %9711 = vmatprep.mubr.bf16.mxu1 %v14175_v4  ;;  %9680 = vmatpush1.bf16.msra.mxu1 %v12372_v60 }
0x258d   :  { %9681 = vmatprep.subr.bf16.mxu1 %v12380_v40 }
0x258e   :  { %9641 = vmatpush1.bf16.msra.mxu0 %v12375_v46 }
0x258f   :  { %9642 = vmatprep.subr.bf16.mxu0 %v12383_v13 }
0x2590   :  { %9682 = vmatpush1.bf16.msra.mxu1 %v12378_v51 }
0x2591   :  { %9683 = vmatprep.subr.bf16.mxu1 %v12386_v9 }
0x2592   :  { %9643 = vmatpush1.bf16.msra.mxu0 %v12381_v11 }
0x2593   :  { %9644 = vmatprep.subr.bf16.mxu0 %v12389_v58 }
0x2594   :  { %9684 = vmatpush1.bf16.msra.mxu1 %v12384_v35 }
0x2595   :  { %9685 = vmatprep.subr.bf16.mxu1 %v12392_v32 }
0x2596   :  { %9645 = vmatpush1.bf16.msra.mxu0 %v12387_v48 }
0x2598   :  { %9686 = vmatpush1.bf16.msra.mxu1 %v12390_v7 }
0x263f   :  { %v9131_v52 = vpop.f32.mrf.mxu1 }
0x2640   :  { %v13945_v16 = vadd.f32 %v9131_v52, %v13851_v57  ;;  %v12395_v52 = vld [vmem:[#allocation13 + $0x64] ss:$16 sps:$4 sm:$0xff]  }
0x2641   :  { %v11840_v44 = vpop.f32.mrf.mxu1  ;;  %9646 = vmatprep.subr.bf16.mxu0 %v12395_v52 }
0x2642   :  { %v9358_v4 = vmul.f32 %v13945_v16, %v13945_v16  ;;  %v12398_v44 = vld [vmem:[#allocation13 + $0x6c] ss:$16 sps:$4 sm:$0xff]  }
0x2643   :  { %v9204_v41 = vpop.f32.mrf.mxu1  ;;  %9687 = vmatprep.subr.bf16.mxu1 %v12398_v44 }
0x2644   :  { %v13942_v27 = vadd.f32 %v9204_v41, %v13854_v39  ;;  %v12393_v41 = vld [vmem:[#allocation13 + $0x60] ss:$16 sps:$4 sm:$0xff]  }
0x2645   :  { %v11845_v29 = vpop.f32.mrf.mxu1  ;;  %9647 = vmatpush1.bf16.msra.mxu0 %v12393_v41 }
0x2646   :  { %v9359_v28 = vmul.f32 %v13942_v27, %v13942_v27  ;;  %v12396_v29 = vld [vmem:[#allocation13 + $0x68] ss:$16 sps:$4 sm:$0xff]  }
0x2647   :  { %v9277_v18 = vpop.f32.mrf.mxu1  ;;  %9688 = vmatpush1.bf16.msra.mxu1 %v12396_v29 }
0x2648   :  { %v13950_v21 = vadd.f32 %v9277_v18, %v13857_v62  ;;  %v9366_v24 = vcombine.low %v9358_v4, %v9359_v28  ;;  %v12401_v18 = vld [vmem:[#allocation13 + $0x44] ss:$16 sps:$4 sm:$0xff]   ;;  %v12399_v28 = vld [vmem:[#allocation13 + $0x40] ss:$16 sps:$4 sm:$0xff]  }
0x2649   :  { %v11850_v17 = vpop.f32.mrf.mxu1  ;;  %9648 = vmatprep.subr.bf16.mxu0 %v12401_v18  ;;  %v12407_v4 = vld [vmem:[#allocation13 + $0x24] ss:$16 sps:$4 sm:$0xff]  }
0x264a   :  { %v9360_v1 = vmul.f32 %v13950_v21, %v13950_v21  ;;  %v9374_v2 = vrot.slane %v9366_v24, %v13003_v12  ;;  %v12404_v17 = vld [vmem:[#allocation13 + $0x4c] ss:$16 sps:$4 sm:$0xff]   ;;  %9649 = vmatpush1.bf16.msra.mxu0 %v12399_v28  ;;  %v12405_v24 = vld [vmem:[#allocation13 + $0x20] ss:$16 sps:$4 sm:$0xff]  }
0x264b   :  { %v9350_v42 = vpop.f32.mrf.mxu1  ;;  %9689 = vmatprep.subr.bf16.mxu1 %v12404_v17  ;;  %9650 = vmatprep.subr.bf16.mxu0 %v12407_v4 }
0x264c   :  { %v13955_v26 = vadd.f32 %v9350_v42, %v13860_v38  ;;  %v12402_v42 = vld [vmem:[#allocation13 + $0x48] ss:$16 sps:$4 sm:$0xff]  }
0x264d   :  { %v11855_v23 = vpop.f32.mrf.mxu1  ;;  %9690 = vmatpush1.bf16.msra.mxu1 %v12402_v42 }
0x264e   :  { %v9361_v63 = vmul.f32 %v13955_v26, %v13955_v26  ;;  %v12410_v23 = vld [vmem:[#allocation13 + $0x2c] ss:$16 sps:$4 sm:$0xff]   ;;  %9651 = vmatpush1.bf16.msra.mxu0 %v12405_v24 }
0x264f   :  { %9691 = vmatprep.subr.bf16.mxu1 %v12410_v23  ;;  %v12418_v23 = vld [vmem:[#allocation14 + $0xf8] sm:$0xff]  }
0x2650   :  { %v9367_v0 = vcombine.low %v9360_v1, %v9361_v63  ;;  %v12408_v1 = vld [vmem:[#allocation13 + $0x28] ss:$16 sps:$4 sm:$0xff]   ;;  %v12413_v63 = vld [vmem:[#allocation13 + $0x4] ss:$16 sps:$4 sm:$0xff]  }
0x2651   :  { %9692 = vmatpush1.bf16.msra.mxu1 %v12408_v1  ;;  %9652 = vmatprep.subr.bf16.mxu0 %v12413_v63  ;;  %v12419_v24 = vld [vmem:[#allocation14 + $0x38] sm:$0xff]   ;;  %v12421_v63 = vld [vmem:[#allocation14 + $0x70] sm:$0xff]  }
0x2652   :  { %v9381_v3 = vrot.slane %v9367_v0, %v13003_v12  ;;  %v12416_v0 = vld [vmem:[#allocation13 + $0xc] ss:$16 sps:$4 sm:$0xff]  }
0x2653   :  { %9693 = vmatprep.subr.bf16.mxu1 %v12416_v0  ;;  %v12420_v1 = vld [vmem:[#allocation14 + $0xb8] sm:$0xff]   ;;  %v12422_v0 = vld [vmem:[#allocation14 + $0xf0] sm:$0xff]  }
0x2654   :  { %v9382_v19 = vcombine.low %v9374_v2, %v9381_v3  ;;  %v12411_v2 = vld [vmem:[#allocation13] ss:$16 sps:$4 sm:$0xff]   ;;  %v12414_v3 = vld [vmem:[#allocation13 + $0x8] ss:$16 sps:$4 sm:$0xff]  }
0x2655   :  { %9653 = vmatpush1.bf16.msra.mxu0 %v12411_v2  ;;  %9694 = vmatpush1.bf16.msra.mxu1 %v12414_v3  ;;  %v12423_v2 = vld [vmem:[#allocation14 + $0x30] sm:$0xff]  }
0x2656   :  { %v9389_v15 = vrot.slane %v9382_v19, %v13003_v12  ;;  %11465 = vmatprep.subr.bf16.mxu1 %v12418_v23  ;;  %v12424_v3 = vld [vmem:[#allocation14 + $0xb0] sm:$0xff]  }
0x2658   :  { %v9391_v59 = vsel %vm427_vm0, %v9389_v15, 0.0 }
0x2659   :  { %9392 = vadd.xlane.f32.xlu1 %v9391_v59 }
0x26e2   :  { %v9393_v19 = vpop.xlane.xlu1 %9392 }
0x26e3   :  { %v9394_v15 = vmul.f32 0.0078125, %v9393_v19  ;;  %v12425_v19 = vld [vmem:[#allocation14 + $0x68] sm:$0xff]  }
0x26e5   :  { %v9395_v59 = vadd.f32 1e-06, %v9394_v15  ;;  %v12426_v15 = vld [vmem:[#allocation14 + $0xe8] sm:$0xff]  }
0x26e7   :  { %12615 = vrsqrt.f32 %v9395_v59  ;;  %v12427_v59 = vld [vmem:[#allocation14 + $0x28] sm:$0xff]  }
0x26f4   :  { %v12616_v14 = vpop.eup %12615 }
0x26f5   :  { %v9401_v31 = vrot.slane %v12616_v14, %v13026_v53  ;;  %v9405_v61 = vrot.slane %v12616_v14, %v13029_v54  ;;  %v9409_v60 = vrot.slane %v12616_v14, %v13032_v55  ;;  %v9413_v22 = vrot.slane %v12616_v14, %v13035_v56  ;;  %v12428_v14 = vld [vmem:[#allocation14 + $0xa8] sm:$0xff]  }
0x26f7   :  { %v9418_v40 = vmul.f32 %v9401_v31, %v13945_v16  ;;  %v9419_v46 = vmul.f32 %v9405_v61, %v13942_v27  ;;  %v9420_v51 = vmul.f32 %v9409_v60, %v13950_v21  ;;  %v9421_v13 = vmul.f32 %v9413_v22, %v13955_v26  ;;  %v12429_v31 = vld [vmem:[#allocation14 + $0x60] sm:$0xff]  }
0x26f8   :  { %v12430_v61 = vld [vmem:[#allocation14 + $0xe0] sm:$0xff]  }
0x26f9   :  { %v9422_v9 = vmul.f32 %v9418_v40, %v13182_v43  ;;  %v9423_v11 = vmul.f32 %v9419_v46, %v13185_v45  ;;  %v9424_v35 = vmul.f32 %v9420_v51, %v13189_v47  ;;  %v9425_v58 = vmul.f32 %v9421_v13, %v13193_v49  ;;  %v12417_v49 = vld [vmem:[#allocation14 + $0x78] sm:$0xff]   ;;  %v12431_v60 = vld [vmem:[#allocation14 + $0x20] sm:$0xff]  }
0x26fa   :  { %11443 = vmatprep.subr.bf16.mxu0 %v12417_v49  ;;  %v12432_v22 = vld [vmem:[#allocation14 + $0xa0] sm:$0xff]   ;;  %v12433_v40 = vld [vmem:[#allocation14 + $0x58] sm:$0xff]  }
0x26fb   :  { %v9426_v32 = vpack.c.bf16 %v9422_v9, %v9422_v9  ;;  %v9427_v48 = vpack.c.bf16 %v9423_v11, %v9423_v11  ;;  %v9428_v7 = vpack.c.bf16 %v9424_v35, %v9424_v35  ;;  %v9429_v52 = vpack.c.bf16 %v9425_v58, %v9425_v58  ;;  %v12434_v46 = vld [vmem:[#allocation14 + $0xd8] sm:$0xff]   ;;  %v12437_v9 = vld [vmem:[#allocation14 + $0x50] sm:$0xff]  }
0x26fc   :  { %v12435_v51 = vld [vmem:[#allocation14 + $0x18] sm:$0xff]   ;;  %v12438_v11 = vld [vmem:[#allocation14 + $0xd0] sm:$0xff]  }
0x26fd   :  { %v9467_v44 = vunpack.c.l.b16 %v9427_v48  ;;  %v9468_v41 = vunpack.c.l.b16 %v9428_v7  ;;  %v9469_v29 = vunpack.c.l.b16 %v9429_v52  ;;  %v9466_v18 = vunpack.c.l.b16 %v9426_v32  ;;  %v12436_v13 = vld [vmem:[#allocation14 + $0x98] sm:$0xff]   ;;  %v12439_v35 = vld [vmem:[#allocation14 + $0x10] sm:$0xff]   ;;  %v12441_v32 = vld [vmem:[#allocation14 + $0x48] sm:$0xff]  }
0x26fe   :  { %v12440_v58 = vld [vmem:[#allocation14 + $0x90] sm:$0xff]   ;;  %v12442_v48 = vld [vmem:[#allocation14 + $0xc8] sm:$0xff]  }
0x26ff   :  { %v9470_v17 = vrot.slane %v9467_v44, 7  ;;  %v9472_v28 = vrot.slane %v9468_v41, 6  ;;  %v9474_v4 = vrot.slane %v9469_v29, 5  ;;  %v12443_v7 = vld [vmem:[#allocation14 + $0x8] sm:$0xff]   ;;  %v12445_v44 = vld [vmem:[#allocation14 + $0x40] sm:$0xff]  }
0x2700   :  { %v12444_v52 = vld [vmem:[#allocation14 + $0x88] sm:$0xff]   ;;  %v12446_v41 = vld [vmem:[#allocation14 + $0xc0] sm:$0xff]  }
0x2701   :  { %v9471_v42 = vsel %vm521_vm2, %v9470_v17, %v9466_v18  ;;  %v12447_v29 = vld [vmem:[#allocation14] sm:$0xff]  }
0x2702   :  { %v9473_v43 = vsel %vm524_vm3, %v9472_v28, %v9471_v42  ;;  %v12448_v18 = vld [vmem:[#allocation14 + $0x80] sm:$0xff]  }
0x2703   :  { %v9475_v45 = vsel %vm527_vm4, %v9474_v4, %v9473_v43 }
0x2704   :  { %v9476_v47 = vpack.c.b16 %v9475_v45, %v9475_v45 }
0x2706   :  { %9671 = vmatmul.mubr.bf16.vlgmr.msra.gmra.mxu0 %v9476_v47  ;;  %9712 = vmatmul.mubr.bf16.vlgmr.msra.gmra.mxu1 %v9476_v47 }
0x2707   :  { %11444 = vmatpush3.bf16.msra.mxu0 %v12419_v24  ;;  %11466 = vmatpush3.bf16.msra.mxu1 %v12420_v1 }
0x2708   :  { %11445 = vmatprep.subr.bf16.mxu0 %v12421_v63  ;;  %11467 = vmatprep.subr.bf16.mxu1 %v12422_v0 }
0x270b   :  { %11446 = vmatpush3.bf16.msra.mxu0 %v12423_v2  ;;  %11468 = vmatpush3.bf16.msra.mxu1 %v12424_v3 }
0x270c   :  { %11447 = vmatprep.subr.bf16.mxu0 %v12425_v19  ;;  %11469 = vmatprep.subr.bf16.mxu1 %v12426_v15 }
0x270f   :  { %11448 = vmatpush3.bf16.msra.mxu0 %v12427_v59  ;;  %11470 = vmatpush3.bf16.msra.mxu1 %v12428_v14 }
0x2710   :  { %11449 = vmatprep.subr.bf16.mxu0 %v12429_v31  ;;  %11471 = vmatprep.subr.bf16.mxu1 %v12430_v61 }
0x2713   :  { %11450 = vmatpush3.bf16.msra.mxu0 %v12431_v60  ;;  %11472 = vmatpush3.bf16.msra.mxu1 %v12432_v22 }
0x2714   :  { %11451 = vmatprep.subr.bf16.mxu0 %v12433_v40  ;;  %11473 = vmatprep.subr.bf16.mxu1 %v12434_v46 }
0x2717   :  { %11452 = vmatpush3.bf16.msra.mxu0 %v12435_v51  ;;  %11474 = vmatpush3.bf16.msra.mxu1 %v12436_v13 }
0x2718   :  { %11453 = vmatprep.subr.bf16.mxu0 %v12437_v9  ;;  %11475 = vmatprep.subr.bf16.mxu1 %v12438_v11 }
0x271b   :  { %11454 = vmatpush3.bf16.msra.mxu0 %v12439_v35  ;;  %11476 = vmatpush3.bf16.msra.mxu1 %v12440_v58 }
0x271c   :  { %11455 = vmatprep.subr.bf16.mxu0 %v12441_v32  ;;  %11477 = vmatprep.subr.bf16.mxu1 %v12442_v48 }
0x271f   :  { %11456 = vmatpush3.bf16.msra.mxu0 %v12443_v7  ;;  %11478 = vmatpush3.bf16.msra.mxu1 %v12444_v52 }
0x2720   :  { %11457 = vmatprep.subr.bf16.mxu0 %v12445_v44  ;;  %11479 = vmatprep.subr.bf16.mxu1 %v12446_v41 }
0x2723   :  { %11458 = vmatpush3.bf16.msra.mxu0 %v12447_v29  ;;  %11480 = vmatpush3.bf16.msra.mxu1 %v12448_v18 }
0x2724   :  { %11856 = vmatprep.subr.bf16.mxu0 %v14172_v37 }
0x27c6   :  { %v9672_v17 = vpop.f32.mrf.mxu0  ;;  %v9713_v28 = vpop.f32.mrf.mxu1 }
0x27c7   :  { %v9673_v42 = vadd.f32 %v9672_v17, %v13216_v30  ;;  %v9714_v4 = vadd.f32 %v9713_v28, %v13219_v33 }
0x27c8   :  { %v9674_v43 = vpop.f32.mrf.mxu0  ;;  %v9715_v45 = vpop.f32.mrf.mxu1 }
0x27c9   :  { %v9724_v47 = vmul.f32 0.044715, %v9673_v42  ;;  %v9726_v49 = vmul.f32 0.044715, %v9714_v4  ;;  %v9675_v23 = vadd.f32 %v9674_v43, %v13222_v34  ;;  %v9716_v24 = vadd.f32 %v9715_v45, %v13225_v10 }
0x27ca   :  { %v9676_v1 = vpop.f32.mrf.mxu0  ;;  %v9717_v63 = vpop.f32.mrf.mxu1  ;;  %v9720_v48 = vmul.f32 0.5, %v9673_v42  ;;  %v9722_v44 = vmul.f32 0.5, %v9714_v4 }
0x27cb   :  { %v9728_v0 = vmul.f32 %v9724_v47, %v9673_v42  ;;  %v9730_v2 = vmul.f32 %v9726_v49, %v9714_v4  ;;  %v9725_v3 = vmul.f32 0.044715, %v9675_v23  ;;  %v9727_v19 = vmul.f32 0.044715, %v9716_v24 }
0x27cc   :  { %v9677_v15 = vpop.f32.mrf.mxu0  ;;  %v9718_v59 = vpop.f32.mrf.mxu1  ;;  %v9721_v41 = vmul.f32 0.5, %v9675_v23  ;;  %v9723_v18 = vmul.f32 0.5, %v9716_v24 }
0x27cd   :  { %v9732_v14 = vmul.f32 %v9728_v0, %v9673_v42  ;;  %v9734_v30 = vmul.f32 %v9730_v2, %v9714_v4  ;;  %v9729_v31 = vmul.f32 %v9725_v3, %v9675_v23  ;;  %v9731_v33 = vmul.f32 %v9727_v19, %v9716_v24 }
0x27ce   :  { %v10136_v3 = vrot.slane %v13393_v5, %v13026_v53  ;;  %v10140_v19 = vrot.slane %v13396_v6, %v13026_v53  ;;  %v10144_v59 = vrot.slane %v13399_v50, %v13026_v53  ;;  %v10164_v5 = vrot.slane %v13552_v8, %v13026_v53  ;;  %v14180_v6 = vld [vmem:[#allocation28_spill] sm:$0xff] }
0x27cf   :  { %v9736_v61 = vadd.f32 %v9732_v14, %v9673_v42  ;;  %v9738_v60 = vadd.f32 %v9734_v30, %v9714_v4  ;;  %v9733_v22 = vmul.f32 %v9729_v31, %v9675_v23  ;;  %v9735_v40 = vmul.f32 %v9731_v33, %v9716_v24 }
0x27d0   :  { %v10148_v14 = vrot.slane %v13402_v25, %v13026_v53 }
0x27d1   :  { %v9740_v46 = vmul.f32 0.7978846, %v9736_v61  ;;  %v9742_v34 = vmul.f32 0.7978846, %v9738_v60  ;;  %v9737_v51 = vadd.f32 %v9733_v22, %v9675_v23  ;;  %v9739_v10 = vadd.f32 %v9735_v40, %v9716_v24 }
0x27d2   :  { %v10160_v61 = vrot.slane %v13549_v36, %v13026_v53  ;;  %v10168_v22 = vrot.slane %v14180_v6, %v13026_v53  ;;  %v14184_v36 = vld [vmem:[#allocation26_spill] sm:$0xff] }
0x27d3   :  { %12617 = vtanh.f32 %v9742_v34  ;;  %v9741_v13 = vmul.f32 0.7978846, %v9737_v51  ;;  %v9743_v9 = vmul.f32 0.7978846, %v9739_v10  ;;  %v14182_v34 = vld [vmem:[#allocation25_spill] sm:$0xff] }
0x27d4   :  { %12619 = vtanh.f32 %v9740_v46  ;;  %v14181_v46 = vld [vmem:[#allocation24_spill] sm:$0xff]  ;;  %v14183_v51 = vld [vmem:[#allocation29_spill] sm:$0xff] }
0x27d5   :  { %12621 = vtanh.f32 %v9741_v13  ;;  %v10250_v25 = vsel %vm10249_vm7, %v14181_v46, %v10136_v3  ;;  %v10172_v10 = vrot.slane %v14183_v51, %v13026_v53  ;;  %v10252_v13 = vsel %vm10249_vm7, %v14184_v36, %v10144_v59  ;;  %v12450_v36 = vld [vmem:[#allocation16 + $0x30] sm:$0xff]  }
0x27d6   :  { %12623 = vtanh.f32 %v9743_v9  ;;  %v14185_v9 = vld [vmem:[#allocation27_spill] sm:$0xff] }
0x27d7   :  { %v10253_v8 = vsel %vm10249_vm7, %v14185_v9, %v10148_v14  ;;  %v12452_v9 = vld [vmem:[#allocation16 + $0x20] sm:$0xff]  }
0x27e0   :  { %v12618_v11 = vpop.eup %12617 }
0x27e1   :  { %v12620_v35 = vpop.eup %12619  ;;  %v9750_v58 = vadd.f32 1.0, %v12618_v11  ;;  %v14186_v11 = vld [vmem:[#allocation30_spill] sm:$0xff] }
0x27e2   :  { %v12622_v32 = vpop.eup %12621  ;;  %v9748_v7 = vadd.f32 1.0, %v12620_v35  ;;  %v10184_v35 = vrot.slane %v14186_v11, %v13026_v53  ;;  %v12454_v11 = vld [vmem:[#allocation16 + $0x10] sm:$0xff]  }
0x27e3   :  { %v12624_v52 = vpop.eup %12623  ;;  %v9749_v29 = vadd.f32 1.0, %v12622_v32  ;;  %v9754_v45 = vmul.f32 %v9750_v58, %v9722_v44  ;;  %v10255_v32 = vsel %vm10254_vm8, %v10250_v25, %v10160_v61 }
0x27e4   :  { %v9751_v17 = vadd.f32 1.0, %v12624_v52  ;;  %v9752_v28 = vmul.f32 %v9748_v7, %v9720_v48  ;;  %v14187_v48 = vld [vmem:[#allocation31_spill] sm:$0xff]  ;;  %v14188_v52 = vld [vmem:[#allocation32_spill] sm:$0xff] }
0x27e5   :  { %v9753_v43 = vmul.f32 %v9749_v29, %v9721_v41  ;;  %v9758_v0 = vpack.c.bf16 %v9754_v45, %v9754_v45  ;;  %v10188_v7 = vrot.slane %v14187_v48, %v13026_v53  ;;  %v10192_v44 = vrot.slane %v14188_v52, %v13026_v53  ;;  %v11060_v52 = vld [vmem:[#allocation8] ss:$0 sm:$0xff] }
0x27e6   :  { %v9755_v47 = vmul.f32 %v9751_v17, %v9723_v18  ;;  %v9756_v63 = vpack.c.bf16 %v9752_v28, %v9752_v28  ;;  %v10257_v29 = vsel %vm10254_vm8, %v10252_v13, %v10168_v22  ;;  %v10258_v28 = vsel %vm10254_vm8, %v10253_v8, %v10172_v10  ;;  %v12449_v10 = vld [vmem:[#allocation16 + $0x38] sm:$0xff]   ;;  %v12451_v13 = vld [vmem:[#allocation16 + $0x28] sm:$0xff]  }
0x27e7   :  { %v9757_v49 = vpack.c.bf16 %v9753_v43, %v9753_v43  ;;  %v14189_v43 = vld [vmem:[#allocation33_spill] sm:$0xff]  ;;  %v12453_v8 = vld [vmem:[#allocation16 + $0x18] sm:$0xff]  }
0x27e8   :  { %v9759_v1 = vpack.c.bf16 %v9755_v47, %v9755_v47  ;;  %v10196_v45 = vrot.slane %v14189_v43, %v13026_v53  ;;  %v10208_v47 = vrot.slane %v13851_v57, %v13026_v53 }
0x27e9   :  { %10048 = vmatprep.mubr.bf16.mxu0 %v9757_v49  ;;  %v10212_v49 = vrot.slane %v13854_v39, %v13026_v53 }
0x27ea   :  { %10088 = vmatprep.mubr.bf16.mxu1 %v9759_v1  ;;  %10049 = vmatmul.mubr.bf16.vlgmr.msra.gmra.mxu0 %v9756_v63  ;;  %v10260_v1 = vsel %vm10259_vm9, %v10255_v32, %v10184_v35  ;;  %v12455_v35 = vld [vmem:[#allocation16 + $0x8] sm:$0xff]  }
0x27eb   :  { %10089 = vmatmul.mubr.bf16.vlgmr.msra.gmra.mxu1 %v9758_v0  ;;  %11872 = vmatprep.mubr.msk.bf16.mxu0 %vm12868_vm1, %v14172_v37 }
0x27ec   :  { %11857 = vmatpush3.bf16.msra.mxu0 %v12449_v10 }
0x27ed   :  { %11858 = vmatprep.subr.bf16.mxu0 %v14172_v37 }
0x27f0   :  { %11859 = vmatpush3.bf16.msra.mxu0 %v12450_v36 }
0x27f1   :  { %11860 = vmatprep.subr.bf16.mxu0 %v14172_v37 }
0x27f4   :  { %11861 = vmatpush3.bf16.msra.mxu0 %v12451_v13 }
0x27f5   :  { %11862 = vmatprep.subr.bf16.mxu0 %v14172_v37 }
0x27f8   :  { %11863 = vmatpush3.bf16.msra.mxu0 %v12452_v9 }
0x27f9   :  { %11864 = vmatprep.subr.bf16.mxu0 %v14172_v37 }
0x27fc   :  { %11865 = vmatpush3.bf16.msra.mxu0 %v12453_v8 }
0x27fd   :  { %11866 = vmatprep.subr.bf16.mxu0 %v14172_v37 }
0x2800   :  { %11867 = vmatpush3.bf16.msra.mxu0 %v12454_v11 }
0x2801   :  { %11868 = vmatprep.subr.bf16.mxu0 %v14172_v37 }
0x2804   :  { %11869 = vmatpush3.bf16.msra.mxu0 %v12455_v35 }
0x2805   :  { %11870 = vmatprep.subr.bf16.mxu0 %v14172_v37 }
0x28aa   :  { %v11459_v42 = vpop.f32.mrf.mxu0 }
0x28ab   :  { %v11481_v4 = vpop.f32.mrf.mxu1 }
0x28ac   :  { %v11460_v23 = vpop.f32.mrf.mxu0 }
0x28ad   :  { %v11461_v24 = vadd.f32 %v11460_v23, %v11459_v42  ;;  %v11482_v2 = vpop.f32.mrf.mxu1  ;;  %v10262_v23 = vsel %vm10259_vm9, %v10257_v29, %v10192_v44  ;;  %v10353_v44 = vrot.slane %v11060_v52, %v13003_v12 }
0x28ae   :  { %v11462_v15 = vpop.f32.mrf.mxu0  ;;  %v11483_v31 = vadd.f32 %v11482_v2, %v11481_v4 }
0x28af   :  { %v10051_v30 = vadd.f32 %v13844_v20, %v11461_v24  ;;  %v11484_v33 = vpop.f32.mrf.mxu1  ;;  %v10251_v20 = vsel %vm10249_vm7, %v14182_v34, %v10140_v19  ;;  %v10216_v24 = vrot.slane %v13857_v62, %v13026_v53  ;;  %v10220_v19 = vrot.slane %v13860_v38, %v13026_v53 }
0x28b0   :  { %v11463_v60 = vpop.f32.mrf.mxu0  ;;  %v10256_v41 = vsel %vm10254_vm8, %v10251_v20, %v10164_v5  ;;  %v10264_v15 = vsel %vm427_vm0, %v10260_v1, %v10208_v47  ;;  %v10361_v29 = vrot.slane %v10353_v44, %v13003_v12 }
0x28b1   :  { %v10091_v40 = vadd.f32 %v11483_v31, %v10051_v30  ;;  %v11485_v50 = vpop.f32.mrf.mxu1  ;;  %v10261_v4 = vsel %vm10259_vm9, %v10256_v41, %v10188_v7  ;;  %v10266_v30 = vsel %vm427_vm0, %v10262_v23, %v10216_v24  ;;  %v10354_v41 = vcombine.high %v10353_v44, %v10353_v44 }
0x28b2   :  { %v10265_v62 = vsel %vm427_vm0, %v10261_v4, %v10212_v49 }
0x28b3   :  { %v10103_v58 = vrot.slane %v10091_v40, %v13003_v12 }
0x28b5   :  { %v10104_v18 = vcombine.high %v10103_v58, %v10103_v58  ;;  %v10111_v17 = vrot.slane %v10103_v58, %v13003_v12  ;;  %v12456_v58 = vld [vmem:[#allocation16] sm:$0xff]  }
0x28b6   :  { %11871 = vmatpush3.bf16.msra.mxu0 %v12456_v58 }
0x28b7   :  { %v10118_v63 = vrot.slane %v10104_v18, %v13003_v12  ;;  %v10119_v0 = vcombine.high %v10111_v17, %v10111_v17  ;;  %v14033_v42 = vadd.f32 %v10111_v17, %v13945_v16  ;;  %v10263_v16 = vsel %vm10259_vm9, %v10258_v28, %v10196_v45 }
0x28b8   :  { %v10267_v6 = vsel %vm427_vm0, %v10263_v16, %v10220_v19  ;;  %v10368_v18 = vrot.slane %v10354_v41, %v13003_v12  ;;  %v10369_v28 = vcombine.high %v10361_v29, %v10361_v29 }
0x28b9   :  { %v10120_v57 = vcombine.high %v10118_v63, %v10118_v63  ;;  %v14040_v2 = vadd.f32 %v10118_v63, %v13942_v27  ;;  %v14043_v39 = vadd.f32 %v10119_v0, %v13950_v21  ;;  %v10232_v3 = vrot.slane %v14033_v42, %v13026_v53 }
0x28ba   :  { %v10283_v38 = vmul.f32 %v14033_v42, %v14033_v42  ;;  %v10370_v43 = vcombine.high %v10368_v18, %v10368_v18 }
0x28bb   :  { %v14053_v59 = vadd.f32 %v10120_v57, %v13955_v26  ;;  %v10236_v27 = vrot.slane %v14040_v2, %v13026_v53  ;;  %v10240_v21 = vrot.slane %v14043_v39, %v13026_v53  ;;  %v10269_v14 = vsel %vm10268_vm10, %v10264_v15, %v10232_v3 }
0x28bc   :  { %10273 = vst [vmem:[%s14144_s16] sm:$0x3f] %v10269_v14  ;;  %v10284_v26 = vmul.f32 %v14040_v2, %v14040_v2  ;;  %v10285_v31 = vmul.f32 %v14043_v39, %v14043_v39 }
0x28bd   :  { %v10244_v33 = vrot.slane %v14053_v59, %v13026_v53  ;;  %v10270_v61 = vsel %vm10268_vm10, %v10265_v62, %v10236_v27  ;;  %v10271_v60 = vsel %vm10268_vm10, %v10266_v30, %v10240_v21  ;;  %v10286_v5 = vmul.f32 %v14053_v59, %v14053_v59  ;;  %v11061_v30 = vld [vmem:[%s14143_s15] ss:$0 sm:$0xff]  ;;  %s12869_s15 = smov [#allocation17]  }
0x28be   :  { %10274 = vst [vmem:[%s14144_s16 + $0x8] sm:$0x3f] %v10270_v61  ;;  %10275 = vst [vmem:[%s14144_s16 + $0x10] sm:$0x3f] %v10271_v60  ;;  %v10291_v22 = vcombine.low %v10283_v38, %v10284_v26  ;;  %s10566_s21 = sshll.u32 %s12869_s15, 4  ;;  %s10567_s21 = int_to_ptr.vmem [resolvable:$true] %s10566_s21 }
0x28bf   :  { %v10272_v40 = vsel %vm10268_vm10, %v10267_v6, %v10244_v33  ;;  %v10292_v50 = vcombine.low %v10285_v31, %v10286_v5  ;;  %s12817_s9 = scalar_lea.vmem %s10567_s21, 64  ;;  %p12822_p4 = scmp.lt.s32.totalorder %s10567_s21, %s10567_s21 }
0x28c0   :  { %10276 = vst [vmem:[%s14144_s16 + $0x18] sm:$0x3f] %v10272_v40  ;;  %v10299_v46 = vrot.slane %v10291_v22, %v13003_v12  ;;  %p12818_p3 = scmp.ne.s32.totalorder %s10567_s21, %s12817_s9  ;;  %p12823_p5 = scmp.lt.s32.totalorder %s12817_s9, %s12817_s9 }
0x28c1   :  { %v10306_v25 = vrot.slane %v10292_v50, %v13003_v12 }
0x28c2   :  { %p12824_p6 = por %p12823_p5, %p12822_p4 }
0x28c3   :  { %v10307_v34 = vcombine.low %v10299_v46, %v10306_v25  ;;  %v11070_v46 = vld [vmem:[%s14133_s5] ss:$0 sm:$0xff] }
0x28c4   :  { %p12825_p7 = pnand %p12824_p6, %p12818_p3 }
0x28c5   :  { %v10314_v20 = vrot.slane %v10307_v34, %v13003_v12 }
0x28c7   :  { %v10316_v51 = vsel %vm427_vm0, %v10314_v20, 0.0 }
0x28c8   :  { %10317 = vadd.xlane.f32.xlu0 %v10316_v51 }
0x2951   :  { %v10318_v32 = vpop.xlane.xlu0 %10317 }
0x2952   :  { %v10319_v48 = vmul.f32 0.0078125, %v10318_v32 }
0x2954   :  { %v10320_v7 = vadd.f32 1e-06, %v10319_v48 }
0x2956   :  { %12625 = vrsqrt.f32 %v10320_v7 }
0x2963   :  { %v12626_v17 = vpop.eup %12625 }
0x2964   :  { %v10326_v45 = vrot.slane %v12626_v17, %v13026_v53  ;;  %v10330_v37 = vrot.slane %v12626_v17, %v13029_v54  ;;  %v10334_v47 = vrot.slane %v12626_v17, %v13032_v55  ;;  %v10338_v49 = vrot.slane %v12626_v17, %v13035_v56 }
0x2966   :  { %v10343_v1 = vmul.f32 %v10326_v45, %v14033_v42  ;;  %v10344_v63 = vmul.f32 %v10330_v37, %v14040_v2  ;;  %v10345_v0 = vmul.f32 %v10334_v47, %v14043_v39  ;;  %v10346_v4 = vmul.f32 %v10338_v49, %v14053_v59 }
0x2968   :  { %v10375_v23 = vmul.f32 %v10361_v29, %v10343_v1  ;;  %v10376_v24 = vmul.f32 %v10368_v18, %v10344_v63  ;;  %v10377_v57 = vmul.f32 %v10369_v28, %v10345_v0  ;;  %v10378_v3 = vmul.f32 %v10370_v43, %v10346_v4 }
0x296a   :  { %v10379_v16 = vpack.c.bf16 %v10375_v23, %v10375_v23  ;;  %v10380_v53 = vpack.c.bf16 %v10376_v24, %v10376_v24  ;;  %v10381_v19 = vpack.c.bf16 %v10377_v57, %v10377_v57  ;;  %v10382_v54 = vpack.c.bf16 %v10378_v3, %v10378_v3 }
0x296c   :  { %v10411_v15 = vunpack.c.l.b16 %v10380_v53  ;;  %v10412_v55 = vunpack.c.l.b16 %v10381_v19  ;;  %v10413_v62 = vunpack.c.l.b16 %v10382_v54  ;;  %v10410_v56 = vunpack.c.l.b16 %v10379_v16 }
0x296e   :  { %v10414_v27 = vrot.slane %v10411_v15, 7  ;;  %v10416_v42 = vrot.slane %v10412_v55, 6  ;;  %v10418_v21 = vrot.slane %v10413_v62, 5 }
0x2970   :  { %v10415_v2 = vsel %vm521_vm2, %v10414_v27, %v10410_v56 }
0x2971   :  { %v10417_v39 = vsel %vm524_vm3, %v10416_v42, %v10415_v2 }
0x2972   :  { %v10419_v59 = vsel %vm527_vm4, %v10418_v21, %v10417_v39 }
0x2973   :  { %v10420_v14 = vpack.c.b16 %v10419_v59, %v10419_v59 }
0x2975   :  { %11873 = vmatmul.mubr.bf16.vlgmr.msra.gmra.mxu0 %v10420_v14 }
0x2a35   :  { %v10504_v38 = vpop.f32.mrf.mxu0 }
0x2a36   :  { %v10505_v26 = vadd.f32 %v11061_v30, %v10504_v38 }
0x2a37   :  { %v11874_v31 = vpop.f32.mrf.mxu0 }
0x2a38   :  { %v10517_v33 = vmul.f32 %v10505_v26, %v10505_v26 }
0x2a39   :  { %v10507_v61 = vpop.f32.mrf.mxu0 }
0x2a3a   :  { %v10518_v60 = vsel %vm427_vm0, %v10517_v33, 0.0 }
0x2a3b   :  { %10519 = vadd.xlane.f32.xlu1 %v10518_v60  ;;  %v11875_v5 = vpop.f32.mrf.mxu0 }
0x2ac4   :  { %v10520_v6 = vpop.xlane.xlu1 %10519 }
0x2ac5   :  { %v10521_v22 = vmul.f32 0.0078125, %v10520_v6 }
0x2ac7   :  { %v10522_v40 = vadd.f32 1e-06, %v10521_v22 }
0x2ac9   :  { %12627 = vrsqrt.f32 %v10522_v40 }
0x2ad6   :  { %v12628_v50 = vpop.eup %12627 }
0x2ad7   :  { %v10524_v25 = vmul.f32 %v12628_v50, %v10505_v26 }
0x2ad9   :  { %v10525_v34 = vmul.f32 %v11070_v46, %v10524_v25 }
0x2adb   :  { %v10533_v20 = vrot.slane %v10525_v34, %v13003_v12 }
0x2add   :  { %v10534_v51 = vcombine.high %v10533_v20, %v10533_v20  ;;  %v10541_v10 = vrot.slane %v10533_v20, %v13003_v12  ;;  %11071 = vst.sshfl [vmem:[#allocation17] sm:$0x1 pattern:$0x73625140] %v10533_v20 }
0x2adf   :  { %v10548_v36 = vrot.slane %v10534_v51, %v13003_v12  ;;  %v10549_v13 = vcombine.high %v10541_v10, %v10541_v10  ;;  %11072 = vst.sshfl [vmem:[#allocation17 + $0x1] sm:$0x1 pattern:$0x73625140] %v10534_v51 }
0x2ae1   :  { %v10550_v9 = vcombine.high %v10548_v36, %v10548_v36  ;;  %10557 = vst [vmem:[#allocation17 + $0x2] sm:$0x1] %v10549_v13 }
0x2ae3   :  { %10558 = vst [vmem:[#allocation17 + $0x3] sm:$0x1] %v10550_v9 }
0x2ae4   :  { %12828 = shalt.err (!%p12825_p7)
}
0x2ae5   :  { %s14190_s5 = smov 1  }
0x2ae6   :  { %10572 = dma.vmem_to_hbm [thread:$0]  %s10567_s21, 64, %s14145_s17, [#allocation4], %s14167_s24, %s14167_s24, %s14190_s5  }
0x2ae7   :  { %12847 = dma.done.wait [#allocation4], 64  }
0x2ae8   :  { %12848 = vsyncadd [#allocation4], 4294967232 }
0x2ae9   :  { %10578 = vsyncpa [#allocation3], 1 }
0x2aea   :  { %10579 = vsyncpa [#allocation6], 1 }
0x2aeb   :  { %10580 = vsyncpa [#allocation9], 1 }
0x2aec   :  { %10581 = vsyncpa [#allocation12], 1 }
0x2aed   :  { %10582 = vsyncpa [#allocation15], 1 }
0x2aee   :  { %10583 = vsyncpa [#allocation4], 1 }

</bundles_post_ra>
